<compile_context>
chip_gen: v6e
topology: v6e:2x2x1
jax: 0.10.0
libtpu: 0.0.40
codegen_flags: <defaults>
</compile_context>

<pallas_src>
import functools

import jax
import jax.numpy as jnp
from jax import lax
from jax.experimental import pallas as pl
from jax.experimental.pallas import tpu as pltpu


def _attention_kernel(x_ref, g_ref, wqkv_ref, wo_ref, bo_ref, o_ref,
                      qkv_scr, head_scr, *, heads, dim_heads, channels):
    """Fused attention for one batch item (channel-major layout).

    x_ref    : (1, C, N)     input; channels on sublanes, tokens on lanes
    g_ref    : (C, 1)        RMSNorm gain
    wqkv_ref : (3*H*dh, C)   fused QKV 1x1-conv weight (bf16, scale in Q rows)
    wo_ref   : (C, H*dh)     output-projection 1x1-conv weight (bf16)
    bo_ref   : (C, 1)        output-projection bias
    o_ref    : (1, C, N)     output (lane-dense store)
    qkv_scr  : (3*H*dh, N)   bf16 VMEM scratch
    head_scr : (H*dh, N)     bf16 VMEM scratch (concatenated head outputs)
    """
    hidden = heads * dim_heads
    gain = channels ** 0.5

    x = x_ref[0]                                               # (C, N) f32
    # RMSNorm over channels: x / max(||x||_2, 1e-12) * g * sqrt(C)
    ss = jnp.sum(x * x, axis=0, keepdims=True)                 # (1, N)
    inv = lax.rsqrt(jnp.maximum(ss, 1e-24))                    # EUP rsqrt
    xn = (x * inv) * (g_ref[...] * gain)                       # (C, N) f32

    # Fused QKV projection: one (3*hidden, C) @ (C, N) MXU matmul, bf16 operands,
    # f32 accumulation.  Attention scale is already folded into the Q rows.
    qkv_scr[...] = jnp.dot(
        wqkv_ref[...], xn.astype(jnp.bfloat16),
        preferred_element_type=jnp.float32).astype(jnp.bfloat16)

    def head_body(h, carry):
        q0 = pl.multiple_of(h * dim_heads, dim_heads)
        k0 = pl.multiple_of(hidden + h * dim_heads, dim_heads)
        v0 = pl.multiple_of(2 * hidden + h * dim_heads, dim_heads)
        qh = qkv_scr[pl.ds(q0, dim_heads), :]                  # (dh, N) bf16
        kh = qkv_scr[pl.ds(k0, dim_heads), :]                  # (dh, N) bf16
        vh = qkv_scr[pl.ds(v0, dim_heads), :]                  # (dh, N) bf16
        # sim[i, j] = sum_d q[d, i] * k[d, j]  (transposed contraction on MXU)
        sim = lax.dot_general(qh, kh, (((0,), (0,)), ((), ())),
                              preferred_element_type=jnp.float32)   # (N, N)
        m = jnp.max(sim, axis=-1, keepdims=True)
        p = jnp.exp(sim - m)
        l = jnp.sum(p, axis=-1, keepdims=True)
        attn = (p * pl.reciprocal(l, approx=True)).astype(jnp.bfloat16)
        # attn_dropout(p=0.0) is the identity -> nothing to do.
        # out_h[d, i] = sum_j v[d, j] * attn[i, j]
        oh = lax.dot_general(vh, attn, (((1,), (1,)), ((), ())),
                             preferred_element_type=jnp.float32)    # (dh, N)
        head_scr[pl.ds(q0, dim_heads), :] = oh.astype(jnp.bfloat16)
        return carry

    lax.fori_loop(0, heads, head_body, 0, unroll=True)

    # Fused output projection: single (C, hidden) @ (hidden, N) matmul + bias.
    out = jnp.dot(wo_ref[...], head_scr[...],
                  preferred_element_type=jnp.float32)          # (C, N)
    o_ref[0] = out + bo_ref[...]


def attention_forward(x, g, w_qkv, w_out, b_out, *, heads, dim_heads):
    """Pallas equivalent of Attention(dim, heads, dim_heads).forward(x).

    x     : (B, C, H, W)
    g     : (C,)                     RMSNorm gain
    w_qkv : (3*heads*dim_heads, C)   1x1 conv weight (no bias)
    w_out : (C, heads*dim_heads)     1x1 conv weight
    b_out : (C,)                     1x1 conv bias
    """
    b, c, hgt, wid = x.shape
    n = hgt * wid
    hidden = heads * dim_heads
    assert w_qkv.shape == (3 * hidden, c)
    assert w_out.shape == (c, hidden)

    # Channel-major tokens: (B, C, N). Pure reshape — no HBM transpose.
    x_cm = x.reshape(b, c, n).astype(jnp.float32)

    # Fold the attention scale (dh**-0.5) into the Q rows of the fused weight,
    # and cast matmul weights to bf16 (f32 accumulation in-kernel).
    scale = dim_heads ** -0.5
    row_scale = jnp.concatenate([
        jnp.full((hidden, 1), scale, jnp.float32),
        jnp.ones((2 * hidden, 1), jnp.float32)], axis=0)
    wqkv = (w_qkv.astype(jnp.float32) * row_scale).astype(jnp.bfloat16)  # (3*hidden, C)
    wo = w_out.astype(jnp.bfloat16)                                      # (C, hidden)
    g_r = g.reshape(c, 1).astype(jnp.float32)
    bo = b_out.reshape(c, 1).astype(jnp.float32)

    kernel = functools.partial(
        _attention_kernel, heads=heads, dim_heads=dim_heads, channels=c)

    out_cm = pl.pallas_call(
        kernel,
        out_shape=jax.ShapeDtypeStruct((b, c, n), jnp.float32),
        grid=(b,),
        in_specs=[
            pl.BlockSpec((1, c, n), lambda i: (i, 0, 0)),            # per-batch block
            pl.BlockSpec((c, 1), lambda i: (0, 0)),                  # resident weights
            pl.BlockSpec((3 * hidden, c), lambda i: (0, 0)),
            pl.BlockSpec((c, hidden), lambda i: (0, 0)),
            pl.BlockSpec((c, 1), lambda i: (0, 0)),
        ],
        out_specs=pl.BlockSpec((1, c, n), lambda i: (i, 0, 0)),      # lane-dense store
        scratch_shapes=[
            pltpu.VMEM((3 * hidden, n), jnp.bfloat16),               # qkv
            pltpu.VMEM((hidden, n), jnp.bfloat16),                   # concat head outs
        ],
        compiler_params=pltpu.CompilerParams(
            dimension_semantics=("parallel",)),                      # both TCs on v7x
    )(x_cm, g_r, wqkv, wo, bo)

    return out_cm.reshape(b, c, hgt, wid)


def _reference(x, g, w_qkv, w_out, b_out, *, heads, dim_heads):
    """Pure-JAX f32 reference matching the PyTorch module semantics."""
    b, c, hgt, wid = x.shape
    n = hgt * wid
    hidden = heads * dim_heads
    norm = jnp.sqrt(jnp.sum(x * x, axis=1, keepdims=True))
    xn = x / jnp.maximum(norm, 1e-12) * g.reshape(1, c, 1, 1) * (c ** 0.5)
    xt = xn.reshape(b, c, n)
    qkv = jnp.einsum('oc,bcn->bon', w_qkv, xt)                 # 1x1 conv, no bias
    q, k, v = jnp.split(qkv, 3, axis=1)

    def heads_view(t):  # 'b (h c) (x y) -> b h (x y) c'
        return jnp.transpose(t.reshape(b, heads, dim_heads, n), (0, 1, 3, 2))

    q, k, v = heads_view(q), heads_view(k), heads_view(v)
    sim = jnp.einsum('bhid,bhjd->bhij', q, k) * dim_heads ** -0.5
    attn = jax.nn.softmax(sim, axis=-1)
    out = jnp.einsum('bhij,bhjd->bhid', attn, v)
    out = jnp.transpose(out, (0, 1, 3, 2)).reshape(b, hidden, n)  # 'b h n d -> b (h d) n'
    out = jnp.einsum('oc,bcn->bon', w_out, out) + b_out.reshape(1, c, 1)
    return out.reshape(b, c, hgt, wid)


if __name__ == "__main__":
    key = jax.random.PRNGKey(0)
    B, DIM, H, W = 2, 32, 16, 16        # N = 256 tokens (lane-dense)
    HEADS, DIM_HEADS = 4, 32            # module defaults
    HIDDEN = HEADS * DIM_HEADS

    kx, kg, kq, ko, kb = jax.random.split(key, 5)
    x = jax.random.normal(kx, (B, DIM, H, W), dtype=jnp.float32)
    g = 1.0 + 0.1 * jax.random.normal(kg, (DIM,), dtype=jnp.float32)
    w_qkv = 0.05 * jax.random.normal(kq, (3 * HIDDEN, DIM), dtype=jnp.float32)
    w_out = 0.05 * jax.random.normal(ko, (DIM, HIDDEN), dtype=jnp.float32)
    b_out = 0.02 * jax.random.normal(kb, (DIM,), dtype=jnp.float32)

    out = attention_forward(x, g, w_qkv, w_out, b_out,
                            heads=HEADS, dim_heads=DIM_HEADS)
    out = jax.block_until_ready(out)

    ref = _reference(x, g, w_qkv, w_out, b_out, heads=HEADS, dim_heads=DIM_HEADS)
    assert out.shape == (B, DIM, H, W), out.shape
    # bf16 MXU operands + approx reciprocal -> loosened tolerance vs f32 reference.
    max_err = float(jnp.max(jnp.abs(out - ref)))
    assert jnp.allclose(out, ref, atol=3e-2, rtol=3e-2), max_err

    print("KERNEL_OK")
</pallas_src>

<mosaic_0001>
module attributes {stable_mosaic.version = 11 : i64} {
  func.func @_attention_kernel(%arg0: i32, %arg1: memref<1x32x256xf32, #tpu.memory_space<vmem>>, %arg2: memref<32x1xf32, #tpu.memory_space<vmem>>, %arg3: memref<384x32xbf16, #tpu.memory_space<vmem>>, %arg4: memref<32x128xbf16, #tpu.memory_space<vmem>>, %arg5: memref<32x1xf32, #tpu.memory_space<vmem>>, %arg6: memref<1x32x256xf32, #tpu.memory_space<vmem>>, %arg7: memref<384x256xbf16, #tpu.memory_space<vmem>>, %arg8: memref<128x256xbf16, #tpu.memory_space<vmem>>) attributes {dimension_semantics = [#tpu.dimension_semantics<parallel>], iteration_bounds = array<i64: 2>, scalar_prefetch = 0 : i64, scratch_operands = 2 : i64, tpu.core_type = #tpu.core_type<tc>, window_params = [{transform_indices = @transform_0, window_bounds = array<i64: 1, 32, 256>}, {pipeline_mode = #tpu.pipeline_mode<synchronous>, transform_indices = @transform_1, window_bounds = array<i64: 32, 1>}, {pipeline_mode = #tpu.pipeline_mode<synchronous>, transform_indices = @transform_2, window_bounds = array<i64: 384, 32>}, {pipeline_mode = #tpu.pipeline_mode<synchronous>, transform_indices = @transform_3, window_bounds = array<i64: 32, 128>}, {pipeline_mode = #tpu.pipeline_mode<synchronous>, transform_indices = @transform_4, window_bounds = array<i64: 32, 1>}, {transform_indices = @transform_5, window_bounds = array<i64: 1, 32, 256>}]} {
    %c0 = arith.constant 0 : index
    %c0_0 = arith.constant 0 : index
    %c0_1 = arith.constant 0 : index
    %0 = vector.load %arg1[%c0, %c0_0, %c0_1] : memref<1x32x256xf32, #tpu.memory_space<vmem>>, vector<1x32x256xf32>
    %1 = vector.shape_cast %0 : vector<1x32x256xf32> to vector<32x256xf32>
    %2 = arith.mulf %1, %1 : vector<32x256xf32>
    %cst = arith.constant dense<0.000000e+00> : vector<256xf32>
    %3 = vector.multi_reduction <add>, %2, %cst [0] : vector<32x256xf32> to vector<256xf32>
    %4 = vector.shape_cast %3 : vector<256xf32> to vector<1x256xf32>
    %cst_2 = arith.constant 1.000000e-24 : f32
    %5 = vector.broadcast %cst_2 : f32 to vector<1x256xf32>
    %6 = arith.maximumf %4, %5 : vector<1x256xf32>
    %7 = math.rsqrt %6 : vector<1x256xf32>
    %8 = vector.broadcast %7 : vector<1x256xf32> to vector<32x256xf32>
    %9 = arith.mulf %1, %8 : vector<32x256xf32>
    %c0_3 = arith.constant 0 : index
    %c0_4 = arith.constant 0 : index
    %10 = vector.load %arg2[%c0_3, %c0_4] : memref<32x1xf32, #tpu.memory_space<vmem>>, vector<32x1xf32>
    %cst_5 = arith.constant 5.65685415 : f32
    %11 = vector.broadcast %cst_5 : f32 to vector<32x1xf32>
    %12 = arith.mulf %10, %11 : vector<32x1xf32>
    %13 = vector.broadcast %12 : vector<32x1xf32> to vector<32x256xf32>
    %14 = arith.mulf %9, %13 : vector<32x256xf32>
    %c0_6 = arith.constant 0 : index
    %c0_7 = arith.constant 0 : index
    %15 = vector.load %arg3[%c0_6, %c0_7] : memref<384x32xbf16, #tpu.memory_space<vmem>>, vector<384x32xbf16>
    %16 = arith.truncf %14 : vector<32x256xf32> to vector<32x256xbf16>
    %cst_8 = arith.constant dense<0.000000e+00> : vector<384x256xf32>
    %17 = tpu.matmul %15, %16, %cst_8 {dimension_numbers = #tpu.dot_dimension_numbers<[1], [0], [0], [1], [0, 0, 1, 1], [], []>} : vector<384x32xbf16>, vector<32x256xbf16>, vector<384x256xf32> -> vector<384x256xf32>
    %18 = arith.truncf %17 : vector<384x256xf32> to vector<384x256xbf16>
    %c0_9 = arith.constant 0 : index
    %c0_10 = arith.constant 0 : index
    %19 = vector.load %arg7[%c0_9, %c0_10] : memref<384x256xbf16, #tpu.memory_space<vmem>>, vector<384x256xbf16>
    tpu.vector_store %arg7[%c0_9, %c0_10], %18 {strides = array<i32>} : memref<384x256xbf16, #tpu.memory_space<vmem>>, vector<384x256xbf16>,
    %c0_i32 = arith.constant 0 : i32
    %c32_i32 = arith.constant 32 : i32
    %20 = arith.muli %c0_i32, %c32_i32 : i32
    %21 = tpu.assume_multiple %20, 32 : i32
    %c32_i32_11 = arith.constant 32 : i32
    %22 = arith.muli %c0_i32, %c32_i32_11 : i32
    %c128_i32 = arith.constant 128 : i32
    %23 = arith.addi %c128_i32, %22 : i32
    %24 = tpu.assume_multiple %23, 32 : i32
    %c32_i32_12 = arith.constant 32 : i32
    %25 = arith.muli %c0_i32, %c32_i32_12 : i32
    %c256_i32 = arith.constant 256 : i32
    %26 = arith.addi %c256_i32, %25 : i32
    %27 = tpu.assume_multiple %26, 32 : i32
    %28 = arith.index_cast %21 : i32 to index
    %c0_13 = arith.constant 0 : index
    %29 = vector.load %arg7[%28, %c0_13] : memref<384x256xbf16, #tpu.memory_space<vmem>>, vector<32x256xbf16>
    %30 = arith.index_cast %24 : i32 to index
    %c0_14 = arith.constant 0 : index
    %31 = vector.load %arg7[%30, %c0_14] : memref<384x256xbf16, #tpu.memory_space<vmem>>, vector<32x256xbf16>
    %32 = arith.index_cast %27 : i32 to index
    %c0_15 = arith.constant 0 : index
    %33 = vector.load %arg7[%32, %c0_15] : memref<384x256xbf16, #tpu.memory_space<vmem>>, vector<32x256xbf16>
    %cst_16 = arith.constant dense<0.000000e+00> : vector<256x256xf32>
    %34 = tpu.matmul %29, %31, %cst_16 {dimension_numbers = #tpu.dot_dimension_numbers<[0], [0], [1], [1], [0, 1, 1, 1], [], []>} : vector<32x256xbf16>, vector<32x256xbf16>, vector<256x256xf32> -> vector<256x256xf32>
    %cst_17 = arith.constant dense<0xFF800000> : vector<256xf32>
    %35 = vector.multi_reduction <maximumf>, %34, %cst_17 [1] : vector<256x256xf32> to vector<256xf32>
    %36 = vector.shape_cast %35 : vector<256xf32> to vector<256x1xf32>
    %37 = vector.broadcast %36 : vector<256x1xf32> to vector<256x256xf32>
    %38 = arith.subf %34, %37 : vector<256x256xf32>
    %39 = math.exp %38 : vector<256x256xf32>
    %cst_18 = arith.constant dense<0.000000e+00> : vector<256xf32>
    %40 = vector.multi_reduction <add>, %39, %cst_18 [1] : vector<256x256xf32> to vector<256xf32>
    %41 = vector.shape_cast %40 : vector<256xf32> to vector<256x1xf32>
    %42 = tpu.reciprocal %41 {approx = true} : vector<256x1xf32> -> vector<256x1xf32>
    %43 = vector.broadcast %42 : vector<256x1xf32> to vector<256x256xf32>
    %44 = arith.mulf %39, %43 : vector<256x256xf32>
    %45 = arith.truncf %44 : vector<256x256xf32> to vector<256x256xbf16>
    %cst_19 = arith.constant dense<0.000000e+00> : vector<32x256xf32>
    %46 = tpu.matmul %33, %45, %cst_19 {dimension_numbers = #tpu.dot_dimension_numbers<[1], [1], [0], [0], [0, 0, 1, 0], [], []>} : vector<32x256xbf16>, vector<256x256xbf16>, vector<32x256xf32> -> vector<32x256xf32>
    %47 = arith.truncf %46 : vector<32x256xf32> to vector<32x256xbf16>
    %48 = arith.index_cast %21 : i32 to index
    %c0_20 = arith.constant 0 : index
    %49 = vector.load %arg8[%48, %c0_20] : memref<128x256xbf16, #tpu.memory_space<vmem>>, vector<32x256xbf16>
    tpu.vector_store %arg8[%48, %c0_20], %47 {strides = array<i32>} : memref<128x256xbf16, #tpu.memory_space<vmem>>, vector<32x256xbf16>,
    %c1_i32 = arith.constant 1 : i32
    %c32_i32_21 = arith.constant 32 : i32
    %50 = arith.muli %c1_i32, %c32_i32_21 : i32
    %51 = tpu.assume_multiple %50, 32 : i32
    %c32_i32_22 = arith.constant 32 : i32
    %52 = arith.muli %c1_i32, %c32_i32_22 : i32
    %c128_i32_23 = arith.constant 128 : i32
    %53 = arith.addi %c128_i32_23, %52 : i32
    %54 = tpu.assume_multiple %53, 32 : i32
    %c32_i32_24 = arith.constant 32 : i32
    %55 = arith.muli %c1_i32, %c32_i32_24 : i32
    %c256_i32_25 = arith.constant 256 : i32
    %56 = arith.addi %c256_i32_25, %55 : i32
    %57 = tpu.assume_multiple %56, 32 : i32
    %58 = arith.index_cast %51 : i32 to index
    %c0_26 = arith.constant 0 : index
    %59 = vector.load %arg7[%58, %c0_26] : memref<384x256xbf16, #tpu.memory_space<vmem>>, vector<32x256xbf16>
    %60 = arith.index_cast %54 : i32 to index
    %c0_27 = arith.constant 0 : index
    %61 = vector.load %arg7[%60, %c0_27] : memref<384x256xbf16, #tpu.memory_space<vmem>>, vector<32x256xbf16>
    %62 = arith.index_cast %57 : i32 to index
    %c0_28 = arith.constant 0 : index
    %63 = vector.load %arg7[%62, %c0_28] : memref<384x256xbf16, #tpu.memory_space<vmem>>, vector<32x256xbf16>
    %cst_29 = arith.constant dense<0.000000e+00> : vector<256x256xf32>
    %64 = tpu.matmul %59, %61, %cst_29 {dimension_numbers = #tpu.dot_dimension_numbers<[0], [0], [1], [1], [0, 1, 1, 1], [], []>} : vector<32x256xbf16>, vector<32x256xbf16>, vector<256x256xf32> -> vector<256x256xf32>
    %cst_30 = arith.constant dense<0xFF800000> : vector<256xf32>
    %65 = vector.multi_reduction <maximumf>, %64, %cst_30 [1] : vector<256x256xf32> to vector<256xf32>
    %66 = vector.shape_cast %65 : vector<256xf32> to vector<256x1xf32>
    %67 = vector.broadcast %66 : vector<256x1xf32> to vector<256x256xf32>
    %68 = arith.subf %64, %67 : vector<256x256xf32>
    %69 = math.exp %68 : vector<256x256xf32>
    %cst_31 = arith.constant dense<0.000000e+00> : vector<256xf32>
    %70 = vector.multi_reduction <add>, %69, %cst_31 [1] : vector<256x256xf32> to vector<256xf32>
    %71 = vector.shape_cast %70 : vector<256xf32> to vector<256x1xf32>
    %72 = tpu.reciprocal %71 {approx = true} : vector<256x1xf32> -> vector<256x1xf32>
    %73 = vector.broadcast %72 : vector<256x1xf32> to vector<256x256xf32>
    %74 = arith.mulf %69, %73 : vector<256x256xf32>
    %75 = arith.truncf %74 : vector<256x256xf32> to vector<256x256xbf16>
    %cst_32 = arith.constant dense<0.000000e+00> : vector<32x256xf32>
    %76 = tpu.matmul %63, %75, %cst_32 {dimension_numbers = #tpu.dot_dimension_numbers<[1], [1], [0], [0], [0, 0, 1, 0], [], []>} : vector<32x256xbf16>, vector<256x256xbf16>, vector<32x256xf32> -> vector<32x256xf32>
    %77 = arith.truncf %76 : vector<32x256xf32> to vector<32x256xbf16>
    %78 = arith.index_cast %51 : i32 to index
    %c0_33 = arith.constant 0 : index
    %79 = vector.load %arg8[%78, %c0_33] : memref<128x256xbf16, #tpu.memory_space<vmem>>, vector<32x256xbf16>
    tpu.vector_store %arg8[%78, %c0_33], %77 {strides = array<i32>} : memref<128x256xbf16, #tpu.memory_space<vmem>>, vector<32x256xbf16>,
    %c2_i32 = arith.constant 2 : i32
    %c32_i32_34 = arith.constant 32 : i32
    %80 = arith.muli %c2_i32, %c32_i32_34 : i32
    %81 = tpu.assume_multiple %80, 32 : i32
    %c32_i32_35 = arith.constant 32 : i32
    %82 = arith.muli %c2_i32, %c32_i32_35 : i32
    %c128_i32_36 = arith.constant 128 : i32
    %83 = arith.addi %c128_i32_36, %82 : i32
    %84 = tpu.assume_multiple %83, 32 : i32
    %c32_i32_37 = arith.constant 32 : i32
    %85 = arith.muli %c2_i32, %c32_i32_37 : i32
    %c256_i32_38 = arith.constant 256 : i32
    %86 = arith.addi %c256_i32_38, %85 : i32
    %87 = tpu.assume_multiple %86, 32 : i32
    %88 = arith.index_cast %81 : i32 to index
    %c0_39 = arith.constant 0 : index
    %89 = vector.load %arg7[%88, %c0_39] : memref<384x256xbf16, #tpu.memory_space<vmem>>, vector<32x256xbf16>
    %90 = arith.index_cast %84 : i32 to index
    %c0_40 = arith.constant 0 : index
    %91 = vector.load %arg7[%90, %c0_40] : memref<384x256xbf16, #tpu.memory_space<vmem>>, vector<32x256xbf16>
    %92 = arith.index_cast %87 : i32 to index
    %c0_41 = arith.constant 0 : index
    %93 = vector.load %arg7[%92, %c0_41] : memref<384x256xbf16, #tpu.memory_space<vmem>>, vector<32x256xbf16>
    %cst_42 = arith.constant dense<0.000000e+00> : vector<256x256xf32>
    %94 = tpu.matmul %89, %91, %cst_42 {dimension_numbers = #tpu.dot_dimension_numbers<[0], [0], [1], [1], [0, 1, 1, 1], [], []>} : vector<32x256xbf16>, vector<32x256xbf16>, vector<256x256xf32> -> vector<256x256xf32>
    %cst_43 = arith.constant dense<0xFF800000> : vector<256xf32>
    %95 = vector.multi_reduction <maximumf>, %94, %cst_43 [1] : vector<256x256xf32> to vector<256xf32>
    %96 = vector.shape_cast %95 : vector<256xf32> to vector<256x1xf32>
    %97 = vector.broadcast %96 : vector<256x1xf32> to vector<256x256xf32>
    %98 = arith.subf %94, %97 : vector<256x256xf32>
    %99 = math.exp %98 : vector<256x256xf32>
    %cst_44 = arith.constant dense<0.000000e+00> : vector<256xf32>
    %100 = vector.multi_reduction <add>, %99, %cst_44 [1] : vector<256x256xf32> to vector<256xf32>
    %101 = vector.shape_cast %100 : vector<256xf32> to vector<256x1xf32>
    %102 = tpu.reciprocal %101 {approx = true} : vector<256x1xf32> -> vector<256x1xf32>
    %103 = vector.broadcast %102 : vector<256x1xf32> to vector<256x256xf32>
    %104 = arith.mulf %99, %103 : vector<256x256xf32>
    %105 = arith.truncf %104 : vector<256x256xf32> to vector<256x256xbf16>
    %cst_45 = arith.constant dense<0.000000e+00> : vector<32x256xf32>
    %106 = tpu.matmul %93, %105, %cst_45 {dimension_numbers = #tpu.dot_dimension_numbers<[1], [1], [0], [0], [0, 0, 1, 0], [], []>} : vector<32x256xbf16>, vector<256x256xbf16>, vector<32x256xf32> -> vector<32x256xf32>
    %107 = arith.truncf %106 : vector<32x256xf32> to vector<32x256xbf16>
    %108 = arith.index_cast %81 : i32 to index
    %c0_46 = arith.constant 0 : index
    %109 = vector.load %arg8[%108, %c0_46] : memref<128x256xbf16, #tpu.memory_space<vmem>>, vector<32x256xbf16>
    tpu.vector_store %arg8[%108, %c0_46], %107 {strides = array<i32>} : memref<128x256xbf16, #tpu.memory_space<vmem>>, vector<32x256xbf16>,
    %c3_i32 = arith.constant 3 : i32
    %c32_i32_47 = arith.constant 32 : i32
    %110 = arith.muli %c3_i32, %c32_i32_47 : i32
    %111 = tpu.assume_multiple %110, 32 : i32
    %c32_i32_48 = arith.constant 32 : i32
    %112 = arith.muli %c3_i32, %c32_i32_48 : i32
    %c128_i32_49 = arith.constant 128 : i32
    %113 = arith.addi %c128_i32_49, %112 : i32
    %114 = tpu.assume_multiple %113, 32 : i32
    %c32_i32_50 = arith.constant 32 : i32
    %115 = arith.muli %c3_i32, %c32_i32_50 : i32
    %c256_i32_51 = arith.constant 256 : i32
    %116 = arith.addi %c256_i32_51, %115 : i32
    %117 = tpu.assume_multiple %116, 32 : i32
    %118 = arith.index_cast %111 : i32 to index
    %c0_52 = arith.constant 0 : index
    %119 = vector.load %arg7[%118, %c0_52] : memref<384x256xbf16, #tpu.memory_space<vmem>>, vector<32x256xbf16>
    %120 = arith.index_cast %114 : i32 to index
    %c0_53 = arith.constant 0 : index
    %121 = vector.load %arg7[%120, %c0_53] : memref<384x256xbf16, #tpu.memory_space<vmem>>, vector<32x256xbf16>
    %122 = arith.index_cast %117 : i32 to index
    %c0_54 = arith.constant 0 : index
    %123 = vector.load %arg7[%122, %c0_54] : memref<384x256xbf16, #tpu.memory_space<vmem>>, vector<32x256xbf16>
    %cst_55 = arith.constant dense<0.000000e+00> : vector<256x256xf32>
    %124 = tpu.matmul %119, %121, %cst_55 {dimension_numbers = #tpu.dot_dimension_numbers<[0], [0], [1], [1], [0, 1, 1, 1], [], []>} : vector<32x256xbf16>, vector<32x256xbf16>, vector<256x256xf32> -> vector<256x256xf32>
    %cst_56 = arith.constant dense<0xFF800000> : vector<256xf32>
    %125 = vector.multi_reduction <maximumf>, %124, %cst_56 [1] : vector<256x256xf32> to vector<256xf32>
    %126 = vector.shape_cast %125 : vector<256xf32> to vector<256x1xf32>
    %127 = vector.broadcast %126 : vector<256x1xf32> to vector<256x256xf32>
    %128 = arith.subf %124, %127 : vector<256x256xf32>
    %129 = math.exp %128 : vector<256x256xf32>
    %cst_57 = arith.constant dense<0.000000e+00> : vector<256xf32>
    %130 = vector.multi_reduction <add>, %129, %cst_57 [1] : vector<256x256xf32> to vector<256xf32>
    %131 = vector.shape_cast %130 : vector<256xf32> to vector<256x1xf32>
    %132 = tpu.reciprocal %131 {approx = true} : vector<256x1xf32> -> vector<256x1xf32>
    %133 = vector.broadcast %132 : vector<256x1xf32> to vector<256x256xf32>
    %134 = arith.mulf %129, %133 : vector<256x256xf32>
    %135 = arith.truncf %134 : vector<256x256xf32> to vector<256x256xbf16>
    %cst_58 = arith.constant dense<0.000000e+00> : vector<32x256xf32>
    %136 = tpu.matmul %123, %135, %cst_58 {dimension_numbers = #tpu.dot_dimension_numbers<[1], [1], [0], [0], [0, 0, 1, 0], [], []>} : vector<32x256xbf16>, vector<256x256xbf16>, vector<32x256xf32> -> vector<32x256xf32>
    %137 = arith.truncf %136 : vector<32x256xf32> to vector<32x256xbf16>
    %138 = arith.index_cast %111 : i32 to index
    %c0_59 = arith.constant 0 : index
    %139 = vector.load %arg8[%138, %c0_59] : memref<128x256xbf16, #tpu.memory_space<vmem>>, vector<32x256xbf16>
    tpu.vector_store %arg8[%138, %c0_59], %137 {strides = array<i32>} : memref<128x256xbf16, #tpu.memory_space<vmem>>, vector<32x256xbf16>,
    %c4_i32 = arith.constant 4 : i32
    %c0_60 = arith.constant 0 : index
    %c0_61 = arith.constant 0 : index
    %140 = vector.load %arg4[%c0_60, %c0_61] : memref<32x128xbf16, #tpu.memory_space<vmem>>, vector<32x128xbf16>
    %c0_62 = arith.constant 0 : index
    %c0_63 = arith.constant 0 : index
    %141 = vector.load %arg8[%c0_62, %c0_63] : memref<128x256xbf16, #tpu.memory_space<vmem>>, vector<128x256xbf16>
    %cst_64 = arith.constant dense<0.000000e+00> : vector<32x256xf32>
    %142 = tpu.matmul %140, %141, %cst_64 {dimension_numbers = #tpu.dot_dimension_numbers<[1], [0], [0], [1], [0, 0, 1, 1], [], []>} : vector<32x128xbf16>, vector<128x256xbf16>, vector<32x256xf32> -> vector<32x256xf32>
    %c0_65 = arith.constant 0 : index
    %c0_66 = arith.constant 0 : index
    %143 = vector.load %arg5[%c0_65, %c0_66] : memref<32x1xf32, #tpu.memory_space<vmem>>, vector<32x1xf32>
    %144 = vector.broadcast %143 : vector<32x1xf32> to vector<32x256xf32>
    %145 = arith.addf %142, %144 : vector<32x256xf32>
    %c0_67 = arith.constant 0 : index
    %c0_68 = arith.constant 0 : index
    %c0_69 = arith.constant 0 : index
    %146 = vector.load %arg6[%c0_67, %c0_68, %c0_69] : memref<1x32x256xf32, #tpu.memory_space<vmem>>, vector<1x32x256xf32>
    %147 = vector.shape_cast %146 : vector<1x32x256xf32> to vector<32x256xf32>
    %148 = vector.shape_cast %145 : vector<32x256xf32> to vector<1x32x256xf32>
    tpu.vector_store %arg6[%c0_67, %c0_68, %c0_69], %148 {strides = array<i32>} : memref<1x32x256xf32, #tpu.memory_space<vmem>>, vector<1x32x256xf32>,
    return
  }
  func.func @transform_0(%arg0: i32) -> (i32, i32, i32) {
    %c0_i32 = arith.constant 0 : i32
    %c0_i32_0 = arith.constant 0 : i32
    %c0_i32_1 = arith.constant 0 : i32
    return %arg0, %c0_i32, %c0_i32_0 : i32, i32, i32
  }
  func.func @transform_1(%arg0: i32) -> (i32, i32) {
    %c0_i32 = arith.constant 0 : i32
    %c0_i32_0 = arith.constant 0 : i32
    %c0_i32_1 = arith.constant 0 : i32
    return %c0_i32, %c0_i32_0 : i32, i32
  }
  func.func @transform_2(%arg0: i32) -> (i32, i32) {
    %c0_i32 = arith.constant 0 : i32
    %c0_i32_0 = arith.constant 0 : i32
    %c0_i32_1 = arith.constant 0 : i32
    return %c0_i32, %c0_i32_0 : i32, i32
  }
  func.func @transform_3(%arg0: i32) -> (i32, i32) {
    %c0_i32 = arith.constant 0 : i32
    %c0_i32_0 = arith.constant 0 : i32
    %c0_i32_1 = arith.constant 0 : i32
    return %c0_i32, %c0_i32_0 : i32, i32
  }
  func.func @transform_4(%arg0: i32) -> (i32, i32) {
    %c0_i32 = arith.constant 0 : i32
    %c0_i32_0 = arith.constant 0 : i32
    %c0_i32_1 = arith.constant 0 : i32
    return %c0_i32, %c0_i32_0 : i32, i32
  }
  func.func @transform_5(%arg0: i32) -> (i32, i32, i32) {
    %c0_i32 = arith.constant 0 : i32
    %c0_i32_0 = arith.constant 0 : i32
    %c0_i32_1 = arith.constant 0 : i32
    return %arg0, %c0_i32, %c0_i32_0 : i32, i32, i32
  }
}

</mosaic_0001>

<bundles_post_ra>
// kernel: tpu_custom_call.1
= control target key start
LH: loop header
LB: loop body
LE: loop exit
PB: predicated region body
PF: predicated region fallthrough
CT: control target
= control target key end

     0   :  { %10 = vsyncpa [#allocation5], 0  ;;  %s9352_s0 = inlined_call_operand.vmem [shape: f32[2,32,256], index: 0, kind: input, shape index: {}]   ;;  %s9353_s1 = inlined_call_operand.vmem [shape: f32[32,1], index: 1, kind: input, shape index: {}]   ;;  %s9354_s2 = inlined_call_operand.vmem [shape: bf16[384,32], index: 2, kind: input, shape index: {}]   ;;  %s9355_s3 = inlined_call_operand.vmem [shape: bf16[32,128], index: 3, kind: input, shape index: {}]   ;;  %s9356_s4 = inlined_call_operand.vmem [shape: f32[32,1], index: 4, kind: input, shape index: {}]   ;;  %s9357_s5 = inlined_call_operand.hbm [shape: f32[2,32,256], index: 5, kind: output, shape index: {}]  }
   0x1   :  { %12 = vsyncpa [#allocation5 + $0x1], 0  ;;  %s6565_s18 = smov 0   ;;  %s6567_s19 = smov 0  }
   0x2   :  { %s6569_s20 = smov 0   ;;  %s6571_s21 = smov 0  }
   0x3 LB: > { %s6586_s22 = sadd.s32 4294967295, %s6529_s21   ;;  %s5243_s23 = sadd.s32 4294967294, %s6529_s21   ;;  %s6529_s21 = sphi %s6571_s21, %s9952_s21   ;;  %s6525_s20 = sphi %s6569_s20, %s9951_s20   ;;  %s6521_s19 = sphi %s6567_s19, %s9950_s19   ;;  %s6517_s18 = sphi %s6565_s18, %s9949_s18  }
   0x4   : > { %s6590_s24 = sadd.s32 1, %s6529_s21   ;;  %s135_s25 = sadd.s32 1, %s6525_s20 }
   0x5   : > { %s132_s26 = ssub.s32 %s6529_s21, %s6590_s24  ;;  %p145_p0 = scmp.ne.s32.totalorder %s6525_s20, %s6521_s19 }
   0x6   : > { %p133_p1 = scmp.eq.s32.totalorder %s132_s26, 0  ;;  %p146_p2 = scmp.eq.s32.totalorder %s6586_s22, 1 }
   0x7   : > { %p151_p3 = scmp.ne.s32.totalorder %s6521_s19, %s6517_s18  ;;  %p152_p4 = scmp.eq.s32.totalorder %s5243_s23, 1 }
   0x8   : > { %s6601_s27 = scalar_select %p133_p1, %s6525_s20, %s135_s25  }
   0x9   : > { %p6603_p5 = por %p146_p2, %p145_p0  ;;  %p6607_p6 = por %p152_p4, %p151_p3 }
   0xa   : > { %p5246_p7 = scmp.ge.s32.totalorder %s6529_s21, 1  ;;  %p190_p8 = scmp.lt.s32.totalorder %s6529_s21, 3 }
   0xc   : > { %p191_p9 = pnand %p5246_p7, %p190_p8 }
   0xe   : > { %194 = sbr.rel (%p191_p9) target bundleno = 4052 (0xfd4), region = 40 }
  0x13   : > { %v272_v0 = vld [vmem:[%s9353_s1 + $0x10] sm:$0xff]  ;;  %v270_v1 = vld [vmem:[%s9353_s1] sm:$0xff]  ;;  %v273_v2 = vld [vmem:[%s9353_s1 + $0x18] sm:$0xff]  ;;  %v9358_v3 = vmov 0   ;;  %p218_p10 = scmp.lt.s32.totalorder %s6586_s22, 1  ;;  %vm478_vm0 = vcmask 261120  }
  0x14   : > { %5670 = vset.pattern.permute.xlu1 %v9358_v3  ;;  %5669 = vset.pattern.permute.xlu0 %v9358_v3  ;;  %v276_v4 = vmul.f32 5.656854, %v272_v0  ;;  %v274_v5 = vmul.f32 5.656854, %v270_v1  ;;  %v277_v6 = vmul.f32 5.656854, %v273_v2 }
  0x15   : > { %v271_v7 = vld [vmem:[%s9353_s1 + $0x8] sm:$0xff]  ;;  %583 = vmatprep.mubr.bf16.mxu0 %v9358_v3  ;;  %1333 = vmatprep.mubr.bf16.mxu1 %v9358_v3  ;;  %s219_s13 = scalar_select %p218_p10, %s6586_s22, 1 }
  0x16   : > { %290 = vperm.xlu0 %5669, %v276_v4   ;;  %280 = vperm.xlu1 %5670, %v274_v5   ;;  %v275_v8 = vmul.f32 5.656854, %v271_v7  ;;  %s6532_s7 = smov [#allocation4]  }
  0x17   : > { %s5497_s14 = sshll.u32 %s219_s13, 6  ;;  %s6473_s8 = sshll.u32 %s6532_s7, 4  ;;  %s6474_s8 = int_to_ptr.vmem [resolvable:$false] %s6473_s8 }
  0x18   : > { %s222_s17 = scalar_lea.vmem %s9352_s0, %s5497_s14  ;;  %s215_s14 = sand.u32 1, %s6521_s19  }
  0x19   : > { %v224_v9 = vld [vmem:[%s222_s17] sm:$0xff]  ;;  %v226_v10 = vld [vmem:[%s222_s17 + $0x10] sm:$0xff]  ;;  %v225_v11 = vld [vmem:[%s222_s17 + $0x8] sm:$0xff]  ;;  %s5247_s15 = sshll.u32 %s215_s14, 6  ;;  %s6475_s9 = scalar_lea.vmem %s6474_s8, 2048 }
  0x1a   : > { %295 = vperm.xlu0 %5669, %v277_v6   ;;  %285 = vperm.xlu1 %5670, %v275_v8   ;;  %v227_v12 = vld [vmem:[%s222_s17 + $0x18] sm:$0xff]  ;;  %v232_v13 = vmul.f32 %v224_v9, %v224_v9  ;;  %v234_v14 = vmul.f32 %v226_v10, %v226_v10  ;;  %v228_v15 = vld [vmem:[%s222_s17 + $0x20] sm:$0xff]  ;;  %v233_v16 = vmul.f32 %v225_v11, %v225_v11  ;;  %v229_v18 = vld [vmem:[%s222_s17 + $0x28] sm:$0xff]  ;;  %s217_s16 = scalar_lea.vmem [#allocation4], %s5247_s15 }
  0x1b   : > { %v235_v17 = vmul.f32 %v227_v12, %v227_v12  ;;  %v236_v19 = vmul.f32 %v228_v15, %v228_v15  ;;  %v230_v21 = vld [vmem:[%s222_s17 + $0x30] sm:$0xff]  ;;  %v237_v22 = vmul.f32 %v229_v18, %v229_v18  ;;  %v231_v24 = vld [vmem:[%s222_s17 + $0x38] sm:$0xff]  ;;  %v5671_v8 = vld [vmem:[%s9354_s2] sm:$0xff]   ;;  %s5562_s17 = sshll.u32 %s6586_s22, 10  ;;  %s5167_s23 = sshll.u32 %s217_s16, 4  ;;  %s9308_s23 = int_to_ptr.vmem [resolvable:$true] %s5167_s23 }
  0x1c   : > { %v240_v20 = vadd.f32 %v234_v14, %v232_v13  ;;  %v238_v25 = vmul.f32 %v230_v21, %v230_v21  ;;  %v239_v27 = vmul.f32 %v231_v24, %v231_v24  ;;  %v5676_v13 = vld [vmem:[%s9354_s2 + $0x28] sm:$0xff]   ;;  %v5677_v14 = vld [vmem:[%s9354_s2 + $0x30] sm:$0xff]   ;;  %s9306_s30 = scalar_lea.hbm %s9357_s5, %s5562_s17  ;;  %s9312_s22 = scalar_lea.sflag [#allocation5], %s215_s14 }
  0x1d   : > { %v249_v23 = vadd.f32 %v235_v17, %v233_v16  ;;  %v5679_v16 = vld [vmem:[%s9354_s2 + $0x40] sm:$0xff]   ;;  %v5680_v17 = vld [vmem:[%s9354_s2 + $0x48] sm:$0xff]   ;;  %s6469_s6 = scalar_lea.vmem %s9308_s23, 1024  ;;  %p6476_p0 = scmp.lt.s32.totalorder %s9308_s23, %s6474_s8 }
  0x1e   : > { %v241_v26 = vadd.f32 %v240_v20, %v236_v19  ;;  %p6470_p11 = scmp.ne.s32.totalorder %s9308_s23, %s6469_s6  ;;  %p6477_p1 = scmp.lt.s32.totalorder %s6475_s9, %s6469_s6 }
  0x1f   : > { %v250_v28 = vadd.f32 %v249_v23, %v237_v22 }
  0x20   : > { %v242_v29 = vadd.f32 %v241_v26, %v238_v25  ;;  %p6471_p12 = pnand %p6470_p11, %p6603_p5  ;;  %p6478_p2 = por %p6477_p1, %p6476_p0 }
  0x21   : > { %v251_v30 = vadd.f32 %v250_v28, %v239_v27 }
  0x22   : > { %v243_v31 = vrot.slane %v242_v29, 4  ;;  %p6472_p13 = pneg %p6471_p12 }
  0x23   : > { %v252_v32 = vrot.slane %v251_v30, 4 }
  0x24   : > { %v244_v33 = vadd.f32 %v243_v31, %v242_v29  ;;  %p6479_p3 = pnand %p6478_p2, %p6472_p13 }
  0x25   : > { %v253_v34 = vadd.f32 %v252_v32, %v251_v30 }
  0x26   : > { %v245_v35 = vrot.slane %v244_v33, 2 }
  0x27   : > { %v254_v36 = vrot.slane %v253_v34, 2 }
  0x28   : > { %v246_v37 = vadd.f32 %v245_v35, %v244_v33 }
  0x29   : > { %v255_v38 = vadd.f32 %v254_v36, %v253_v34 }
  0x2a   : > { %v247_v39 = vrot.slane %v246_v37, 1 }
  0x2b   : > { %v256_v40 = vrot.slane %v255_v38, 1 }
  0x2c   : > { %v248_v41 = vadd.f32 %v247_v39, %v246_v37 }
  0x2d   : > { %v257_v42 = vadd.f32 %v256_v40, %v255_v38 }
  0x2e   : > { %v258_v43 = vmax.f32 %v248_v41, 1e-24 }
  0x2f   : > { %v259_v44 = vmax.f32 %v257_v42, 1e-24 }
  0x30   : > { %5697 = vrsqrt.f32 %v258_v43 }
  0x31   : > { %5699 = vrsqrt.f32 %v259_v44 }
  0x3d   : > { %v5698_v45 = vpop.eup %5697 }
  0x3e   : > { %v5700_v46 = vpop.eup %5699  ;;  %v266_v48 = vmul.f32 %v5698_v45, %v228_v15  ;;  %v268_v54 = vmul.f32 %v5698_v45, %v230_v21  ;;  %v262_v57 = vmul.f32 %v5698_v45, %v224_v9  ;;  %v264_v60 = vmul.f32 %v5698_v45, %v226_v10  ;;  %v5672_v9 = vld [vmem:[%s9354_s2 + $0x8] sm:$0xff]   ;;  %v5673_v10 = vld [vmem:[%s9354_s2 + $0x10] sm:$0xff]   ;;  %v5678_v15 = vld [vmem:[%s9354_s2 + $0x38] sm:$0xff]  }
  0x3f   : > { %v267_v49 = vmul.f32 %v5700_v46, %v229_v18  ;;  %v263_v51 = vmul.f32 %v5700_v46, %v225_v11  ;;  %v265_v52 = vmul.f32 %v5700_v46, %v227_v12  ;;  %v269_v53 = vmul.f32 %v5700_v46, %v231_v24  ;;  %v5674_v11 = vld [vmem:[%s9354_s2 + $0x18] sm:$0xff]   ;;  %v5675_v12 = vld [vmem:[%s9354_s2 + $0x20] sm:$0xff]  }
  0x91   : > { %v291_v47 = vpop.permute.xlu0 %290  ;;  %v281_v50 = vpop.permute.xlu1 %280 }
  0x92   : > { %v302_v55 = vmul.f32 %v291_v47, %v266_v48  ;;  %v303_v56 = vmul.f32 %v291_v47, %v267_v49  ;;  %v299_v61 = vmul.f32 %v281_v50, %v263_v51  ;;  %v298_v4 = vmul.f32 %v281_v50, %v262_v57 }
  0x95   : > { %v296_v58 = vpop.permute.xlu0 %295  ;;  %v286_v59 = vpop.permute.xlu1 %285 }
  0x96   : > { %v301_v62 = vmul.f32 %v286_v59, %v265_v52  ;;  %v305_v63 = vmul.f32 %v296_v58, %v269_v53  ;;  %v304_v0 = vmul.f32 %v296_v58, %v268_v54  ;;  %v300_v5 = vmul.f32 %v286_v59, %v264_v60 }
  0x98   : > { %v357_v1 = vpack.c.bf16 %v305_v63, %v303_v56  ;;  %v356_v2 = vpack.c.bf16 %v304_v0, %v302_v55  ;;  %v355_v6 = vpack.c.bf16 %v301_v62, %v299_v61  ;;  %v354_v7 = vpack.c.bf16 %v300_v5, %v298_v4 }
  0x9a   : > { %563 = vmatprep.subr.bf16.mxu0 %v357_v1 }
  0x9b   : > { %564 = vmatpush1.bf16.msra.mxu0 %v356_v2 }
  0x9c   : > { %565 = vmatprep.subr.bf16.mxu0 %v355_v6 }
  0x9f   : > { %566 = vmatpush1.bf16.msra.mxu0 %v354_v7 }
  0xa2   : > { %5274 = vmatmul.mubr.msk.bf16.vlgmr.msra.gmra.mxu0 %vm478_vm0, %v5671_v8 }
  0xa3   : > { %593 = vmatprep.mubr.bf16.mxu0 %v9358_v3 }
  0xaa   : > { %5275 = vmatmul.mubr.msk.bf16.gmra.mxu0 %vm478_vm0, %v5672_v9 }
  0xab   : > { %603 = vmatprep.mubr.bf16.mxu0 %v9358_v3 }
  0xb2   : > { %5276 = vmatmul.mubr.msk.bf16.gmra.mxu0 %vm478_vm0, %v5673_v10 }
  0xb3   : > { %613 = vmatprep.mubr.bf16.mxu0 %v9358_v3 }
  0xba   : > { %5277 = vmatmul.mubr.msk.bf16.gmra.mxu0 %vm478_vm0, %v5674_v11 }
  0xbb   : > { %623 = vmatprep.mubr.bf16.mxu0 %v9358_v3 }
  0xc2   : > { %5278 = vmatmul.mubr.msk.bf16.gmra.mxu0 %vm478_vm0, %v5675_v12 }
  0xc3   : > { %633 = vmatprep.mubr.bf16.mxu0 %v9358_v3 }
  0xca   : > { %5279 = vmatmul.mubr.msk.bf16.gmra.mxu0 %vm478_vm0, %v5676_v13 }
  0xcb   : > { %643 = vmatprep.mubr.bf16.mxu0 %v9358_v3 }
  0xd2   : > { %5280 = vmatmul.mubr.msk.bf16.gmra.mxu0 %vm478_vm0, %v5677_v14 }
  0xd3   : > { %653 = vmatprep.mubr.bf16.mxu0 %v9358_v3 }
  0xda   : > { %5281 = vmatmul.mubr.msk.bf16.gmra.mxu0 %vm478_vm0, %v5678_v15 }
  0xdb   : > { %663 = vmatprep.mubr.bf16.mxu0 %v9358_v3 }
  0xe2   : > { %5282 = vmatmul.mubr.msk.bf16.gmra.mxu0 %vm478_vm0, %v5679_v16 }
  0xe3   : > { %673 = vmatprep.mubr.bf16.mxu0 %v9358_v3 }
  0xea   : > { %5283 = vmatmul.mubr.msk.bf16.gmra.mxu0 %vm478_vm0, %v5680_v17 }
  0xeb   : > { %683 = vmatprep.mubr.bf16.mxu0 %v9358_v3 }
 0x162   : > { %v585_v18 = vpop.f32.mrf.mxu0 }
 0x164   : > { %v587_v19 = vpop.f32.mrf.mxu0 }
 0x166   : > { %v589_v20 = vpop.f32.mrf.mxu0 }
 0x167   : > { %v5563_v21 = vpack.c.bf16 %v589_v20, %v585_v18 }
 0x168   : > { %v591_v22 = vpop.f32.mrf.mxu0 }
 0x169   : > { %v5564_v23 = vpack.c.bf16 %v591_v22, %v587_v19  ;;  %1201 = vxpose.xlu0.c.b16.start [1/2] (short) %v5563_v21, 128 }
 0x16a   : > { %v595_v24 = vpop.f32.mrf.mxu0 }
 0x16b   : > { %1217 = vxpose.xlu1.c.b16.start [1/2] (short) %v5564_v23, 128 }
 0x16c   : > { %v597_v25 = vpop.f32.mrf.mxu0 }
 0x16e   : > { %v599_v26 = vpop.f32.mrf.mxu0 }
 0x16f   : > { %v5565_v27 = vpack.c.bf16 %v599_v26, %v595_v24 }
 0x170   : > { %v601_v28 = vpop.f32.mrf.mxu0 }
 0x171   : > { %v5566_v29 = vpack.c.bf16 %v601_v28, %v597_v25  ;;  %1202 = vxpose.xlu0.c.b16.end [2/2] (short) %v5565_v27, 128 }
 0x172   : > { %v6684_v30 = vpop.f32.mrf.mxu0 }
 0x173   : > { %9532 = vst [vmem:[#allocation7_spill] sm:$0xff] %v6684_v30  ;;  %1218 = vxpose.xlu1.c.b16.end [2/2] (short) %v5566_v29, 128 }
 0x174   : > { %v6686_v31 = vpop.f32.mrf.mxu0 }
 0x175   : > { %9533 = vst [vmem:[#allocation8_spill] sm:$0xff] %v6686_v31 }
 0x176   : > { %v6688_v32 = vpop.f32.mrf.mxu0 }
 0x177   : > { %9534 = vst [vmem:[#allocation9_spill] sm:$0xff] %v6688_v32 }
 0x178   : > { %v6692_v34 = vpop.f32.mrf.mxu0 }
 0x179   : > { %9535 = vst [vmem:[#allocation10_spill] sm:$0xff] %v6692_v34 }
 0x17a   : > { %v6694_v35 = vpop.f32.mrf.mxu0 }
 0x17b   : > { %9536 = vst [vmem:[#allocation11_spill] sm:$0xff] %v6694_v35 }
 0x17c   : > { %v6696_v36 = vpop.f32.mrf.mxu0 }
 0x17d   : > { %9537 = vst [vmem:[#allocation12_spill] sm:$0xff] %v6696_v36 }
 0x17e   : > { %v6698_v37 = vpop.f32.mrf.mxu0 }
 0x17f   : > { %9538 = vst [vmem:[#allocation13_spill] sm:$0xff] %v6698_v37 }
 0x180   : > { %v6702_v39 = vpop.f32.mrf.mxu0 }
 0x181   : > { %9539 = vst [vmem:[#allocation14_spill] sm:$0xff] %v6702_v39 }
 0x182   : > { %v6704_v40 = vpop.f32.mrf.mxu0 }
 0x183   : > { %9540 = vst [vmem:[#allocation15_spill] sm:$0xff] %v6704_v40 }
 0x184   : > { %v6706_v41 = vpop.f32.mrf.mxu0 }
 0x185   : > { %9541 = vst [vmem:[#allocation16_spill] sm:$0xff] %v6706_v41 }
 0x186   : > { %v6708_v42 = vpop.f32.mrf.mxu0 }
 0x187   : > { %9542 = vst [vmem:[#allocation17_spill] sm:$0xff] %v6708_v42 }
 0x188   : > { %v6712_v44 = vpop.f32.mrf.mxu0 }
 0x189   : > { %9543 = vst [vmem:[#allocation18_spill] sm:$0xff] %v6712_v44 }
 0x18a   : > { %v6714_v45 = vpop.f32.mrf.mxu0 }
 0x18b   : > { %9544 = vst [vmem:[#allocation19_spill] sm:$0xff] %v6714_v45 }
 0x18c   : > { %v6716_v46 = vpop.f32.mrf.mxu0 }
 0x18d   : > { %9545 = vst [vmem:[#allocation20_spill] sm:$0xff] %v6716_v46 }
 0x18e   : > { %v6718_v47 = vpop.f32.mrf.mxu0 }
 0x18f   : > { %9546 = vst [vmem:[#allocation21_spill] sm:$0xff] %v6718_v47 }
 0x190   : > { %v6722_v49 = vpop.f32.mrf.mxu0 }
 0x191   : > { %9547 = vst [vmem:[#allocation22_spill] sm:$0xff] %v6722_v49 }
 0x192   : > { %v6724_v50 = vpop.f32.mrf.mxu0 }
 0x193   : > { %9548 = vst [vmem:[#allocation23_spill] sm:$0xff] %v6724_v50 }
 0x194   : > { %v6726_v51 = vpop.f32.mrf.mxu0 }
 0x195   : > { %9549 = vst [vmem:[#allocation24_spill] sm:$0xff] %v6726_v51 }
 0x196   : > { %v6728_v52 = vpop.f32.mrf.mxu0 }
 0x197   : > { %9550 = vst [vmem:[#allocation25_spill] sm:$0xff] %v6728_v52 }
 0x198   : > { %v6732_v54 = vpop.f32.mrf.mxu0 }
 0x199   : > { %9551 = vst [vmem:[#allocation26_spill] sm:$0xff] %v6732_v54 }
 0x19a   : > { %v6734_v55 = vpop.f32.mrf.mxu0 }
 0x19b   : > { %9552 = vst [vmem:[#allocation27_spill] sm:$0xff] %v6734_v55 }
 0x19c   : > { %v6736_v56 = vpop.f32.mrf.mxu0 }
 0x19d   : > { %9553 = vst [vmem:[#allocation28_spill] sm:$0xff] %v6736_v56 }
 0x19e   : > { %v6738_v57 = vpop.f32.mrf.mxu0 }
 0x19f   : > { %9554 = vst [vmem:[#allocation29_spill] sm:$0xff] %v6738_v57 }
 0x1a0   : > { %v6742_v59 = vpop.f32.mrf.mxu0 }
 0x1a1   : > { %9555 = vst [vmem:[#allocation30_spill] sm:$0xff] %v6742_v59 }
 0x1a2   : > { %v665_v60 = vpop.f32.mrf.mxu0 }
 0x1a4   : > { %v667_v61 = vpop.f32.mrf.mxu0 }
 0x1a6   : > { %v669_v62 = vpop.f32.mrf.mxu0 }
 0x1a7   : > { %v5567_v8 = vpack.c.bf16 %v669_v62, %v665_v60 }
 0x1a8   : > { %v671_v63 = vpop.f32.mrf.mxu0 }
 0x1a9   : > { %v5568_v6 = vpack.c.bf16 %v671_v63, %v667_v61 }
 0x1aa   : > { %v675_v0 = vpop.f32.mrf.mxu0 }
 0x1ac   : > { %v677_v1 = vpop.f32.mrf.mxu0 }
 0x1ae   : > { %v679_v2 = vpop.f32.mrf.mxu0 }
 0x1af   : > { %v5569_v4 = vpack.c.bf16 %v679_v2, %v675_v0 }
 0x1b0   : > { %v681_v5 = vpop.f32.mrf.mxu0 }
 0x1b1   : > { %v5570_v7 = vpack.c.bf16 %v681_v5, %v677_v1 }
 0x1b3   : > { %1313 = vmatprep.subr.bf16.mxu1 %v5570_v7 }
 0x1b4   : > { %1314 = vmatpush1.bf16.msra.mxu1 %v5569_v4 }
 0x1b5   : > { %1315 = vmatprep.subr.bf16.mxu1 %v5568_v6 }
 0x1b8   : > { %1316 = vmatpush1.bf16.msra.mxu1 %v5567_v8 }
 0x1cf   : > { %v1209_v9 = vpop.trf.xlu0 }
 0x1d0   : > { %5354 = vmatmul.mubr.msk.bf16.vlgmr.msra.gmra.mxu1 %vm478_vm0, %v1209_v9 }
 0x1d1   : > { %1343 = vmatprep.mubr.bf16.mxu1 %v9358_v3  ;;  %v1225_v17 = vpop.trf.xlu1 }
 0x1d3   : > { %v1210_v10 = vpop.trf.xlu0 }
 0x1d5   : > { %v1226_v18 = vpop.trf.xlu1 }
 0x1d7   : > { %v1211_v11 = vpop.trf.xlu0 }
 0x1d8   : > { %5355 = vmatmul.mubr.msk.bf16.gmra.mxu1 %vm478_vm0, %v1210_v10 }
 0x1d9   : > { %1353 = vmatprep.mubr.bf16.mxu1 %v9358_v3  ;;  %v1227_v19 = vpop.trf.xlu1 }
 0x1db   : > { %v1212_v12 = vpop.trf.xlu0 }
 0x1dd   : > { %v1228_v20 = vpop.trf.xlu1 }
 0x1df   : > { %v1213_v13 = vpop.trf.xlu0 }
 0x1e0   : > { %5356 = vmatmul.mubr.msk.bf16.gmra.mxu1 %vm478_vm0, %v1211_v11 }
 0x1e1   : > { %1363 = vmatprep.mubr.bf16.mxu1 %v9358_v3  ;;  %v1229_v21 = vpop.trf.xlu1 }
 0x1e3   : > { %v1214_v14 = vpop.trf.xlu0 }
 0x1e5   : > { %v1230_v22 = vpop.trf.xlu1 }
 0x1e7   : > { %v1215_v15 = vpop.trf.xlu0 }
 0x1e8   : > { %5357 = vmatmul.mubr.msk.bf16.gmra.mxu1 %vm478_vm0, %v1212_v12 }
 0x1e9   : > { %1373 = vmatprep.mubr.bf16.mxu1 %v9358_v3  ;;  %v1231_v23 = vpop.trf.xlu1 }
 0x1eb   : > { %v1216_v16 = vpop.trf.xlu0 }
 0x1ed   : > { %v1232_v24 = vpop.trf.xlu1 }
 0x1f0   : > { %5358 = vmatmul.mubr.msk.bf16.gmra.mxu1 %vm478_vm0, %v1213_v13 }
 0x1f1   : > { %1383 = vmatprep.mubr.bf16.mxu1 %v9358_v3 }
 0x1f8   : > { %5359 = vmatmul.mubr.msk.bf16.gmra.mxu1 %vm478_vm0, %v1214_v14 }
 0x1f9   : > { %1393 = vmatprep.mubr.bf16.mxu1 %v9358_v3 }
 0x200   : > { %5360 = vmatmul.mubr.msk.bf16.gmra.mxu1 %vm478_vm0, %v1215_v15 }
 0x201   : > { %1403 = vmatprep.mubr.bf16.mxu1 %v9358_v3 }
 0x208   : > { %5361 = vmatmul.mubr.msk.bf16.gmra.mxu1 %vm478_vm0, %v1216_v16 }
 0x209   : > { %1413 = vmatprep.mubr.bf16.mxu1 %v9358_v3 }
 0x210   : > { %5362 = vmatmul.mubr.msk.bf16.gmra.mxu1 %vm478_vm0, %v1225_v17 }
 0x211   : > { %1423 = vmatprep.mubr.bf16.mxu1 %v9358_v3 }
 0x218   : > { %5363 = vmatmul.mubr.msk.bf16.gmra.mxu1 %vm478_vm0, %v1226_v18 }
 0x219   : > { %1433 = vmatprep.mubr.bf16.mxu1 %v9358_v3 }
 0x220   : > { %5364 = vmatmul.mubr.msk.bf16.gmra.mxu1 %vm478_vm0, %v1227_v19 }
 0x221   : > { %1443 = vmatprep.mubr.bf16.mxu1 %v9358_v3 }
 0x228   : > { %5365 = vmatmul.mubr.msk.bf16.gmra.mxu1 %vm478_vm0, %v1228_v20 }
 0x229   : > { %1453 = vmatprep.mubr.bf16.mxu1 %v9358_v3 }
 0x230   : > { %5366 = vmatmul.mubr.msk.bf16.gmra.mxu1 %vm478_vm0, %v1229_v21 }
 0x231   : > { %1463 = vmatprep.mubr.bf16.mxu1 %v9358_v3 }
 0x238   : > { %5367 = vmatmul.mubr.msk.bf16.gmra.mxu1 %vm478_vm0, %v1230_v22 }
 0x239   : > { %1473 = vmatprep.mubr.bf16.mxu1 %v9358_v3 }
 0x240   : > { %5368 = vmatmul.mubr.msk.bf16.gmra.mxu1 %vm478_vm0, %v1231_v23 }
 0x241   : > { %1483 = vmatprep.mubr.bf16.mxu1 %v9358_v3 }
 0x248   : > { %5369 = vmatmul.mubr.msk.bf16.gmra.mxu1 %vm478_vm0, %v1232_v24 }
 0x290   : > { %v6775_v25 = vpop.f32.mrf.mxu1 }
 0x292   : > { %v6777_v26 = vpop.f32.mrf.mxu1 }
 0x294   : > { %v6779_v27 = vpop.f32.mrf.mxu1 }
 0x296   : > { %v6781_v28 = vpop.f32.mrf.mxu1 }
 0x297   : > { %v1497_v45 = vmax.f32 %v6779_v27, %v6781_v28 }
 0x298   : > { %v6783_v29 = vpop.f32.mrf.mxu1 }
 0x29a   : > { %v6785_v60 = vpop.f32.mrf.mxu1 }
 0x29c   : > { %v6787_v61 = vpop.f32.mrf.mxu1 }
 0x29e   : > { %v6789_v62 = vpop.f32.mrf.mxu1 }
 0x29f   : > { %v1503_v49 = vmax.f32 %v6787_v61, %v6789_v62 }
 0x2a0   : > { %v6791_v63 = vpop.f32.mrf.mxu1 }
 0x2a2   : > { %v6793_v0 = vpop.f32.mrf.mxu1 }
 0x2a4   : > { %v6795_v1 = vpop.f32.mrf.mxu1 }
 0x2a6   : > { %v6797_v2 = vpop.f32.mrf.mxu1 }
 0x2a7   : > { %v1509_v50 = vmax.f32 %v6795_v1, %v6797_v2 }
 0x2a8   : > { %v6799_v4 = vpop.f32.mrf.mxu1 }
 0x2aa   : > { %v6801_v5 = vpop.f32.mrf.mxu1 }
 0x2ac   : > { %v6803_v6 = vpop.f32.mrf.mxu1 }
 0x2ae   : > { %v6805_v7 = vpop.f32.mrf.mxu1 }
 0x2af   : > { %v1515_v54 = vmax.f32 %v6803_v6, %v6805_v7 }
 0x2b0   : > { %v6807_v8 = vpop.f32.mrf.mxu1 }
 0x2b2   : > { %v6809_v9 = vpop.f32.mrf.mxu1 }
 0x2b4   : > { %v6811_v10 = vpop.f32.mrf.mxu1 }
 0x2b6   : > { %v6813_v11 = vpop.f32.mrf.mxu1 }
 0x2b7   : > { %v1521_v55 = vmax.f32 %v6811_v10, %v6813_v11 }
 0x2b8   : > { %v6815_v12 = vpop.f32.mrf.mxu1 }
 0x2ba   : > { %v6817_v13 = vpop.f32.mrf.mxu1 }
 0x2bc   : > { %v6819_v14 = vpop.f32.mrf.mxu1 }
 0x2be   : > { %v6821_v15 = vpop.f32.mrf.mxu1 }
 0x2bf   : > { %v1527_v59 = vmax.f32 %v6819_v14, %v6821_v15 }
 0x2c0   : > { %v6823_v16 = vpop.f32.mrf.mxu1 }
 0x2c2   : > { %v6825_v17 = vpop.f32.mrf.mxu1 }
 0x2c3   : > { %v1530_v58 = vmax.f32 %v6823_v16, %v6825_v17 }
 0x2c4   : > { %v6827_v18 = vpop.f32.mrf.mxu1 }
 0x2c6   : > { %v6829_v19 = vpop.f32.mrf.mxu1 }
 0x2c7   : > { %v1533_v38 = vmax.f32 %v6827_v18, %v6829_v19 }
 0x2c8   : > { %v6831_v20 = vpop.f32.mrf.mxu1 }
 0x2ca   : > { %v6833_v21 = vpop.f32.mrf.mxu1 }
 0x2cb   : > { %v1536_v22 = vmax.f32 %v6831_v20, %v6833_v21 }
 0x2cc   : > { %v6837_v23 = vpop.f32.mrf.mxu1 }
 0x2cd   : > { %1537 = vmax.xlane.f32.xlu0 %v1536_v22  ;;  %v1524_v22 = vmax.f32 %v6815_v12, %v6817_v13 }
 0x2ce   : > { %v6839_v24 = vpop.f32.mrf.mxu1 }
 0x2cf   : > { %v1539_v53 = vmax.f32 %v6837_v23, %v6839_v24 }
 0x2d0   : > { %v6845_v48 = vpop.f32.mrf.mxu1 }
 0x2d1   : > { %9556 = vst [vmem:[#allocation31_spill] sm:$0xff] %v6845_v48  ;;  %1531 = vmax.xlane.f32.xlu0 %v1530_v58  ;;  %1540 = vmax.xlane.f32.xlu1 %v1539_v53  ;;  %v1518_v53 = vmax.f32 %v6807_v8, %v6809_v9 }
 0x2d2   : > { %v6847_v43 = vpop.f32.mrf.mxu1 }
 0x2d3   : > { %9557 = vst [vmem:[#allocation32_spill] sm:$0xff] %v6847_v43 }
 0x2d4   : > { %v6853_v33 = vpop.f32.mrf.mxu1 }
 0x2d5   : > { %9558 = vst [vmem:[#allocation33_spill] sm:$0xff] %v6853_v33  ;;  %1534 = vmax.xlane.f32.xlu0 %v1533_v38  ;;  %1525 = vmax.xlane.f32.xlu1 %v1524_v22  ;;  %v1512_v38 = vmax.f32 %v6799_v4, %v6801_v5 }
 0x2d6   : > { %v6855_v3 = vpop.f32.mrf.mxu1 }
 0x2d7   : > { %9559 = vst [vmem:[#allocation34_spill] sm:$0xff] %v6855_v3 }
 0x2d8   : > { %v6861_v58 = vpop.f32.mrf.mxu1 }
 0x2d9   : > { %1528 = vmax.xlane.f32.xlu0 %v1527_v59  ;;  %1519 = vmax.xlane.f32.xlu1 %v1518_v53  ;;  %v1506_v59 = vmax.f32 %v6791_v63, %v6793_v0 }
 0x2da   : > { %v6863_v56 = vpop.f32.mrf.mxu1 }
 0x2dc   : > { %v6869_v22 = vpop.f32.mrf.mxu1 }
 0x2dd   : > { %9560 = vst [vmem:[#allocation35_spill] sm:$0xff] %v6869_v22  ;;  %1522 = vmax.xlane.f32.xlu0 %v1521_v55  ;;  %1513 = vmax.xlane.f32.xlu1 %v1512_v38  ;;  %v1500_v55 = vmax.f32 %v6783_v29, %v6785_v60 }
 0x2de   : > { %v6871_v57 = vpop.f32.mrf.mxu1 }
 0x2e0   : > { %v6877_v53 = vpop.f32.mrf.mxu1 }
 0x2e1   : > { %1516 = vmax.xlane.f32.xlu0 %v1515_v54  ;;  %1507 = vmax.xlane.f32.xlu1 %v1506_v59  ;;  %v1494_v54 = vmax.f32 %v6775_v25, %v6777_v26 }
 0x2e2   : > { %v6879_v51 = vpop.f32.mrf.mxu1 }
 0x2e4   : > { %v6885_v38 = vpop.f32.mrf.mxu1 }
 0x2e5   : > { %1510 = vmax.xlane.f32.xlu0 %v1509_v50  ;;  %1501 = vmax.xlane.f32.xlu1 %v1500_v55 }
 0x2e6   : > { %v6887_v52 = vpop.f32.mrf.mxu1 }
 0x2e8   : > { %v6893_v59 = vpop.f32.mrf.mxu1 }
 0x2e9   : > { %1504 = vmax.xlane.f32.xlu0 %v1503_v49  ;;  %1495 = vmax.xlane.f32.xlu1 %v1494_v54 }
 0x2ea   : > { %v6895_v46 = vpop.f32.mrf.mxu1 }
 0x2ec   : > { %v6899_v47 = vpop.f32.mrf.mxu1 }
 0x2ed   : > { %1498 = vmax.xlane.f32.xlu0 %v1497_v45 }
 0x2ee   : > { %v6901_v50 = vpop.f32.mrf.mxu1 }
 0x2f0   : > { %v6903_v55 = vpop.f32.mrf.mxu1 }
 0x2f1   : > { %9561 = vst [vmem:[#allocation36_spill] sm:$0xff] %v6903_v55 }
 0x2f2   : > { %v6905_v44 = vpop.f32.mrf.mxu1 }
 0x2f3   : > { %9562 = vst [vmem:[#allocation37_spill] sm:$0xff] %v6905_v44 }
 0x2f4   : > { %v6907_v41 = vpop.f32.mrf.mxu1 }
 0x2f5   : > { %9563 = vst [vmem:[#allocation38_spill] sm:$0xff] %v6907_v41 }
 0x2f6   : > { %v6909_v40 = vpop.f32.mrf.mxu1 }
 0x2f7   : > { %9564 = vst [vmem:[#allocation39_spill] sm:$0xff] %v6909_v40 }
 0x2f8   : > { %v6911_v49 = vpop.f32.mrf.mxu1 }
 0x2fa   : > { %v6913_v54 = vpop.f32.mrf.mxu1 }
 0x2fb   : > { %v1572_v43 = vmax.f32 %v6911_v49, %v6913_v54 }
 0x2fc   : > { %v6915_v42 = vpop.f32.mrf.mxu1 }
 0x2fd   : > { %9565 = vst [vmem:[#allocation40_spill] sm:$0xff] %v6915_v42 }
 0x2fe   : > { %v6917_v39 = vpop.f32.mrf.mxu1 }
 0x2ff   : > { %9566 = vst [vmem:[#allocation41_spill] sm:$0xff] %v6917_v39 }
 0x300   : > { %v6919_v36 = vpop.f32.mrf.mxu1 }
 0x302   : > { %v6921_v45 = vpop.f32.mrf.mxu1 }
 0x303   : > { %9567 = vst [vmem:[#allocation42_spill] sm:$0xff] %v6921_v45  ;;  %v1578_v33 = vmax.f32 %v6919_v36, %v6921_v45  ;;  %v1575_v45 = vmax.f32 %v6915_v42, %v6917_v39 }
 0x304   : > { %v6923_v35 = vpop.f32.mrf.mxu1 }
 0x305   : > { %9568 = vst [vmem:[#allocation43_spill] sm:$0xff] %v6923_v35 }
 0x306   : > { %v6925_v37 = vpop.f32.mrf.mxu1 }
 0x307   : > { %9569 = vst [vmem:[#allocation44_spill] sm:$0xff] %v6925_v37  ;;  %v1581_v22 = vmax.f32 %v6923_v35, %v6925_v37 }
 0x308   : > { %v6927_v34 = vpop.f32.mrf.mxu1 }
 0x30a   : > { %v6929_v31 = vpop.f32.mrf.mxu1 }
 0x30b   : > { %v1584_v30 = vmax.f32 %v6927_v34, %v6929_v31 }
 0x30c   : > { %v6933_v32 = vpop.f32.mrf.mxu1 }
 0x30d   : > { %1585 = vmax.xlane.f32.xlu1 %v1584_v30  ;;  %v1566_v30 = vmax.f32 %v6903_v55, %v6905_v44 }
 0x30e   : > { %v6937_v3 = vpop.f32.mrf.mxu1 }
 0x30f   : > { %v1587_v48 = vmax.f32 %v6933_v32, %v6937_v3 }
 0x311   : > { %1579 = vmax.xlane.f32.xlu1 %v1578_v33  ;;  %1588 = vmax.xlane.f32.xlu0 %v1587_v48  ;;  %v1569_v33 = vmax.f32 %v6907_v41, %v6909_v40  ;;  %v5681_v48 = vld [vmem:[%s9354_s2 + $0x50] sm:$0xff]  }
 0x312   : > { %5284 = vmatmul.mubr.msk.bf16.gmra.mxu0 %vm478_vm0, %v5681_v48 }
 0x315   : > { %1573 = vmax.xlane.f32.xlu1 %v1572_v43  ;;  %1582 = vmax.xlane.f32.xlu0 %v1581_v22  ;;  %v9570_v43 = vmov 0   ;;  %v5682_v22 = vld [vmem:[%s9354_s2 + $0x58] sm:$0xff]  }
 0x316   : > { %693 = vmatprep.mubr.bf16.mxu0 %v9570_v43 }
 0x319   : > { %1567 = vmax.xlane.f32.xlu1 %v1566_v30  ;;  %1576 = vmax.xlane.f32.xlu0 %v1575_v45  ;;  %v5683_v45 = vld [vmem:[%s9354_s2 + $0x60] sm:$0xff]   ;;  %v5684_v30 = vld [vmem:[%s9354_s2 + $0x68] sm:$0xff]  }
 0x31a   : > { %5285 = vmatmul.mubr.msk.bf16.gmra.mxu0 %vm478_vm0, %v5682_v22 }
 0x31b   : > { %703 = vmatprep.mubr.bf16.mxu0 %v9570_v43 }
 0x31d   : > { %1570 = vmax.xlane.f32.xlu0 %v1569_v33 }
 0x322   : > { %5286 = vmatmul.mubr.msk.bf16.gmra.mxu0 %vm478_vm0, %v5683_v45 }
 0x323   : > { %713 = vmatprep.mubr.bf16.mxu0 %v9570_v43 }
 0x32a   : > { %5287 = vmatmul.mubr.msk.bf16.gmra.mxu0 %vm478_vm0, %v5684_v30 }
 0x32b   : > { %723 = vmatprep.mubr.bf16.mxu0 %v9570_v43 }
 0x356   : > { %v1538_v33 = vpop.xlane.xlu0 %1537 }
 0x357   : > { %v1618_v48 = vsub.f32 %v6831_v20, %v1538_v33  ;;  %v1619_v40 = vsub.f32 %v6833_v21, %v1538_v33  ;;  %v5685_v21 = vld [vmem:[%s9354_s2 + $0x70] sm:$0xff]  }
 0x358   : > { %5288 = vmatmul.mubr.msk.bf16.gmra.mxu0 %vm478_vm0, %v5685_v21 }
 0x359   : > { %v1710_v22 = vmul.f32 1.442695, %v1618_v48  ;;  %v1712_v41 = vmul.f32 1.442695, %v1619_v40  ;;  %733 = vmatprep.mubr.bf16.mxu0 %v9570_v43 }
 0x35a   : > { %v1532_v39 = vpop.xlane.xlu0 %1531  ;;  %v1541_v42 = vpop.xlane.xlu1 %1540 }
 0x35b   : > { %5701 = vpow2.f32 %v1710_v22  ;;  %v1614_v45 = vsub.f32 %v6823_v16, %v1532_v39  ;;  %v1615_v44 = vsub.f32 %v6825_v17, %v1532_v39  ;;  %v1620_v55 = vsub.f32 %v6837_v23, %v1541_v42 }
 0x35c   : > { %5703 = vpow2.f32 %v1712_v41  ;;  %v1621_v20 = vsub.f32 %v6839_v24, %v1541_v42 }
 0x35d   : > { %v1702_v30 = vmul.f32 1.442695, %v1614_v45  ;;  %v1704_v40 = vmul.f32 1.442695, %v1615_v44  ;;  %v1714_v33 = vmul.f32 1.442695, %v1620_v55 }
 0x35e   : > { %v1716_v48 = vmul.f32 1.442695, %v1621_v20  ;;  %v1535_v37 = vpop.xlane.xlu0 %1534  ;;  %v1526_v35 = vpop.xlane.xlu1 %1525 }
 0x35f   : > { %5705 = vpow2.f32 %v1702_v30  ;;  %v1616_v16 = vsub.f32 %v6827_v18, %v1535_v37  ;;  %v1617_v39 = vsub.f32 %v6829_v19, %v1535_v37  ;;  %v1610_v41 = vsub.f32 %v6815_v12, %v1526_v35 }
 0x360   : > { %5707 = vpow2.f32 %v1704_v40  ;;  %v1611_v42 = vsub.f32 %v6817_v13, %v1526_v35 }
 0x361   : > { %5709 = vpow2.f32 %v1714_v33  ;;  %v1706_v23 = vmul.f32 1.442695, %v1616_v16  ;;  %v1708_v24 = vmul.f32 1.442695, %v1617_v39  ;;  %v1694_v55 = vmul.f32 1.442695, %v1610_v41 }
 0x362   : > { %5711 = vpow2.f32 %v1716_v48  ;;  %v1529_v44 = vpop.xlane.xlu0 %1528  ;;  %v1520_v17 = vpop.xlane.xlu1 %1519  ;;  %v1696_v22 = vmul.f32 1.442695, %v1611_v42 }
 0x363   : > { %5713 = vpow2.f32 %v1706_v23  ;;  %v1612_v18 = vsub.f32 %v6819_v14, %v1529_v44  ;;  %v1613_v19 = vsub.f32 %v6821_v15, %v1529_v44  ;;  %v1606_v35 = vsub.f32 %v6807_v8, %v1520_v17 }
 0x364   : > { %5715 = vpow2.f32 %v1708_v24  ;;  %v1607_v13 = vsub.f32 %v6809_v9, %v1520_v17  ;;  %v1560_v8 = vmax.f32 %v6893_v59, %v6895_v46 }
 0x365   : > { %5717 = vpow2.f32 %v1694_v55  ;;  %v1698_v30 = vmul.f32 1.442695, %v1612_v18  ;;  %v1700_v40 = vmul.f32 1.442695, %v1613_v19  ;;  %v1686_v15 = vmul.f32 1.442695, %v1606_v35 }
 0x366   : > { %v1523_v12 = vpop.xlane.xlu0 %1522  ;;  %v1514_v45 = vpop.xlane.xlu1 %1513  ;;  %5719 = vpow2.f32 %v1696_v22  ;;  %v1688_v16 = vmul.f32 1.442695, %v1607_v13 }
 0x367   : > { %5721 = vpow2.f32 %v1698_v30  ;;  %v1608_v42 = vsub.f32 %v6811_v10, %v1523_v12  ;;  %v1609_v44 = vsub.f32 %v6813_v11, %v1523_v12  ;;  %v1602_v23 = vsub.f32 %v6799_v4, %v1514_v45 }
 0x368   : > { %v6987_v37 = vpop.eup %5701  ;;  %5723 = vpow2.f32 %v1700_v40  ;;  %v1603_v24 = vsub.f32 %v6801_v5, %v1514_v45  ;;  %v1563_v12 = vmax.f32 %v6899_v47, %v6901_v50  ;;  %v1554_v30 = vmax.f32 %v6877_v53, %v6879_v51  ;;  %v5686_v40 = vld [vmem:[%s9354_s2 + $0x78] sm:$0xff]  }
 0x369   : > { %v6990_v20 = vpop.eup %5703  ;;  %5725 = vpow2.f32 %v1686_v15  ;;  %v1690_v22 = vmul.f32 1.442695, %v1608_v42  ;;  %v1692_v10 = vmul.f32 1.442695, %v1609_v44  ;;  %v1678_v4 = vmul.f32 1.442695, %v1602_v23  ;;  %5289 = vmatmul.mubr.msk.bf16.gmra.mxu0 %vm478_vm0, %v5686_v40 }
 0x36a   : > { %v1824_v21 = vadd.f32 %v6990_v20, %v6987_v37  ;;  %v1517_v39 = vpop.xlane.xlu0 %1516  ;;  %v1508_v41 = vpop.xlane.xlu1 %1507  ;;  %5727 = vpow2.f32 %v1688_v16  ;;  %v1680_v45 = vmul.f32 1.442695, %v1603_v24  ;;  %743 = vmatprep.mubr.bf16.mxu0 %v9570_v43 }
 0x36b   : > { %v1598_v13 = vsub.f32 %v6791_v63, %v1508_v41  ;;  %5729 = vpow2.f32 %v1690_v22  ;;  %v1604_v16 = vsub.f32 %v6803_v6, %v1517_v39  ;;  %v1605_v63 = vsub.f32 %v6805_v7, %v1517_v39 }
 0x36c   : > { %v6996_v14 = vpop.eup %5705  ;;  %1825 = vadd.xlane.f32.xlu1 %v1824_v21  ;;  %v1599_v21 = vsub.f32 %v6793_v0, %v1508_v41  ;;  %5731 = vpow2.f32 %v1692_v10  ;;  %v1557_v22 = vmax.f32 %v6885_v38, %v6887_v52 }
 0x36d   : > { %v6998_v33 = vpop.eup %5707  ;;  %5733 = vpow2.f32 %v1678_v4  ;;  %v1670_v41 = vmul.f32 1.442695, %v1598_v13  ;;  %v1682_v39 = vmul.f32 1.442695, %v1604_v16 }
 0x36e   : > { %v7000_v48 = vpop.eup %5709  ;;  %v1818_v55 = vadd.f32 %v6998_v33, %v6996_v14  ;;  %v1511_v19 = vpop.xlane.xlu0 %1510  ;;  %5735 = vpow2.f32 %v1680_v45  ;;  %v1672_v42 = vmul.f32 1.442695, %v1599_v21 }
 0x36f   : > { %v7004_v9 = vpop.eup %5711  ;;  %v1502_v11 = vpop.xlane.xlu1 %1501  ;;  %v1600_v23 = vsub.f32 %v6795_v1, %v1511_v19  ;;  %5737 = vpow2.f32 %v1670_v41 }
 0x370   : > { %1561 = vmax.xlane.f32.xlu1 %v1560_v8  ;;  %v1827_v17 = vadd.f32 %v7004_v9, %v7000_v48  ;;  %v7014_v18 = vpop.eup %5713  ;;  %v1594_v8 = vsub.f32 %v6783_v29, %v1502_v11  ;;  %v1595_v44 = vsub.f32 %v6785_v60, %v1502_v11  ;;  %v1601_v29 = vsub.f32 %v6797_v2, %v1511_v19 }
 0x371   : > { %v7018_v35 = vpop.eup %5715  ;;  %5739 = vpow2.f32 %v1672_v42  ;;  %v1548_v2 = vmax.f32 %v6861_v58, %v6863_v56  ;;  %v1674_v13 = vmul.f32 1.442695, %v1600_v23  ;;  %v9573_v23 = vld [vmem:[#allocation31_spill] sm:$0xff] }
 0x372   : > { %1828 = vadd.xlane.f32.xlu0 %v1827_v17  ;;  %v7021_v5 = vpop.eup %5717  ;;  %v1821_v0 = vadd.f32 %v7018_v35, %v7014_v18  ;;  %v1505_v6 = vpop.xlane.xlu0 %1504  ;;  %v1662_v60 = vmul.f32 1.442695, %v1594_v8  ;;  %v1664_v4 = vmul.f32 1.442695, %v1595_v44  ;;  %5741 = vpow2.f32 %v1682_v39  ;;  %v9571_v44 = vld [vmem:[#allocation35_spill] sm:$0xff]  ;;  %v9572_v39 = vld [vmem:[#allocation32_spill] sm:$0xff] }
 0x373   : > { %v7029_v15 = vpop.eup %5719  ;;  %v1496_v17 = vpop.xlane.xlu1 %1495  ;;  %v1596_v45 = vsub.f32 %v6787_v61, %v1505_v6  ;;  %v1676_v21 = vmul.f32 1.442695, %v1601_v29 }
 0x374   : > { %1819 = vadd.xlane.f32.xlu1 %v1818_v55  ;;  %v1812_v7 = vadd.f32 %v7029_v15, %v7021_v5  ;;  %v7042_v24 = vpop.eup %5721  ;;  %v1684_v55 = vmul.f32 1.442695, %v1605_v63  ;;  %v1590_v11 = vsub.f32 %v6775_v25, %v1496_v17  ;;  %v1591_v1 = vsub.f32 %v6777_v26, %v1496_v17  ;;  %v5687_v25 = vld [vmem:[%s9354_s2 + $0x80] sm:$0xff]  }
 0x375   : > { %v7047_v10 = vpop.eup %5723  ;;  %5290 = vmatmul.mubr.msk.bf16.gmra.mxu0 %vm478_vm0, %v5687_v25 }
 0x376   : > { %1564 = vmax.xlane.f32.xlu0 %v1563_v12  ;;  %v7050_v12 = vpop.eup %5725  ;;  %5743 = vpow2.f32 %v1684_v55  ;;  %v1499_v40 = vpop.xlane.xlu0 %1498  ;;  %v1815_v26 = vadd.f32 %v7047_v10, %v7042_v24  ;;  %v1654_v16 = vmul.f32 1.442695, %v1590_v11  ;;  %v1656_v63 = vmul.f32 1.442695, %v1591_v1  ;;  %753 = vmatprep.mubr.bf16.mxu0 %v9570_v43 }
 0x377   : > { %v7055_v19 = vpop.eup %5727  ;;  %5745 = vpow2.f32 %v1662_v60  ;;  %v1593_v42 = vsub.f32 %v6781_v28, %v1499_v40 }
 0x378   : > { %1555 = vmax.xlane.f32.xlu1 %v1554_v30  ;;  %v1597_v30 = vsub.f32 %v6789_v62, %v1505_v6  ;;  %5747 = vpow2.f32 %v1664_v4  ;;  %v1806_v61 = vadd.f32 %v7055_v19, %v7050_v12  ;;  %v1592_v62 = vsub.f32 %v6779_v27, %v1499_v40  ;;  %v7069_v41 = vpop.eup %5729  ;;  %v5688_v4 = vld [vmem:[%s9354_s2 + $0x88] sm:$0xff]  }
 0x379   : > { %5749 = vpow2.f32 %v1674_v13  ;;  %v1551_v6 = vmax.f32 %v9571_v44, %v6871_v57  ;;  %v7074_v17 = vpop.eup %5731  ;;  %v1542_v27 = vmax.f32 %v9573_v23, %v9572_v39  ;;  %v1660_v28 = vmul.f32 1.442695, %v1593_v42  ;;  %v9574_v13 = vld [vmem:[#allocation34_spill] sm:$0xff] }
 0x37a   : > { %1822 = vadd.xlane.f32.xlu0 %v1821_v0  ;;  %v1666_v0 = vmul.f32 1.442695, %v1596_v45  ;;  %5751 = vpow2.f32 %v1676_v21  ;;  %v1668_v8 = vmul.f32 1.442695, %v1597_v30  ;;  %v1658_v29 = vmul.f32 1.442695, %v1592_v62 }
 0x37b   : > { %5753 = vpow2.f32 %v1654_v16  ;;  %v9575_v45 = vld [vmem:[#allocation33_spill] sm:$0xff] }
 0x37c   : > { %1813 = vadd.xlane.f32.xlu1 %v1812_v7  ;;  %v7076_v7 = vpop.eup %5733  ;;  %5755 = vpow2.f32 %v1656_v63  ;;  %v1545_v25 = vmax.f32 %v9575_v45, %v9574_v13 }
 0x37d   : > { %v7080_v55 = vpop.eup %5735  ;;  %5757 = vpow2.f32 %v1666_v0  ;;  %5291 = vmatmul.mubr.msk.bf16.gmra.mxu0 %vm478_vm0, %v5688_v4 }
 0x37e   : > { %1558 = vmax.xlane.f32.xlu0 %v1557_v22  ;;  %5759 = vpow2.f32 %v1668_v8  ;;  %v1809_v22 = vadd.f32 %v7074_v17, %v7069_v41  ;;  %v7084_v60 = vpop.eup %5737  ;;  %v1800_v11 = vadd.f32 %v7080_v55, %v7076_v7  ;;  %763 = vmatprep.mubr.bf16.mxu0 %v9570_v43 }
 0x37f   : > { %v7091_v1 = vpop.eup %5739  ;;  %5761 = vpow2.f32 %v1658_v29 }
 0x380   : > { %1549 = vmax.xlane.f32.xlu1 %v1548_v2  ;;  %v7093_v2 = vpop.eup %5741  ;;  %5763 = vpow2.f32 %v1660_v28  ;;  %v1794_v40 = vadd.f32 %v7091_v1, %v7084_v60 }
 0x382   : > { %1816 = vadd.xlane.f32.xlu0 %v1815_v26 }
 0x383   : > { %v7098_v21 = vpop.eup %5743 }
 0x384   : > { %1807 = vadd.xlane.f32.xlu1 %v1806_v61  ;;  %v7101_v30 = vpop.eup %5745  ;;  %v1803_v63 = vadd.f32 %v7098_v21, %v7093_v2 }
 0x385   : > { %9576 = vst [vmem:[#allocation35_spill] sm:$0xff] %v7101_v30  ;;  %v7105_v26 = vpop.eup %5747 }
 0x386   : > { %1552 = vmax.xlane.f32.xlu0 %v1551_v6  ;;  %9577 = vst [vmem:[#allocation32_spill] sm:$0xff] %v7105_v26  ;;  %v7107_v16 = vpop.eup %5749  ;;  %v1788_v62 = vadd.f32 %v7105_v26, %v7101_v30 }
 0x387   : > { %v7111_v61 = vpop.eup %5751 }
 0x388   : > { %1543 = vmax.xlane.f32.xlu1 %v1542_v27  ;;  %v7113_v0 = vpop.eup %5753  ;;  %v1797_v6 = vadd.f32 %v7111_v61, %v7107_v16 }
 0x389   : > { %9578 = vst [vmem:[#allocation31_spill] sm:$0xff] %v7113_v0  ;;  %v7117_v8 = vpop.eup %5755 }
 0x38a   : > { %1810 = vadd.xlane.f32.xlu0 %v1809_v22  ;;  %9579 = vst [vmem:[#allocation34_spill] sm:$0xff] %v7117_v8  ;;  %v7119_v42 = vpop.eup %5757  ;;  %v1782_v28 = vadd.f32 %v7117_v8, %v7113_v0  ;;  %v9583_v8 = vld [vmem:[#allocation42_spill] sm:$0xff] }
 0x38b   : > { %9580 = vst [vmem:[#allocation33_spill] sm:$0xff] %v7119_v42  ;;  %v7123_v27 = vpop.eup %5759 }
 0x38c   : > { %1801 = vadd.xlane.f32.xlu1 %v1800_v11  ;;  %v7129_v4 = vpop.eup %5761 }
 0x38d   : > { %9581 = vst [vmem:[#allocation45_spill] sm:$0xff] %v7129_v4 }
 0x38e   : > { %1546 = vmax.xlane.f32.xlu0 %v1545_v25  ;;  %v1791_v25 = vadd.f32 %v7123_v27, %v7119_v42 }
 0x390   : > { %1795 = vadd.xlane.f32.xlu1 %v1794_v40  ;;  %v7133_v40 = vpop.eup %5763 }
 0x391   : > { %9582 = vst [vmem:[#allocation46_spill] sm:$0xff] %v7133_v40 }
 0x392   : > { %1804 = vadd.xlane.f32.xlu0 %v1803_v63 }
 0x394   : > { %1789 = vadd.xlane.f32.xlu1 %v1788_v62 }
 0x396   : > { %1798 = vadd.xlane.f32.xlu0 %v1797_v6  ;;  %v1586_v29 = vpop.xlane.xlu1 %1585 }
 0x397   : > { %v1650_v22 = vsub.f32 %v6927_v34, %v1586_v29  ;;  %v1651_v11 = vsub.f32 %v6929_v31, %v1586_v29 }
 0x398   : > { %1783 = vadd.xlane.f32.xlu1 %v1782_v28  ;;  %v1785_v28 = vadd.f32 %v7133_v40, %v7129_v4  ;;  %v9587_v4 = vld [vmem:[#allocation37_spill] sm:$0xff]  ;;  %v9588_v40 = vld [vmem:[#allocation40_spill] sm:$0xff] }
 0x399   : > { %v1774_v63 = vmul.f32 1.442695, %v1650_v22  ;;  %v1776_v62 = vmul.f32 1.442695, %v1651_v11 }
 0x39a   : > { %1792 = vadd.xlane.f32.xlu0 %v1791_v25  ;;  %v1580_v6 = vpop.xlane.xlu1 %1579  ;;  %v1589_v43 = vpop.xlane.xlu0 %1588 }
 0x39b   : > { %5765 = vpow2.f32 %v1774_v63  ;;  %v1646_v0 = vsub.f32 %v6919_v36, %v1580_v6  ;;  %v1647_v34 = vsub.f32 %v9583_v8, %v1580_v6  ;;  %v1652_v31 = vsub.f32 %v6933_v32, %v1589_v43  ;;  %v9584_v63 = vld [vmem:[#allocation43_spill] sm:$0xff] }
 0x39c   : > { %5767 = vpow2.f32 %v1776_v62  ;;  %v1653_v29 = vsub.f32 %v6937_v3, %v1589_v43  ;;  %v9585_v62 = vld [vmem:[#allocation44_spill] sm:$0xff] }
 0x39d   : > { %v1766_v30 = vmul.f32 1.442695, %v1646_v0  ;;  %v1768_v42 = vmul.f32 1.442695, %v1647_v34  ;;  %v1778_v22 = vmul.f32 1.442695, %v1652_v31 }
 0x39e   : > { %v1780_v11 = vmul.f32 1.442695, %v1653_v29  ;;  %1786 = vadd.xlane.f32.xlu0 %v1785_v28  ;;  %v1574_v25 = vpop.xlane.xlu1 %1573  ;;  %v1583_v26 = vpop.xlane.xlu0 %1582  ;;  %v9586_v28 = vld [vmem:[#allocation36_spill] sm:$0xff] }
 0x39f   : > { %5769 = vpow2.f32 %v1766_v30  ;;  %v1642_v36 = vsub.f32 %v6911_v49, %v1574_v25  ;;  %v1643_v8 = vsub.f32 %v6913_v54, %v1574_v25  ;;  %v1648_v32 = vsub.f32 %v9584_v63, %v1583_v26  ;;  %v9589_v25 = vld [vmem:[#allocation41_spill] sm:$0xff]  ;;  %v9590_v63 = vld [vmem:[#allocation38_spill] sm:$0xff] }
 0x3a0   : > { %5771 = vpow2.f32 %v1768_v42  ;;  %v1649_v3 = vsub.f32 %v9585_v62, %v1583_v26  ;;  %v9591_v62 = vld [vmem:[#allocation39_spill] sm:$0xff] }
 0x3a1   : > { %5773 = vpow2.f32 %v1778_v22  ;;  %v1758_v43 = vmul.f32 1.442695, %v1642_v36  ;;  %v1760_v6 = vmul.f32 1.442695, %v1643_v8  ;;  %v1770_v0 = vmul.f32 1.442695, %v1648_v32 }
 0x3a2   : > { %5775 = vpow2.f32 %v1780_v11  ;;  %v1772_v34 = vmul.f32 1.442695, %v1649_v3  ;;  %v1568_v31 = vpop.xlane.xlu1 %1567  ;;  %v1577_v29 = vpop.xlane.xlu0 %1576 }
 0x3a3   : > { %5777 = vpow2.f32 %v1758_v43  ;;  %v1638_v30 = vsub.f32 %v9586_v28, %v1568_v31  ;;  %v1639_v49 = vsub.f32 %v9587_v4, %v1568_v31  ;;  %v1644_v54 = vsub.f32 %v9588_v40, %v1577_v29 }
 0x3a4   : > { %5779 = vpow2.f32 %v1760_v6  ;;  %v1645_v42 = vsub.f32 %v9589_v25, %v1577_v29 }
 0x3a5   : > { %5781 = vpow2.f32 %v1770_v0  ;;  %v1750_v26 = vmul.f32 1.442695, %v1638_v30  ;;  %v1752_v22 = vmul.f32 1.442695, %v1639_v49  ;;  %v1762_v36 = vmul.f32 1.442695, %v1644_v54 }
 0x3a6   : > { %5783 = vpow2.f32 %v1772_v34  ;;  %v1764_v8 = vmul.f32 1.442695, %v1645_v42  ;;  %v1571_v11 = vpop.xlane.xlu0 %1570 }
 0x3a7   : > { %5785 = vpow2.f32 %v1750_v26  ;;  %v1640_v32 = vsub.f32 %v9590_v63, %v1571_v11  ;;  %v1641_v3 = vsub.f32 %v9591_v62, %v1571_v11 }
 0x3a8   : > { %v7151_v43 = vpop.eup %5765  ;;  %5787 = vpow2.f32 %v1752_v22 }
 0x3a9   : > { %v7153_v4 = vpop.eup %5767  ;;  %5789 = vpow2.f32 %v1762_v36  ;;  %v1754_v40 = vmul.f32 1.442695, %v1640_v32  ;;  %v1756_v6 = vmul.f32 1.442695, %v1641_v3 }
 0x3aa   : > { %5791 = vpow2.f32 %v1764_v8  ;;  %v1872_v0 = vadd.f32 %v7153_v4, %v7151_v43 }
 0x3ab   : > { %5793 = vpow2.f32 %v1754_v40 }
 0x3ac   : > { %v7157_v34 = vpop.eup %5769  ;;  %5795 = vpow2.f32 %v1756_v6  ;;  %1873 = vadd.xlane.f32.xlu1 %v1872_v0 }
 0x3ad   : > { %v7159_v31 = vpop.eup %5771 }
 0x3ae   : > { %v7161_v29 = vpop.eup %5773  ;;  %v1866_v28 = vadd.f32 %v7159_v31, %v7157_v34 }
 0x3af   : > { %v7165_v30 = vpop.eup %5775 }
 0x3b0   : > { %v7167_v49 = vpop.eup %5777  ;;  %1867 = vadd.xlane.f32.xlu1 %v1866_v28  ;;  %v1875_v54 = vadd.f32 %v7165_v30, %v7161_v29 }
 0x3b1   : > { %9592 = vst [vmem:[#allocation42_spill] sm:$0xff] %v7167_v49  ;;  %v7171_v25 = vpop.eup %5779 }
 0x3b2   : > { %9593 = vst [vmem:[#allocation43_spill] sm:$0xff] %v7171_v25  ;;  %v7173_v42 = vpop.eup %5781  ;;  %1876 = vadd.xlane.f32.xlu0 %v1875_v54  ;;  %v1860_v26 = vadd.f32 %v7171_v25, %v7167_v49 }
 0x3b3   : > { %v7177_v22 = vpop.eup %5783 }
 0x3b4   : > { %v7179_v36 = vpop.eup %5785  ;;  %1861 = vadd.xlane.f32.xlu1 %v1860_v26  ;;  %v1869_v8 = vadd.f32 %v7177_v22, %v7173_v42 }
 0x3b5   : > { %9594 = vst [vmem:[#allocation44_spill] sm:$0xff] %v7179_v36  ;;  %v7183_v11 = vpop.eup %5787 }
 0x3b6   : > { %9595 = vst [vmem:[#allocation36_spill] sm:$0xff] %v7183_v11  ;;  %v7185_v63 = vpop.eup %5789  ;;  %1870 = vadd.xlane.f32.xlu0 %v1869_v8  ;;  %v1854_v32 = vadd.f32 %v7183_v11, %v7179_v36 }
 0x3b7   : > { %9596 = vst [vmem:[#allocation37_spill] sm:$0xff] %v7185_v63  ;;  %v7189_v62 = vpop.eup %5791 }
 0x3b8   : > { %v7191_v3 = vpop.eup %5793  ;;  %1855 = vadd.xlane.f32.xlu1 %v1854_v32  ;;  %v1863_v40 = vadd.f32 %v7189_v62, %v7185_v63 }
 0x3b9   : > { %9597 = vst [vmem:[#allocation40_spill] sm:$0xff] %v7191_v3  ;;  %v7195_v6 = vpop.eup %5795 }
 0x3ba   : > { %9598 = vst [vmem:[#allocation41_spill] sm:$0xff] %v7195_v6  ;;  %1864 = vadd.xlane.f32.xlu0 %v1863_v40  ;;  %v1857_v0 = vadd.f32 %v7195_v6, %v7191_v3 }
 0x3be   : > { %1858 = vadd.xlane.f32.xlu0 %v1857_v0 }
 0x3d2   : > { %v7203_v0 = vpop.f32.mrf.mxu0 }
 0x3f5   : > { %v1826_v28 = vpop.xlane.xlu1 %1825 }
 0x3f6   : > { %5797 = vrcp.f32 %v1826_v28 }
 0x3f9   : > { %v1562_v54 = vpop.xlane.xlu1 %1561 }
 0x3fa   : > { %v1634_v26 = vsub.f32 %v6893_v59, %v1562_v54  ;;  %v1635_v8 = vsub.f32 %v6895_v46, %v1562_v54  ;;  %v7207_v54 = vpop.f32.mrf.mxu0 }
 0x3fb   : > { %v1829_v36 = vpop.xlane.xlu0 %1828 }
 0x3fc   : > { %v1742_v11 = vmul.f32 1.442695, %v1634_v26  ;;  %v1744_v32 = vmul.f32 1.442695, %v1635_v8  ;;  %5799 = vrcp.f32 %v1829_v36  ;;  %v7209_v8 = vpop.f32.mrf.mxu0 }
 0x3fd   : > { %v1820_v49 = vpop.xlane.xlu1 %1819 }
 0x3fe   : > { %5801 = vpow2.f32 %v1742_v11 }
 0x3ff   : > { %5803 = vpow2.f32 %v1744_v32  ;;  %v1565_v63 = vpop.xlane.xlu0 %1564 }
 0x400   : > { %v1636_v40 = vsub.f32 %v6899_v47, %v1565_v63  ;;  %v1637_v3 = vsub.f32 %v6901_v50, %v1565_v63  ;;  %5805 = vrcp.f32 %v1820_v49 }
 0x401   : > { %v1556_v28 = vpop.xlane.xlu1 %1555 }
 0x402   : > { %v1746_v6 = vmul.f32 1.442695, %v1636_v40  ;;  %v1748_v25 = vmul.f32 1.442695, %v1637_v3  ;;  %v1630_v59 = vsub.f32 %v6877_v53, %v1556_v28  ;;  %v1631_v46 = vsub.f32 %v6879_v51, %v1556_v28 }
 0x403   : > { %v1823_v36 = vpop.xlane.xlu0 %1822  ;;  %v5798_v63 = vpop.eup %5797 }
 0x404   : > { %5807 = vpow2.f32 %v1746_v6  ;;  %v1734_v11 = vmul.f32 1.442695, %v1630_v59  ;;  %v1736_v26 = vmul.f32 1.442695, %v1631_v46  ;;  %v1939_v32 = vmul.f32 %v5798_v63, %v6990_v20 }
 0x405   : > { %5809 = vpow2.f32 %v1748_v25  ;;  %v1814_v47 = vpop.xlane.xlu1 %1813 }
 0x406   : > { %5811 = vpow2.f32 %v1734_v11 }
 0x407   : > { %5813 = vpow2.f32 %v1736_v26  ;;  %v1559_v53 = vpop.xlane.xlu0 %1558 }
 0x408   : > { %5815 = vrcp.f32 %v1823_v36  ;;  %v1632_v51 = vsub.f32 %v6885_v38, %v1559_v53  ;;  %v1633_v49 = vsub.f32 %v6887_v52, %v1559_v53  ;;  %v1938_v38 = vmul.f32 %v5798_v63, %v6987_v37 }
 0x409   : > { %v5800_v3 = vpop.eup %5799  ;;  %v1550_v6 = vpop.xlane.xlu1 %1549  ;;  %5817 = vrcp.f32 %v1814_v47 }
 0x40a   : > { %v1738_v40 = vmul.f32 1.442695, %v1632_v51  ;;  %v1740_v28 = vmul.f32 1.442695, %v1633_v49  ;;  %v1626_v25 = vsub.f32 %v6861_v58, %v1550_v6  ;;  %v1627_v59 = vsub.f32 %v6863_v56, %v1550_v6  ;;  %v7231_v6 = vpop.f32.mrf.mxu0 }
 0x40b   : > { %v7218_v46 = vpop.eup %5801  ;;  %v1817_v11 = vpop.xlane.xlu0 %1816  ;;  %v1941_v36 = vmul.f32 %v5800_v3, %v7004_v9  ;;  %v1940_v52 = vmul.f32 %v5800_v3, %v7000_v48 }
 0x40c   : > { %v7223_v26 = vpop.eup %5803  ;;  %5819 = vpow2.f32 %v1738_v40  ;;  %v1726_v20 = vmul.f32 1.442695, %v1626_v25  ;;  %v1728_v53 = vmul.f32 1.442695, %v1627_v59 }
 0x40d   : > { %5821 = vpow2.f32 %v1740_v28  ;;  %v1989_v51 = vpack.c.bf16 %v1941_v36, %v1939_v32  ;;  %v1808_v58 = vpop.xlane.xlu1 %1807  ;;  %v1988_v49 = vpack.c.bf16 %v1940_v52, %v1938_v38  ;;  %v1848_v56 = vadd.f32 %v7223_v26, %v7218_v46  ;;  %v5806_v37 = vpop.eup %5805 }
 0x40e   : > { %5823 = vpow2.f32 %v1726_v20 }
 0x40f   : > { %5825 = vpow2.f32 %v1728_v53  ;;  %2026 = vmatprep.subr.bf16.mxu1 %v1989_v51  ;;  %v1553_v9 = vpop.xlane.xlu0 %1552  ;;  %1849 = vadd.xlane.f32.xlu1 %v1848_v56  ;;  %v1935_v53 = vmul.f32 %v5806_v37, %v6998_v33  ;;  %v7246_v51 = vpop.f32.mrf.mxu0 }
 0x410   : > { %5827 = vrcp.f32 %v1817_v11  ;;  %2027 = vmatpush1.bf16.xpose.msra.mxu1 %v1988_v49  ;;  %v1628_v48 = vsub.f32 %v9571_v44, %v1553_v9  ;;  %v1629_v47 = vsub.f32 %v6871_v57, %v1553_v9  ;;  %v1934_v49 = vmul.f32 %v5806_v37, %v6996_v14 }
 0x411   : > { %v7229_v63 = vpop.eup %5807  ;;  %v1544_v3 = vpop.xlane.xlu1 %1543  ;;  %5829 = vrcp.f32 %v1808_v58 }
 0x412   : > { %v7233_v32 = vpop.eup %5809  ;;  %v1730_v40 = vmul.f32 1.442695, %v1628_v48  ;;  %v1732_v28 = vmul.f32 1.442695, %v1629_v47  ;;  %v1622_v25 = vsub.f32 %v9573_v23, %v1544_v3  ;;  %v1623_v59 = vsub.f32 %v9572_v39, %v1544_v3 }
 0x413   : > { %v7237_v36 = vpop.eup %5811  ;;  %v1811_v11 = vpop.xlane.xlu0 %1810  ;;  %v1851_v57 = vadd.f32 %v7233_v32, %v7229_v63 }
 0x414   : > { %v7241_v44 = vpop.eup %5813  ;;  %5831 = vpow2.f32 %v1730_v40  ;;  %v1718_v38 = vmul.f32 1.442695, %v1622_v25  ;;  %v1720_v52 = vmul.f32 1.442695, %v1623_v59  ;;  %v7255_v59 = vpop.f32.mrf.mxu0 }
 0x415   : > { %v5816_v20 = vpop.eup %5815  ;;  %5833 = vpow2.f32 %v1732_v28  ;;  %1852 = vadd.xlane.f32.xlu0 %v1851_v57  ;;  %v1802_v23 = vpop.xlane.xlu1 %1801  ;;  %v1842_v39 = vadd.f32 %v7241_v44, %v7237_v36 }
 0x416   : > { %5835 = vpow2.f32 %v1718_v38  ;;  %v1937_v58 = vmul.f32 %v5816_v20, %v7018_v35  ;;  %v1936_v56 = vmul.f32 %v5816_v20, %v7014_v18  ;;  %v5818_v48 = vpop.eup %5817  ;;  %v7263_v57 = vpop.f32.mrf.mxu0 }
 0x417   : > { %5837 = vpow2.f32 %v1720_v52  ;;  %v1547_v9 = vpop.xlane.xlu0 %1546  ;;  %1843 = vadd.xlane.f32.xlu1 %v1842_v39  ;;  %v1931_v20 = vmul.f32 %v5818_v48, %v7029_v15  ;;  %v1930_v39 = vmul.f32 %v5818_v48, %v7021_v5 }
 0x418   : > { %5839 = vrcp.f32 %v1811_v11  ;;  %v1987_v47 = vpack.c.bf16 %v1937_v58, %v1935_v53  ;;  %v1986_v33 = vpack.c.bf16 %v1936_v56, %v1934_v49  ;;  %v1624_v3 = vsub.f32 %v9575_v45, %v1547_v9  ;;  %v7275_v56 = vpop.f32.mrf.mxu0 }
 0x419   : > { %v7252_v40 = vpop.eup %5819  ;;  %v1625_v28 = vsub.f32 %v9574_v13, %v1547_v9  ;;  %v1796_v25 = vpop.xlane.xlu1 %1795  ;;  %5841 = vrcp.f32 %v1802_v23 }
 0x41a   : > { %v7257_v35 = vpop.eup %5821  ;;  %2028 = vmatprep.subr.bf16.mxu1 %v1987_v47  ;;  %v1722_v14 = vmul.f32 1.442695, %v1624_v3  ;;  %5843 = vrcp.f32 %v1796_v25  ;;  %v7279_v15 = vpop.f32.mrf.mxu0 }
 0x41b   : > { %v7259_v18 = vpop.eup %5823  ;;  %2029 = vmatpush1.bf16.xpose.msra.mxu1 %v1986_v33  ;;  %v1724_v37 = vmul.f32 1.442695, %v1625_v28  ;;  %v1805_v11 = vpop.xlane.xlu0 %1804  ;;  %v1845_v45 = vadd.f32 %v7257_v35, %v7252_v40  ;;  %9599 = vst [vmem:[#allocation38_spill] sm:$0xff] %v7279_v15 }
 0x41c   : > { %v7265_v13 = vpop.eup %5825  ;;  %5845 = vpow2.f32 %v1722_v14  ;;  %v7287_v48 = vpop.f32.mrf.mxu0 }
 0x41d   : > { %v5828_v52 = vpop.eup %5827  ;;  %5847 = vpow2.f32 %v1724_v37  ;;  %1846 = vadd.xlane.f32.xlu0 %v1845_v45  ;;  %v1836_v53 = vadd.f32 %v7265_v13, %v7259_v18  ;;  %9600 = vst [vmem:[#allocation39_spill] sm:$0xff] %v7287_v48  ;;  %v1790_v37 = vpop.xlane.xlu1 %1789 }
 0x41e   : > { %5849 = vrcp.f32 %v1805_v11  ;;  %v1933_v23 = vmul.f32 %v5828_v52, %v7047_v10  ;;  %v1932_v58 = vmul.f32 %v5828_v52, %v7042_v24  ;;  %v5830_v9 = vpop.eup %5829 }
 0x41f   : > { %v1799_v49 = vpop.xlane.xlu0 %1798  ;;  %1837 = vadd.xlane.f32.xlu1 %v1836_v53  ;;  %v1927_v11 = vmul.f32 %v5830_v9, %v7055_v19  ;;  %v1926_v45 = vmul.f32 %v5830_v9, %v7050_v12 }
 0x420   : > { %v1985_v47 = vpack.c.bf16 %v1933_v23, %v1931_v20  ;;  %v1984_v33 = vpack.c.bf16 %v1932_v58, %v1930_v39  ;;  %5851 = vrcp.f32 %v1799_v49  ;;  %v7295_v20 = vpop.f32.mrf.mxu0 }
 0x421   : > { %v7277_v3 = vpop.eup %5831  ;;  %9601 = vst [vmem:[#allocation47_spill] sm:$0xff] %v7295_v20 }
 0x422   : > { %v7281_v28 = vpop.eup %5833  ;;  %2030 = vmatprep.subr.bf16.mxu1 %v1985_v47  ;;  %v7301_v49 = vpop.f32.mrf.mxu0 }
 0x423   : > { %v7283_v10 = vpop.eup %5835  ;;  %2031 = vmatpush1.bf16.xpose.msra.mxu1 %v1984_v33  ;;  %v1793_v5 = vpop.xlane.xlu0 %1792  ;;  %v1839_v24 = vadd.f32 %v7281_v28, %v7277_v3  ;;  %9602 = vst [vmem:[#allocation48_spill] sm:$0xff] %v7301_v49 }
 0x424   : > { %v7289_v25 = vpop.eup %5837  ;;  %5853 = vrcp.f32 %v1793_v5  ;;  %v7305_v33 = vpop.f32.mrf.mxu0 }
 0x425   : > { %v5840_v14 = vpop.eup %5839  ;;  %1840 = vadd.xlane.f32.xlu0 %v1839_v24  ;;  %v1830_v52 = vadd.f32 %v7289_v25, %v7283_v10  ;;  %5855 = vrcp.f32 %v1790_v37  ;;  %9603 = vst [vmem:[#allocation49_spill] sm:$0xff] %v7305_v33 }
 0x426   : > { %v1929_v53 = vmul.f32 %v5840_v14, %v7074_v17  ;;  %v1928_v23 = vmul.f32 %v5840_v14, %v7069_v41  ;;  %v5842_v58 = vpop.eup %5841  ;;  %v7311_v14 = vpop.f32.mrf.mxu0 }
 0x427   : > { %1831 = vadd.xlane.f32.xlu1 %v1830_v52  ;;  %v5844_v19 = vpop.eup %5843  ;;  %v1787_v41 = vpop.xlane.xlu0 %1786  ;;  %9604 = vst [vmem:[#allocation50_spill] sm:$0xff] %v7311_v14  ;;  %v1923_v52 = vmul.f32 %v5842_v58, %v7080_v55 }
 0x428   : > { %v1983_v12 = vpack.c.bf16 %v1929_v53, %v1927_v11  ;;  %v1982_v9 = vpack.c.bf16 %v1928_v23, %v1926_v45  ;;  %v1784_v53 = vpop.xlane.xlu1 %1783  ;;  %v1922_v23 = vmul.f32 %v5842_v58, %v7076_v7  ;;  %5857 = vrcp.f32 %v1787_v41 }
 0x429   : > { %v7303_v47 = vpop.eup %5845  ;;  %v1919_v39 = vmul.f32 %v5844_v19, %v7091_v1  ;;  %5859 = vrcp.f32 %v1784_v53 }
 0x42a   : > { %v7307_v5 = vpop.eup %5847  ;;  %2032 = vmatprep.subr.bf16.mxu1 %v1983_v12  ;;  %v7317_v12 = vpop.f32.mrf.mxu0 }
 0x42b   : > { %v5850_v17 = vpop.eup %5849  ;;  %2033 = vmatpush1.bf16.xpose.msra.mxu1 %v1982_v9  ;;  %v1833_v24 = vadd.f32 %v7307_v5, %v7303_v47  ;;  %9605 = vst [vmem:[#allocation51_spill] sm:$0xff] %v7317_v12 }
 0x42c   : > { %v1925_v37 = vmul.f32 %v5850_v17, %v7098_v21  ;;  %v1924_v11 = vmul.f32 %v5850_v17, %v7093_v2  ;;  %v7323_v21 = vpop.f32.mrf.mxu0 }
 0x42d   : > { %v5852_v45 = vpop.eup %5851  ;;  %1834 = vadd.xlane.f32.xlu0 %v1833_v24  ;;  %9606 = vst [vmem:[#allocation52_spill] sm:$0xff] %v7323_v21 }
 0x42e   : > { %v1981_v9 = vpack.c.bf16 %v1925_v37, %v1923_v52  ;;  %v1921_v50 = vmul.f32 %v5852_v45, %v7111_v61  ;;  %v1980_v38 = vpack.c.bf16 %v1924_v11, %v1922_v23  ;;  %v7325_v17 = vpop.f32.mrf.mxu0  ;;  %v1920_v61 = vmul.f32 %v5852_v45, %v7107_v16  ;;  %v9611_v11 = vld [vmem:[#allocation32_spill] sm:$0xff]  ;;  %v9614_v37 = vld [vmem:[#allocation33_spill] sm:$0xff] }
 0x42f   : > { %9607 = vst [vmem:[#allocation53_spill] sm:$0xff] %v7325_v17  ;;  %v9619_v17 = vld [vmem:[#allocation34_spill] sm:$0xff] }
 0x430   : > { %2034 = vmatprep.subr.bf16.mxu1 %v1981_v9  ;;  %v1979_v2 = vpack.c.bf16 %v1921_v50, %v1919_v39  ;;  %v7327_v58 = vpop.f32.mrf.mxu0  ;;  %v1918_v50 = vmul.f32 %v5844_v19, %v7084_v60 }
 0x431   : > { %v5854_v7 = vpop.eup %5853  ;;  %9608 = vst [vmem:[#allocation54_spill] sm:$0xff] %v7327_v58 }
 0x432   : > { %v5856_v41 = vpop.eup %5855  ;;  %v7330_v24 = vpop.f32.mrf.mxu0  ;;  %v1917_v52 = vmul.f32 %v5854_v7, %v7123_v27  ;;  %v1978_v53 = vpack.c.bf16 %v1920_v61, %v1918_v50  ;;  %v1916_v60 = vmul.f32 %v5854_v7, %v9614_v37 }
 0x433   : > { %2035 = vmatpush1.bf16.xpose.msra.mxu1 %v1980_v38  ;;  %9609 = vst [vmem:[#allocation55_spill] sm:$0xff] %v7330_v24  ;;  %v1915_v38 = vmul.f32 %v5856_v41, %v9611_v11  ;;  %v9616_v11 = vld [vmem:[#allocation46_spill] sm:$0xff] }
 0x434   : > { %2036 = vmatprep.subr.bf16.mxu1 %v1979_v2  ;;  %v7336_v39 = vpop.f32.mrf.mxu0 }
 0x435   : > { %v1874_v1 = vpop.xlane.xlu1 %1873  ;;  %9610 = vst [vmem:[#allocation56_spill] sm:$0xff] %v7336_v39  ;;  %v1977_v9 = vpack.c.bf16 %v1917_v52, %v1915_v38  ;;  %v5858_v16 = vpop.eup %5857  ;;  %v9617_v52 = vld [vmem:[#allocation35_spill] sm:$0xff]  ;;  %v9620_v39 = vld [vmem:[#allocation45_spill] sm:$0xff] }
 0x436   : > { %v7339_v23 = vpop.f32.mrf.mxu0  ;;  %5861 = vrcp.f32 %v1874_v1  ;;  %v5860_v27 = vpop.eup %5859  ;;  %v1913_v61 = vmul.f32 %v5858_v16, %v9616_v11  ;;  %v1914_v50 = vmul.f32 %v5856_v41, %v9617_v52  ;;  %v1912_v58 = vmul.f32 %v5858_v16, %v9620_v39 }
 0x437   : > { %9612 = vst [vmem:[#allocation32_spill] sm:$0xff] %v7339_v23 }
 0x438   : > { %v7341_v55 = vpop.f32.mrf.mxu0 }
 0x439   : > { %v1868_v2 = vpop.xlane.xlu1 %1867  ;;  %9613 = vst [vmem:[#allocation57_spill] sm:$0xff] %v7341_v55 }
 0x43a   : > { %v7344_v19 = vpop.f32.mrf.mxu0 }
 0x43b   : > { %2037 = vmatpush1.bf16.xpose.msra.mxu1 %v1978_v53  ;;  %v1877_v45 = vpop.xlane.xlu0 %1876  ;;  %9615 = vst [vmem:[#allocation33_spill] sm:$0xff] %v7344_v19 }
 0x43c   : > { %2038 = vmatprep.subr.bf16.mxu1 %v1977_v9  ;;  %5863 = vrcp.f32 %v1877_v45  ;;  %v7350_v53 = vpop.f32.mrf.mxu0  ;;  %v1911_v9 = vmul.f32 %v5860_v27, %v9619_v17  ;;  %v1976_v45 = vpack.c.bf16 %v1916_v60, %v1914_v50 }
 0x43d   : > { %5865 = vrcp.f32 %v1868_v2  ;;  %9618 = vst [vmem:[#allocation46_spill] sm:$0xff] %v7350_v53  ;;  %v1862_v11 = vpop.xlane.xlu1 %1861 }
 0x43e   : > { %v7353_v24 = vpop.f32.mrf.mxu0  ;;  %v1975_v7 = vpack.c.bf16 %v1913_v61, %v1911_v9 }
 0x43f   : > { %v1871_v38 = vpop.xlane.xlu0 %1870 }
 0x440   : > { %5867 = vrcp.f32 %v1871_v38  ;;  %v747_v2 = vpop.f32.mrf.mxu0  ;;  %v9621_v38 = vld [vmem:[#allocation31_spill] sm:$0xff] }
 0x441   : > { %v1910_v17 = vmul.f32 %v5860_v27, %v9621_v38  ;;  %v1856_v19 = vpop.xlane.xlu1 %1855  ;;  %v9622_v38 = vld [vmem:[#allocation9_spill] sm:$0xff] }
 0x442   : > { %v7356_v1 = vpop.f32.mrf.mxu0 }
 0x443   : > { %2039 = vmatpush1.bf16.xpose.msra.mxu1 %v1976_v45  ;;  %v1865_v37 = vpop.xlane.xlu0 %1864  ;;  %v5862_v52 = vpop.eup %5861  ;;  %v1974_v9 = vpack.c.bf16 %v1912_v58, %v1910_v17  ;;  %v9623_v17 = vld [vmem:[#allocation7_spill] sm:$0xff] }
 0x444   : > { %2040 = vmatprep.subr.bf16.mxu1 %v1975_v7  ;;  %5869 = vrcp.f32 %v1865_v37  ;;  %v751_v60 = vpop.f32.mrf.mxu0  ;;  %v1971_v45 = vmul.f32 %v5862_v52, %v7153_v4  ;;  %v1970_v27 = vmul.f32 %v5862_v52, %v7151_v43  ;;  %v9626_v52 = vld [vmem:[#allocation10_spill] sm:$0xff] }
 0x445   : > { %5871 = vrcp.f32 %v1862_v11  ;;  %v5572_v50 = vpack.c.bf16 %v751_v60, %v747_v2 }
 0x447   : > { %2058 = vmatprep.mubr.bf16.mxu1 %v5572_v50  ;;  %v1859_v16 = vpop.xlane.xlu0 %1858 }
 0x448   : > { %5873 = vrcp.f32 %v1859_v16 }
 0x449   : > { %v5864_v61 = vpop.eup %5863  ;;  %5875 = vrcp.f32 %v1856_v19 }
 0x44a   : > { %v1973_v7 = vmul.f32 %v5864_v61, %v7165_v30  ;;  %v5866_v39 = vpop.eup %5865  ;;  %v1972_v37 = vmul.f32 %v5864_v61, %v7161_v29  ;;  %v9624_v29 = vpack.c.bf16 %v9622_v38, %v9623_v17  ;;  %v9627_v61 = vld [vmem:[#allocation43_spill] sm:$0xff]  ;;  %v9636_v17 = vld [vmem:[#allocation36_spill] sm:$0xff] }
 0x44b   : > { %2041 = vmatpush1.bf16.xpose.msra.mxu1 %v1974_v9  ;;  %v1967_v2 = vmul.f32 %v5866_v39, %v7159_v31  ;;  %v9625_v31 = vld [vmem:[#allocation8_spill] sm:$0xff]  ;;  %v9628_v9 = vld [vmem:[#allocation13_spill] sm:$0xff] }
 0x44c   : > { %v2005_v23 = vpack.c.bf16 %v1973_v7, %v1971_v45  ;;  %v2004_v4 = vpack.c.bf16 %v1972_v37, %v1970_v27  ;;  %v9629_v45 = vld [vmem:[#allocation11_spill] sm:$0xff] }
 0x44d   : > { %v5868_v41 = vpop.eup %5867  ;;  %v9630_v7 = vpack.c.bf16 %v9628_v9, %v9629_v45 }
 0x44e   : > { %2042 = vmatprep.subr.bf16.mxu1 %v2005_v23  ;;  %v1969_v58 = vmul.f32 %v5868_v41, %v7177_v22  ;;  %v1968_v50 = vmul.f32 %v5868_v41, %v7173_v42  ;;  %v1966_v23 = vmul.f32 %v5866_v39, %v7157_v34  ;;  %v5576_v22 = vpack.c.bf16 %v9626_v52, %v9625_v31  ;;  %v9632_v42 = vld [vmem:[#allocation14_spill] sm:$0xff]  ;;  %v9633_v34 = vld [vmem:[#allocation37_spill] sm:$0xff]  ;;  %v9638_v52 = vld [vmem:[#allocation44_spill] sm:$0xff] }
 0x450   : > { %v2003_v30 = vpack.c.bf16 %v1969_v58, %v1967_v2  ;;  %v2002_v16 = vpack.c.bf16 %v1968_v50, %v1966_v23  ;;  %v9631_v2 = vld [vmem:[#allocation12_spill] sm:$0xff]  ;;  %v9634_v58 = vld [vmem:[#allocation41_spill] sm:$0xff] }
 0x451   : > { %v5870_v11 = vpop.eup %5869  ;;  %v5578_v41 = vpack.c.bf16 %v9632_v42, %v9631_v2 }
 0x452   : > { %v5872_v60 = vpop.eup %5871  ;;  %v1965_v43 = vmul.f32 %v5870_v11, %v7189_v62  ;;  %v1964_v39 = vmul.f32 %v5870_v11, %v9633_v34 }
 0x453   : > { %2043 = vmatpush2.bf16.xpose.msra.mxu1 %v2004_v4  ;;  %v1963_v19 = vmul.f32 %v5872_v60, %v9627_v61 }
 0x454   : > { %2044 = vmatprep.subr.bf16.mxu1 %v2003_v30  ;;  %2150 = vxpose.xlu1.c.b16.start [1/2] (short) %v9624_v29, 128  ;;  %v9635_v30 = vld [vmem:[#allocation42_spill] sm:$0xff] }
 0x455   : > { %v2001_v37 = vpack.c.bf16 %v1965_v43, %v1963_v19  ;;  %v5874_v27 = vpop.eup %5873  ;;  %v1962_v38 = vmul.f32 %v5872_v60, %v9635_v30  ;;  %v9637_v43 = vld [vmem:[#allocation40_spill] sm:$0xff] }
 0x456   : > { %v5876_v62 = vpop.eup %5875  ;;  %v1961_v4 = vmul.f32 %v5874_v27, %v9634_v58  ;;  %v1960_v23 = vmul.f32 %v5874_v27, %v9637_v43 }
 0x457   : > { %v1959_v29 = vmul.f32 %v5876_v62, %v9636_v17  ;;  %v2000_v31 = vpack.c.bf16 %v1964_v39, %v1962_v38 }
 0x458   : > { %2151 = vxpose.xlu1.c.b16.end [2/2] (short) %v9630_v7, 128 }
 0x459   : > { %v1999_v50 = vpack.c.bf16 %v1961_v4, %v1959_v29 }
 0x45a   : > { %2166 = vxpose.xlu0.c.b16.start [1/2] (short) %v5576_v22, 128  ;;  %v1958_v22 = vmul.f32 %v5876_v62, %v9638_v52  ;;  %v755_v52 = vpop.f32.mrf.mxu0 }
 0x45b   : > { %2045 = vmatpush2.bf16.xpose.msra.mxu1 %v2002_v16 }
 0x45c   : > { %2046 = vmatprep.subr.bf16.mxu1 %v2001_v37  ;;  %v1998_v61 = vpack.c.bf16 %v1960_v23, %v1958_v22  ;;  %v757_v22 = vpop.f32.mrf.mxu0 }
 0x45e   : > { %2167 = vxpose.xlu0.c.b16.end [2/2] (short) %v5578_v41, 128 }
 0x463   : > { %2047 = vmatpush2.bf16.xpose.msra.mxu1 %v2000_v31 }
 0x464   : > { %2048 = vmatprep.subr.bf16.mxu1 %v1999_v50 }
 0x46b   : > { %2049 = vmatpush2.bf16.xpose.msra.mxu1 %v1998_v61 }
 0x498   : > { %v1850_v19 = vpop.xlane.xlu1 %1849 }
 0x499   : > { %5877 = vrcp.f32 %v1850_v19 }
 0x49e   : > { %v1853_v11 = vpop.xlane.xlu0 %1852 }
 0x49f   : > { %5879 = vrcp.f32 %v1853_v11 }
 0x4a0   : > { %v1844_v9 = vpop.xlane.xlu1 %1843 }
 0x4a1   : > { %5881 = vrcp.f32 %v1844_v9 }
 0x4a6   : > { %v1847_v45 = vpop.xlane.xlu0 %1846  ;;  %v5878_v60 = vpop.eup %5877 }
 0x4a7   : > { %5883 = vrcp.f32 %v1847_v45  ;;  %v1955_v37 = vmul.f32 %v5878_v60, %v7223_v26  ;;  %v1954_v2 = vmul.f32 %v5878_v60, %v7218_v46  ;;  %v759_v45 = vpop.f32.mrf.mxu0 }
 0x4a8   : > { %v1838_v7 = vpop.xlane.xlu1 %1837 }
 0x4a9   : > { %5885 = vrcp.f32 %v1838_v7  ;;  %v761_v60 = vpop.f32.mrf.mxu0 }
 0x4aa   : > { %v5574_v7 = vpack.c.bf16 %v761_v60, %v757_v22 }
 0x4ac   : > { %v5880_v16 = vpop.eup %5879 }
 0x4ad   : > { %v1957_v27 = vmul.f32 %v5880_v16, %v7233_v32  ;;  %v1956_v42 = vmul.f32 %v5880_v16, %v7229_v63 }
 0x4ae   : > { %v1841_v41 = vpop.xlane.xlu0 %1840  ;;  %v5882_v39 = vpop.eup %5881 }
 0x4af   : > { %5887 = vrcp.f32 %v1841_v41  ;;  %v1997_v62 = vpack.c.bf16 %v1957_v27, %v1955_v37  ;;  %v1996_v34 = vpack.c.bf16 %v1956_v42, %v1954_v2  ;;  %v1951_v30 = vmul.f32 %v5882_v39, %v7241_v44 }
 0x4b0   : > { %v1832_v58 = vpop.xlane.xlu1 %1831  ;;  %v1950_v32 = vmul.f32 %v5882_v39, %v7237_v36 }
 0x4b1   : > { %2050 = vmatprep.subr.bf16.mxu1 %v1997_v62  ;;  %5889 = vrcp.f32 %v1832_v58 }
 0x4b2   : > { %2051 = vmatpush2.bf16.xpose.msra.mxu1 %v1996_v34 }
 0x4b4   : > { %v5884_v4 = vpop.eup %5883 }
 0x4b5   : > { %v1953_v26 = vmul.f32 %v5884_v4, %v7257_v35  ;;  %v1952_v46 = vmul.f32 %v5884_v4, %v7252_v40 }
 0x4b6   : > { %v1835_v38 = vpop.xlane.xlu0 %1834  ;;  %v5886_v29 = vpop.eup %5885 }
 0x4b7   : > { %5891 = vrcp.f32 %v1835_v38  ;;  %v1995_v63 = vpack.c.bf16 %v1953_v26, %v1951_v30  ;;  %v1994_v17 = vpack.c.bf16 %v1952_v46, %v1950_v32  ;;  %v1947_v50 = vmul.f32 %v5886_v29, %v7265_v13  ;;  %v2158_v16 = vpop.trf.xlu1 }
 0x4b8   : > { %v1946_v44 = vmul.f32 %v5886_v29, %v7259_v18 }
 0x4b9   : > { %2052 = vmatprep.subr.bf16.mxu1 %v1995_v63 }
 0x4ba   : > { %2053 = vmatpush2.bf16.xpose.msra.mxu1 %v1994_v17 }
 0x4bc   : > { %v5888_v31 = vpop.eup %5887 }
 0x4bd   : > { %v1949_v43 = vmul.f32 %v5888_v31, %v7281_v28  ;;  %v1948_v35 = vmul.f32 %v5888_v31, %v7277_v3  ;;  %v5582_v3 = vpack.c.bf16 %v7275_v56, %v7255_v59  ;;  %v9641_v59 = vpack.c.bf16 %v7209_v8, %v7203_v0 }
 0x4be   : > { %v5890_v40 = vpop.eup %5889  ;;  %v5573_v56 = vpack.c.bf16 %v759_v45, %v755_v52 }
 0x4bf   : > { %v1993_v23 = vpack.c.bf16 %v1949_v43, %v1947_v50  ;;  %v1992_v36 = vpack.c.bf16 %v1948_v35, %v1946_v44  ;;  %v1943_v19 = vmul.f32 %v5890_v40, %v7289_v25  ;;  %v1942_v13 = vmul.f32 %v5890_v40, %v7283_v10 }
 0x4c0   : > { %v5580_v25 = vpack.c.bf16 %v7231_v6, %v7207_v54  ;;  %v9640_v10 = vpack.c.bf16 %v7263_v57, %v7246_v51  ;;  %v2159_v54 = vpop.trf.xlu1 }
 0x4c1   : > { %2054 = vmatprep.subr.bf16.mxu1 %v1993_v23 }
 0x4c2   : > { %2055 = vmatpush2.bf16.xpose.msra.mxu1 %v1992_v36 }
 0x4c4   : > { %v5892_v61 = vpop.eup %5891  ;;  %v2160_v6 = vpop.trf.xlu1 }
 0x4c5   : > { %v1945_v11 = vmul.f32 %v5892_v61, %v7307_v5  ;;  %v1944_v28 = vmul.f32 %v5892_v61, %v7303_v47  ;;  %v9639_v5 = vpack.c.bf16 %v7356_v1, %v7353_v24  ;;  %v9642_v47 = vmov 0   ;;  %v2174_v1 = vpop.trf.xlu0 }
 0x4c7   : > { %v1991_v9 = vpack.c.bf16 %v1945_v11, %v1943_v19  ;;  %v1990_v18 = vpack.c.bf16 %v1944_v28, %v1942_v13 }
 0x4c8   : > { %v2161_v0 = vpop.trf.xlu1 }
 0x4c9   : > { %2056 = vmatprep.subr.bf16.mxu1 %v1991_v9  ;;  %v2175_v37 = vpop.trf.xlu0 }
 0x4ca   : > { %2057 = vmatpush2.bf16.xpose.msra.mxu1 %v1990_v18 }
 0x4cb   : > { %2262 = vmatprep.subr.bf16.mxu1 %v5582_v3 }
 0x4cc   : > { %v2162_v8 = vpop.trf.xlu1 }
 0x4cd   : > { %v2176_v27 = vpop.trf.xlu0 }
 0x4d0   : > { %v2163_v51 = vpop.trf.xlu1 }
 0x4d1   : > { %2059 = vmatmul.mubr.bf16.vlgmr.msra.gmra.mxu1 %v9639_v5  ;;  %v2177_v2 = vpop.trf.xlu0 }
 0x4d2   : > { %2068 = vmatprep.mubr.bf16.mxu1 %v5574_v7  ;;  %2263 = vmatpush1.bf16.msra.mxu1 %v9640_v10 }
 0x4d3   : > { %2264 = vmatprep.subr.bf16.mxu1 %v5580_v25 }
 0x4d4   : > { %v2164_v57 = vpop.trf.xlu1 }
 0x4d5   : > { %v2178_v42 = vpop.trf.xlu0 }
 0x4d6   : > { %2265 = vmatpush1.bf16.msra.mxu1 %v9641_v59 }
 0x4d8   : > { %v2165_v24 = vpop.trf.xlu1 }
 0x4d9   : > { %2069 = vmatmul.mubr.bf16.gmra.mxu1 %v5573_v56  ;;  %v2179_v41 = vpop.trf.xlu0 }
 0x4da   : > { %2282 = vmatprep.mubr.bf16.mxu1 %v9642_v47 }
 0x4dd   : > { %v2180_v62 = vpop.trf.xlu0 }
 0x4e1   : > { %5386 = vmatmul.mubr.msk.bf16.vlgmr.msra.gmra.mxu1 %vm478_vm0, %v2158_v16  ;;  %v2181_v34 = vpop.trf.xlu0 }
 0x4e2   : > { %2292 = vmatprep.mubr.bf16.mxu1 %v9642_v47 }
 0x4e9   : > { %5387 = vmatmul.mubr.msk.bf16.gmra.mxu1 %vm478_vm0, %v2159_v54 }
 0x4ea   : > { %2302 = vmatprep.mubr.bf16.mxu1 %v9642_v47 }
 0x4f1   : > { %5388 = vmatmul.mubr.msk.bf16.gmra.mxu1 %vm478_vm0, %v2160_v6 }
 0x4f2   : > { %2312 = vmatprep.mubr.bf16.mxu1 %v9642_v47 }
 0x4f9   : > { %5389 = vmatmul.mubr.msk.bf16.gmra.mxu1 %vm478_vm0, %v2161_v0 }
 0x4fa   : > { %2322 = vmatprep.mubr.bf16.mxu1 %v9642_v47 }
 0x501   : > { %5390 = vmatmul.mubr.msk.bf16.gmra.mxu1 %vm478_vm0, %v2162_v8 }
 0x502   : > { %2332 = vmatprep.mubr.bf16.mxu1 %v9642_v47 }
 0x509   : > { %5391 = vmatmul.mubr.msk.bf16.gmra.mxu1 %vm478_vm0, %v2163_v51 }
 0x50a   : > { %2342 = vmatprep.mubr.bf16.mxu1 %v9642_v47 }
 0x511   : > { %5392 = vmatmul.mubr.msk.bf16.gmra.mxu1 %vm478_vm0, %v2164_v57 }
 0x512   : > { %2352 = vmatprep.mubr.bf16.mxu1 %v9642_v47 }
 0x519   : > { %5393 = vmatmul.mubr.msk.bf16.gmra.mxu1 %vm478_vm0, %v2165_v24 }
 0x51a   : > { %2362 = vmatprep.mubr.bf16.mxu1 %v9642_v47 }
 0x521   : > { %5394 = vmatmul.mubr.msk.bf16.gmra.mxu1 %vm478_vm0, %v2174_v1 }
 0x522   : > { %2372 = vmatprep.mubr.bf16.mxu1 %v9642_v47 }
 0x529   : > { %5395 = vmatmul.mubr.msk.bf16.gmra.mxu1 %vm478_vm0, %v2175_v37 }
 0x52a   : > { %2382 = vmatprep.mubr.bf16.mxu1 %v9642_v47 }
 0x531   : > { %5396 = vmatmul.mubr.msk.bf16.gmra.mxu1 %vm478_vm0, %v2176_v27 }
 0x532   : > { %2392 = vmatprep.mubr.bf16.mxu1 %v9642_v47 }
 0x539   : > { %5397 = vmatmul.mubr.msk.bf16.gmra.mxu1 %vm478_vm0, %v2177_v2 }
 0x53a   : > { %2402 = vmatprep.mubr.bf16.mxu1 %v9642_v47 }
 0x541   : > { %5398 = vmatmul.mubr.msk.bf16.gmra.mxu1 %vm478_vm0, %v2178_v42 }
 0x542   : > { %2412 = vmatprep.mubr.bf16.mxu1 %v9642_v47 }
 0x549   : > { %5399 = vmatmul.mubr.msk.bf16.gmra.mxu1 %vm478_vm0, %v2179_v41 }
 0x54a   : > { %2422 = vmatprep.mubr.bf16.mxu1 %v9642_v47 }
 0x551   : > { %5400 = vmatmul.mubr.msk.bf16.gmra.mxu1 %vm478_vm0, %v2180_v62 }
 0x552   : > { %2432 = vmatprep.mubr.bf16.mxu1 %v9642_v47 }
 0x559   : > { %5401 = vmatmul.mubr.msk.bf16.gmra.mxu1 %vm478_vm0, %v2181_v34 }
 0x591   : > { %v7448_v39 = vpop.f32.mrf.mxu1 }
 0x592   : > { %9643 = vst [vmem:[#allocation35_spill] sm:$0xff] %v7448_v39 }
 0x593   : > { %v7450_v58 = vpop.f32.mrf.mxu1 }
 0x594   : > { %9644 = vst [vmem:[#allocation34_spill] sm:$0xff] %v7450_v58 }
 0x595   : > { %v7452_v4 = vpop.f32.mrf.mxu1 }
 0x596   : > { %9645 = vst [vmem:[#allocation45_spill] sm:$0xff] %v7452_v4 }
 0x597   : > { %v7456_v26 = vpop.f32.mrf.mxu1 }
 0x598   : > { %9646 = vst [vmem:[#allocation31_spill] sm:$0xff] %v7456_v26 }
 0x599   : > { %v7458_v32 = vpop.f32.mrf.mxu1 }
 0x59a   : > { %9647 = vst [vmem:[#allocation9_spill] sm:$0xff] %v7458_v32 }
 0x59b   : > { %v7460_v46 = vpop.f32.mrf.mxu1 }
 0x59c   : > { %9648 = vst [vmem:[#allocation7_spill] sm:$0xff] %v7460_v46 }
 0x59d   : > { %v7462_v38 = vpop.f32.mrf.mxu1 }
 0x59e   : > { %9649 = vst [vmem:[#allocation8_spill] sm:$0xff] %v7462_v38 }
 0x59f   : > { %v7466_v17 = vpop.f32.mrf.mxu1 }
 0x5a0   : > { %9650 = vst [vmem:[#allocation10_spill] sm:$0xff] %v7466_v17 }
 0x5a1   : > { %v7468_v29 = vpop.f32.mrf.mxu1 }
 0x5a3   : > { %v7470_v31 = vpop.f32.mrf.mxu1 }
 0x5a4   : > { %v2443_v38 = vmax.f32 %v7468_v29, %v7470_v31 }
 0x5a5   : > { %v7472_v50 = vpop.f32.mrf.mxu1 }
 0x5a7   : > { %v7474_v43 = vpop.f32.mrf.mxu1 }
 0x5a8   : > { %9651 = vst [vmem:[#allocation43_spill] sm:$0xff] %v7474_v43  ;;  %v2446_v58 = vmax.f32 %v7472_v50, %v7474_v43 }
 0x5a9   : > { %v7476_v44 = vpop.f32.mrf.mxu1 }
 0x5ab   : > { %v7478_v35 = vpop.f32.mrf.mxu1 }
 0x5ac   : > { %v2449_v4 = vmax.f32 %v7476_v44, %v7478_v35 }
 0x5ad   : > { %v7480_v23 = vpop.f32.mrf.mxu1 }
 0x5af   : > { %v7482_v36 = vpop.f32.mrf.mxu1 }
 0x5b1   : > { %v7484_v52 = vpop.f32.mrf.mxu1 }
 0x5b3   : > { %v7486_v40 = vpop.f32.mrf.mxu1 }
 0x5b4   : > { %v2455_v63 = vmax.f32 %v7484_v52, %v7486_v40 }
 0x5b5   : > { %v7488_v22 = vpop.f32.mrf.mxu1 }
 0x5b7   : > { %v7490_v61 = vpop.f32.mrf.mxu1 }
 0x5b9   : > { %v7492_v19 = vpop.f32.mrf.mxu1 }
 0x5bb   : > { %v7494_v11 = vpop.f32.mrf.mxu1 }
 0x5bd   : > { %v7496_v13 = vpop.f32.mrf.mxu1 }
 0x5bf   : > { %v7498_v28 = vpop.f32.mrf.mxu1 }
 0x5c1   : > { %v7500_v9 = vpop.f32.mrf.mxu1 }
 0x5c3   : > { %v7502_v18 = vpop.f32.mrf.mxu1 }
 0x5c4   : > { %v2467_v62 = vmax.f32 %v7500_v9, %v7502_v18 }
 0x5c5   : > { %v7504_v45 = vpop.f32.mrf.mxu1 }
 0x5c7   : > { %v7506_v3 = vpop.f32.mrf.mxu1 }
 0x5c9   : > { %v7508_v60 = vpop.f32.mrf.mxu1 }
 0x5cb   : > { %v7510_v7 = vpop.f32.mrf.mxu1 }
 0x5cc   : > { %v2473_v27 = vmax.f32 %v7508_v60, %v7510_v7 }
 0x5cd   : > { %v7512_v25 = vpop.f32.mrf.mxu1 }
 0x5cf   : > { %v7514_v5 = vpop.f32.mrf.mxu1 }
 0x5d0   : > { %v2476_v34 = vmax.f32 %v7512_v25, %v7514_v5 }
 0x5d1   : > { %v7516_v10 = vpop.f32.mrf.mxu1 }
 0x5d3   : > { %v7518_v59 = vpop.f32.mrf.mxu1 }
 0x5d4   : > { %v2479_v57 = vmax.f32 %v7516_v10, %v7518_v59 }
 0x5d5   : > { %v7520_v56 = vpop.f32.mrf.mxu1 }
 0x5d7   : > { %v7522_v16 = vpop.f32.mrf.mxu1 }
 0x5d8   : > { %v2482_v2 = vmax.f32 %v7520_v56, %v7522_v16 }
 0x5d9   : > { %v7524_v54 = vpop.f32.mrf.mxu1 }
 0x5db   : > { %v7526_v6 = vpop.f32.mrf.mxu1 }
 0x5dc   : > { %v2485_v0 = vmax.f32 %v7524_v54, %v7526_v6 }
 0x5dd   : > { %v7530_v8 = vpop.f32.mrf.mxu1 }
 0x5de   : > { %2486 = vmax.xlane.f32.xlu1 %v2485_v0 }
 0x5df   : > { %v7532_v51 = vpop.f32.mrf.mxu1 }
 0x5e0   : > { %v2488_v24 = vmax.f32 %v7530_v8, %v7532_v51 }
 0x5e1   : > { %v7538_v1 = vpop.f32.mrf.mxu1 }
 0x5e2   : > { %9652 = vst [vmem:[#allocation13_spill] sm:$0xff] %v7538_v1  ;;  %2480 = vmax.xlane.f32.xlu1 %v2479_v57  ;;  %2489 = vmax.xlane.f32.xlu0 %v2488_v24  ;;  %v2461_v24 = vmax.f32 %v7492_v19, %v7494_v11 }
 0x5e3   : > { %v7540_v37 = vpop.f32.mrf.mxu1 }
 0x5e4   : > { %9653 = vst [vmem:[#allocation11_spill] sm:$0xff] %v7540_v37 }
 0x5e5   : > { %v7546_v42 = vpop.f32.mrf.mxu1 }
 0x5e6   : > { %9654 = vst [vmem:[#allocation12_spill] sm:$0xff] %v7546_v42  ;;  %2474 = vmax.xlane.f32.xlu1 %v2473_v27  ;;  %2483 = vmax.xlane.f32.xlu0 %v2482_v2  ;;  %v2470_v27 = vmax.f32 %v7504_v45, %v7506_v3 }
 0x5e7   : > { %v7548_v41 = vpop.f32.mrf.mxu1 }
 0x5e8   : > { %9655 = vst [vmem:[#allocation14_spill] sm:$0xff] %v7548_v41 }
 0x5e9   : > { %v7554_v0 = vpop.f32.mrf.mxu1 }
 0x5ea   : > { %2468 = vmax.xlane.f32.xlu1 %v2467_v62  ;;  %2477 = vmax.xlane.f32.xlu0 %v2476_v34  ;;  %v2464_v62 = vmax.f32 %v7496_v13, %v7498_v28 }
 0x5eb   : > { %v7556_v57 = vpop.f32.mrf.mxu1 }
 0x5ed   : > { %v7562_v2 = vpop.f32.mrf.mxu1 }
 0x5ee   : > { %2462 = vmax.xlane.f32.xlu1 %v2461_v24  ;;  %2471 = vmax.xlane.f32.xlu0 %v2470_v27  ;;  %v2458_v24 = vmax.f32 %v7488_v22, %v7490_v61 }
 0x5ef   : > { %v7564_v30 = vpop.f32.mrf.mxu1 }
 0x5f1   : > { %v7570_v34 = vpop.f32.mrf.mxu1 }
 0x5f2   : > { %2456 = vmax.xlane.f32.xlu1 %v2455_v63  ;;  %2465 = vmax.xlane.f32.xlu0 %v2464_v62  ;;  %v2452_v63 = vmax.f32 %v7480_v23, %v7482_v36 }
 0x5f3   : > { %v7572_v39 = vpop.f32.mrf.mxu1 }
 0x5f5   : > { %v7578_v27 = vpop.f32.mrf.mxu1 }
 0x5f6   : > { %2450 = vmax.xlane.f32.xlu1 %v2449_v4  ;;  %2459 = vmax.xlane.f32.xlu0 %v2458_v24 }
 0x5f7   : > { %v7580_v32 = vpop.f32.mrf.mxu1 }
 0x5f9   : > { %v7586_v62 = vpop.f32.mrf.mxu1 }
 0x5fa   : > { %2444 = vmax.xlane.f32.xlu1 %v2443_v38  ;;  %2453 = vmax.xlane.f32.xlu0 %v2452_v63 }
 0x5fb   : > { %v7588_v26 = vpop.f32.mrf.mxu1 }
 0x5fd   : > { %v7592_v17 = vpop.f32.mrf.mxu1 }
 0x5fe   : > { %2447 = vmax.xlane.f32.xlu0 %v2446_v58 }
 0x5ff   : > { %v7594_v4 = vpop.f32.mrf.mxu1 }
 0x601   : > { %v7596_v24 = vpop.f32.mrf.mxu1 }
 0x603   : > { %v7598_v46 = vpop.f32.mrf.mxu1 }
 0x604   : > { %9656 = vst [vmem:[#allocation37_spill] sm:$0xff] %v7598_v46 }
 0x605   : > { %v7600_v53 = vpop.f32.mrf.mxu1 }
 0x606   : > { %9657 = vst [vmem:[#allocation41_spill] sm:$0xff] %v7600_v53 }
 0x607   : > { %v7602_v55 = vpop.f32.mrf.mxu1 }
 0x608   : > { %9658 = vst [vmem:[#allocation42_spill] sm:$0xff] %v7602_v55 }
 0x609   : > { %v7604_v38 = vpop.f32.mrf.mxu1 }
 0x60a   : > { %9659 = vst [vmem:[#allocation36_spill] sm:$0xff] %v7604_v38 }
 0x60b   : > { %v7606_v63 = vpop.f32.mrf.mxu1 }
 0x60c   : > { %9660 = vst [vmem:[#allocation40_spill] sm:$0xff] %v7606_v63  ;;  %v2521_v47 = vmax.f32 %v7604_v38, %v7606_v63 }
 0x60d   : > { %v7608_v15 = vpop.f32.mrf.mxu1 }
 0x60f   : > { %v7610_v20 = vpop.f32.mrf.mxu1 }
 0x610   : > { %9661 = vst [vmem:[#allocation44_spill] sm:$0xff] %v7610_v20 }
 0x611   : > { %v7612_v33 = vpop.f32.mrf.mxu1 }
 0x613   : > { %v7614_v58 = vpop.f32.mrf.mxu1 }
 0x614   : > { %9662 = vst [vmem:[#allocation58_spill] sm:$0xff] %v7614_v58  ;;  %v2527_v41 = vmax.f32 %v7612_v33, %v7614_v58  ;;  %v2524_v58 = vmax.f32 %v7608_v15, %v7610_v20 }
 0x615   : > { %v7616_v12 = vpop.f32.mrf.mxu1 }
 0x616   : > { %9663 = vst [vmem:[#allocation59_spill] sm:$0xff] %v7616_v12 }
 0x617   : > { %v7618_v49 = vpop.f32.mrf.mxu1 }
 0x618   : > { %9664 = vst [vmem:[#allocation60_spill] sm:$0xff] %v7618_v49  ;;  %v2530_v43 = vmax.f32 %v7616_v12, %v7618_v49 }
 0x619   : > { %v7620_v48 = vpop.f32.mrf.mxu1 }
 0x61b   : > { %v7622_v21 = vpop.f32.mrf.mxu1 }
 0x61c   : > { %9665 = vst [vmem:[#allocation61_spill] sm:$0xff] %v7622_v21  ;;  %v2533_v14 = vmax.f32 %v7620_v48, %v7622_v21  ;;  %v2515_v21 = vmax.f32 %v7596_v24, %v7598_v46 }
 0x61d   : > { %v7626_v42 = vpop.f32.mrf.mxu1 }
 0x61e   : > { %2534 = vmax.xlane.f32.xlu1 %v2533_v14  ;;  %v2518_v14 = vmax.f32 %v7600_v53, %v7602_v55 }
 0x61f   : > { %v7630_v1 = vpop.f32.mrf.mxu1 }
 0x620   : > { %v2536_v37 = vmax.f32 %v7626_v42, %v7630_v1 }
 0x622   : > { %2528 = vmax.xlane.f32.xlu1 %v2527_v41  ;;  %2537 = vmax.xlane.f32.xlu0 %v2536_v37 }
 0x626   : > { %2522 = vmax.xlane.f32.xlu1 %v2521_v47  ;;  %2531 = vmax.xlane.f32.xlu0 %v2530_v43 }
 0x62a   : > { %2516 = vmax.xlane.f32.xlu1 %v2515_v21  ;;  %2525 = vmax.xlane.f32.xlu0 %v2524_v58 }
 0x62e   : > { %2519 = vmax.xlane.f32.xlu0 %v2518_v14 }
 0x667   : > { %v2487_v63 = vpop.xlane.xlu1 %2486 }
 0x668   : > { %v2567_v38 = vsub.f32 %v7524_v54, %v2487_v63  ;;  %v2568_v41 = vsub.f32 %v7526_v6, %v2487_v63 }
 0x66a   : > { %v2659_v37 = vmul.f32 1.442695, %v2567_v38  ;;  %v2661_v49 = vmul.f32 1.442695, %v2568_v41 }
 0x66b   : > { %v2481_v12 = vpop.xlane.xlu1 %2480  ;;  %v2490_v46 = vpop.xlane.xlu0 %2489 }
 0x66c   : > { %5893 = vpow2.f32 %v2659_v37  ;;  %v2563_v20 = vsub.f32 %v7516_v10, %v2481_v12  ;;  %v2564_v47 = vsub.f32 %v7518_v59, %v2481_v12  ;;  %v2569_v43 = vsub.f32 %v7530_v8, %v2490_v46 }
 0x66d   : > { %5895 = vpow2.f32 %v2661_v49  ;;  %v2570_v21 = vsub.f32 %v7532_v51, %v2490_v46 }
 0x66e   : > { %v2651_v58 = vmul.f32 1.442695, %v2563_v20  ;;  %v2653_v14 = vmul.f32 1.442695, %v2564_v47  ;;  %v2663_v55 = vmul.f32 1.442695, %v2569_v43 }
 0x66f   : > { %v2665_v54 = vmul.f32 1.442695, %v2570_v21  ;;  %v2475_v53 = vpop.xlane.xlu1 %2474  ;;  %v2484_v6 = vpop.xlane.xlu0 %2483 }
 0x670   : > { %5897 = vpow2.f32 %v2651_v58  ;;  %v2565_v38 = vsub.f32 %v7520_v56, %v2484_v6  ;;  %v2566_v63 = vsub.f32 %v7522_v16, %v2484_v6  ;;  %v2559_v12 = vsub.f32 %v7508_v60, %v2475_v53 }
 0x671   : > { %5899 = vpow2.f32 %v2653_v14  ;;  %v2560_v49 = vsub.f32 %v7510_v7, %v2475_v53 }
 0x672   : > { %5901 = vpow2.f32 %v2663_v55  ;;  %v2655_v20 = vmul.f32 1.442695, %v2565_v38  ;;  %v2657_v59 = vmul.f32 1.442695, %v2566_v63  ;;  %v2643_v8 = vmul.f32 1.442695, %v2559_v12 }
 0x673   : > { %5903 = vpow2.f32 %v2665_v54  ;;  %v2469_v10 = vpop.xlane.xlu1 %2468  ;;  %v2478_v46 = vpop.xlane.xlu0 %2477  ;;  %v2645_v51 = vmul.f32 1.442695, %v2560_v49  ;;  %v2509_v54 = vmax.f32 %v7586_v62, %v7588_v26 }
 0x674   : > { %5905 = vpow2.f32 %v2655_v20  ;;  %v2561_v41 = vsub.f32 %v7512_v25, %v2478_v46  ;;  %v2562_v56 = vsub.f32 %v7514_v5, %v2478_v46  ;;  %v2555_v53 = vsub.f32 %v7500_v9, %v2469_v10 }
 0x675   : > { %5907 = vpow2.f32 %v2657_v59  ;;  %v2556_v7 = vsub.f32 %v7502_v18, %v2469_v10 }
 0x676   : > { %5909 = vpow2.f32 %v2643_v8  ;;  %v2647_v43 = vmul.f32 1.442695, %v2561_v41  ;;  %v2649_v21 = vmul.f32 1.442695, %v2562_v56  ;;  %v2635_v5 = vmul.f32 1.442695, %v2555_v53 }
 0x677   : > { %v2463_v55 = vpop.xlane.xlu1 %2462  ;;  %v2472_v16 = vpop.xlane.xlu0 %2471  ;;  %5911 = vpow2.f32 %v2645_v51  ;;  %v2637_v9 = vmul.f32 1.442695, %v2556_v7 }
 0x678   : > { %5913 = vpow2.f32 %v2647_v43  ;;  %v2557_v63 = vsub.f32 %v7504_v45, %v2472_v16  ;;  %v2558_v12 = vsub.f32 %v7506_v3, %v2472_v16  ;;  %v2551_v10 = vsub.f32 %v7492_v19, %v2463_v55 }
 0x679   : > { %v7655_v37 = vpop.eup %5893  ;;  %5915 = vpow2.f32 %v2649_v21  ;;  %v2552_v46 = vsub.f32 %v7494_v11, %v2463_v55  ;;  %v2512_v45 = vmax.f32 %v7592_v17, %v7594_v4  ;;  %v2503_v55 = vmax.f32 %v7570_v34, %v7572_v39 }
 0x67a   : > { %v7658_v60 = vpop.eup %5895  ;;  %5917 = vpow2.f32 %v2635_v5  ;;  %v2639_v59 = vmul.f32 1.442695, %v2557_v63  ;;  %v2641_v3 = vmul.f32 1.442695, %v2558_v12  ;;  %v2627_v19 = vmul.f32 1.442695, %v2551_v10 }
 0x67b   : > { %v2773_v47 = vadd.f32 %v7658_v60, %v7655_v37  ;;  %v2457_v6 = vpop.xlane.xlu1 %2456  ;;  %v2466_v38 = vpop.xlane.xlu0 %2465  ;;  %5919 = vpow2.f32 %v2637_v9  ;;  %v2629_v53 = vmul.f32 1.442695, %v2552_v46 }
 0x67c   : > { %v2547_v16 = vsub.f32 %v7484_v52, %v2457_v6  ;;  %v2548_v7 = vsub.f32 %v7486_v40, %v2457_v6  ;;  %5921 = vpow2.f32 %v2639_v59  ;;  %v2553_v43 = vsub.f32 %v7496_v13, %v2466_v38 }
 0x67d   : > { %v7664_v25 = vpop.eup %5897  ;;  %2774 = vadd.xlane.f32.xlu1 %v2773_v47  ;;  %5923 = vpow2.f32 %v2641_v3  ;;  %v2554_v21 = vsub.f32 %v7498_v28, %v2466_v38 }
 0x67e   : > { %v7666_v58 = vpop.eup %5899  ;;  %5925 = vpow2.f32 %v2627_v19  ;;  %v2619_v5 = vmul.f32 1.442695, %v2547_v16  ;;  %v2621_v9 = vmul.f32 1.442695, %v2548_v7  ;;  %v2631_v12 = vmul.f32 1.442695, %v2553_v43 }
 0x67f   : > { %v7668_v14 = vpop.eup %5901  ;;  %v2767_v20 = vadd.f32 %v7666_v58, %v7664_v25  ;;  %v2451_v51 = vpop.xlane.xlu1 %2450  ;;  %5927 = vpow2.f32 %v2629_v53  ;;  %v2633_v10 = vmul.f32 1.442695, %v2554_v21 }
 0x680   : > { %v7672_v18 = vpop.eup %5903  ;;  %v2460_v41 = vpop.xlane.xlu0 %2459  ;;  %v2544_v40 = vsub.f32 %v7478_v35, %v2451_v51  ;;  %5929 = vpow2.f32 %v2619_v5 }
 0x681   : > { %2510 = vmax.xlane.f32.xlu1 %v2509_v54  ;;  %v2776_v49 = vadd.f32 %v7672_v18, %v7668_v14  ;;  %v7682_v8 = vpop.eup %5905  ;;  %v2543_v54 = vsub.f32 %v7476_v44, %v2451_v51  ;;  %v2549_v28 = vsub.f32 %v7488_v22, %v2460_v41  ;;  %v2550_v44 = vsub.f32 %v7490_v61, %v2460_v41 }
 0x682   : > { %v7686_v56 = vpop.eup %5907  ;;  %v2497_v22 = vmax.f32 %v7554_v0, %v7556_v57  ;;  %5931 = vpow2.f32 %v2621_v9 }
 0x683   : > { %2777 = vadd.xlane.f32.xlu0 %v2776_v49  ;;  %v7689_v11 = vpop.eup %5909  ;;  %v2770_v52 = vadd.f32 %v7686_v56, %v7682_v8  ;;  %v2445_v6 = vpop.xlane.xlu1 %2444  ;;  %v2506_v49 = vmax.f32 %v7578_v27, %v7580_v32  ;;  %v2611_v35 = vmul.f32 1.442695, %v2543_v54  ;;  %5933 = vpow2.f32 %v2631_v12  ;;  %v9666_v54 = vld [vmem:[#allocation43_spill] sm:$0xff] }
 0x684   : > { %v7694_v47 = vpop.eup %5911  ;;  %v2454_v63 = vpop.xlane.xlu0 %2453  ;;  %v2540_v3 = vsub.f32 %v7470_v31, %v2445_v6  ;;  %v2623_v61 = vmul.f32 1.442695, %v2549_v28  ;;  %5935 = vpow2.f32 %v2633_v10  ;;  %v2625_v19 = vmul.f32 1.442695, %v2550_v44 }
 0x685   : > { %2768 = vadd.xlane.f32.xlu1 %v2767_v20  ;;  %v2761_v13 = vadd.f32 %v7694_v47, %v7689_v11  ;;  %v7705_v38 = vpop.eup %5913  ;;  %v2539_v20 = vsub.f32 %v7468_v29, %v2445_v6  ;;  %v2545_v41 = vsub.f32 %v7480_v23, %v2454_v63  ;;  %v2546_v29 = vsub.f32 %v7482_v36, %v2454_v63  ;;  %v5689_v23 = vld [vmem:[%s9354_s2 + $0x90] sm:$0xff]  }
 0x686   : > { %v7710_v46 = vpop.eup %5915  ;;  %5937 = vpow2.f32 %v2611_v35  ;;  %v2605_v31 = vmul.f32 1.442695, %v2540_v3  ;;  %5292 = vmatmul.mubr.msk.bf16.gmra.mxu0 %vm478_vm0, %v5689_v23  ;;  %v9667_v6 = vmov 0  }
 0x687   : > { %2513 = vmax.xlane.f32.xlu0 %v2512_v45  ;;  %v7713_v59 = vpop.eup %5917  ;;  %v2613_v45 = vmul.f32 1.442695, %v2544_v40  ;;  %v2603_v53 = vmul.f32 1.442695, %v2539_v20  ;;  %v2615_v43 = vmul.f32 1.442695, %v2545_v41  ;;  %773 = vmatprep.mubr.bf16.mxu0 %v9667_v6 }
 0x688   : > { %v7718_v51 = vpop.eup %5919  ;;  %v2448_v16 = vpop.xlane.xlu0 %2447  ;;  %v2617_v5 = vmul.f32 1.442695, %v2546_v29  ;;  %v9672_v41 = vld [vmem:[#allocation12_spill] sm:$0xff] }
 0x689   : > { %2504 = vmax.xlane.f32.xlu1 %v2503_v55  ;;  %v2764_v55 = vadd.f32 %v7710_v46, %v7705_v38  ;;  %5939 = vpow2.f32 %v2613_v45  ;;  %v2755_v7 = vadd.f32 %v7718_v51, %v7713_v59  ;;  %v2541_v36 = vsub.f32 %v7472_v50, %v2448_v16  ;;  %v7730_v21 = vpop.eup %5921  ;;  %v9668_v50 = vld [vmem:[#allocation11_spill] sm:$0xff] }
 0x68a   : > { %5941 = vpow2.f32 %v2623_v61  ;;  %v2542_v9 = vsub.f32 %v9666_v54, %v2448_v16  ;;  %v7736_v40 = vpop.eup %5923  ;;  %v9671_v61 = vld [vmem:[#allocation14_spill] sm:$0xff] }
 0x68b   : > { %2771 = vadd.xlane.f32.xlu0 %v2770_v52  ;;  %v2500_v52 = vmax.f32 %v7562_v2, %v7564_v30  ;;  %5943 = vpow2.f32 %v2625_v19  ;;  %v7739_v63 = vpop.eup %5925  ;;  %v2758_v44 = vadd.f32 %v7736_v40, %v7730_v21  ;;  %v2494_v19 = vmax.f32 %v9672_v41, %v9671_v61 }
 0x68c   : > { %5945 = vpow2.f32 %v2603_v53  ;;  %v7743_v28 = vpop.eup %5927  ;;  %v2609_v10 = vmul.f32 1.442695, %v2542_v9 }
 0x68d   : > { %2762 = vadd.xlane.f32.xlu1 %v2761_v13  ;;  %v9669_v13 = vld [vmem:[#allocation13_spill] sm:$0xff]  ;;  %5947 = vpow2.f32 %v2605_v31  ;;  %v7747_v35 = vpop.eup %5929  ;;  %v2749_v20 = vadd.f32 %v7743_v28, %v7739_v63 }
 0x68e   : > { %v2491_v12 = vmax.f32 %v9669_v13, %v9668_v50  ;;  %5949 = vpow2.f32 %v2615_v43  ;;  %9670 = vst [vmem:[#allocation43_spill] sm:$0xff] %v7747_v35 }
 0x68f   : > { %2507 = vmax.xlane.f32.xlu0 %v2506_v49  ;;  %v2607_v49 = vmul.f32 1.442695, %v2541_v36  ;;  %5951 = vpow2.f32 %v2617_v5  ;;  %v7754_v45 = vpop.eup %5931 }
 0x690   : > { %v7756_v3 = vpop.eup %5933 }
 0x691   : > { %2498 = vmax.xlane.f32.xlu1 %v2497_v22  ;;  %v5690_v22 = vld [vmem:[%s9354_s2 + $0x98] sm:$0xff]   ;;  %5953 = vpow2.f32 %v2607_v49  ;;  %v7761_v29 = vpop.eup %5935 }
 0x692   : > { %5955 = vpow2.f32 %v2609_v10  ;;  %5293 = vmatmul.mubr.msk.bf16.gmra.mxu0 %vm478_vm0, %v5690_v22 }
 0x693   : > { %2765 = vadd.xlane.f32.xlu0 %v2764_v55  ;;  %783 = vmatprep.mubr.bf16.mxu0 %v9667_v6  ;;  %v7764_v16 = vpop.eup %5937  ;;  %v2743_v55 = vadd.f32 %v7754_v45, %v7747_v35 }
 0x694   : > { %9673 = vst [vmem:[#allocation11_spill] sm:$0xff] %v7764_v16 }
 0x695   : > { %2756 = vadd.xlane.f32.xlu1 %v2755_v7  ;;  %v2752_v7 = vadd.f32 %v7761_v29, %v7756_v3 }
 0x696   : > { %v7768_v53 = vpop.eup %5939 }
 0x697   : > { %2501 = vmax.xlane.f32.xlu0 %v2500_v52  ;;  %9674 = vst [vmem:[#allocation13_spill] sm:$0xff] %v7768_v53  ;;  %v7770_v31 = vpop.eup %5941  ;;  %v2737_v36 = vadd.f32 %v7768_v53, %v7764_v16 }
 0x698   : > { %v7774_v23 = vpop.eup %5943 }
 0x699   : > { %2492 = vmax.xlane.f32.xlu1 %v2491_v12  ;;  %v7776_v43 = vpop.eup %5945  ;;  %v2746_v54 = vadd.f32 %v7774_v23, %v7770_v31 }
 0x69a   : > { %9675 = vst [vmem:[#allocation14_spill] sm:$0xff] %v7776_v43  ;;  %v7780_v52 = vpop.eup %5947 }
 0x69b   : > { %2759 = vadd.xlane.f32.xlu0 %v2758_v44  ;;  %9676 = vst [vmem:[#allocation12_spill] sm:$0xff] %v7780_v52  ;;  %v7782_v5 = vpop.eup %5949  ;;  %v2731_v49 = vadd.f32 %v7780_v52, %v7776_v43  ;;  %v9679_v44 = vld [vmem:[#allocation61_spill] sm:$0xff]  ;;  %v9681_v52 = vld [vmem:[#allocation58_spill] sm:$0xff] }
 0x69c   : > { %9677 = vst [vmem:[#allocation62_spill] sm:$0xff] %v7782_v5  ;;  %v7786_v9 = vpop.eup %5951 }
 0x69d   : > { %2750 = vadd.xlane.f32.xlu1 %v2749_v20  ;;  %9678 = vst [vmem:[#allocation63_spill] sm:$0xff] %v7786_v9 }
 0x69e   : > { %v7792_v22 = vpop.eup %5953 }
 0x69f   : > { %2495 = vmax.xlane.f32.xlu0 %v2494_v19  ;;  %9680 = vst [vmem:[#allocation61_spill] sm:$0xff] %v7792_v22  ;;  %v2740_v19 = vadd.f32 %v7786_v9, %v7782_v5  ;;  %v9683_v9 = vld [vmem:[#allocation40_spill] sm:$0xff] }
 0x6a1   : > { %2744 = vadd.xlane.f32.xlu1 %v2743_v55  ;;  %v7796_v55 = vpop.eup %5955 }
 0x6a3   : > { %2753 = vadd.xlane.f32.xlu0 %v2752_v7 }
 0x6a5   : > { %2738 = vadd.xlane.f32.xlu1 %v2737_v36 }
 0x6a7   : > { %2747 = vadd.xlane.f32.xlu0 %v2746_v54  ;;  %v2535_v12 = vpop.xlane.xlu1 %2534 }
 0x6a8   : > { %v2599_v10 = vsub.f32 %v7620_v48, %v2535_v12  ;;  %v2600_v20 = vsub.f32 %v9679_v44, %v2535_v12  ;;  %v2734_v44 = vadd.f32 %v7796_v55, %v7792_v22 }
 0x6a9   : > { %2732 = vadd.xlane.f32.xlu1 %v2731_v49 }
 0x6aa   : > { %v2723_v7 = vmul.f32 1.442695, %v2599_v10  ;;  %v2725_v36 = vmul.f32 1.442695, %v2600_v20 }
 0x6ab   : > { %2741 = vadd.xlane.f32.xlu0 %v2740_v19  ;;  %v2529_v54 = vpop.xlane.xlu1 %2528  ;;  %v2538_v16 = vpop.xlane.xlu0 %2537 }
 0x6ac   : > { %5957 = vpow2.f32 %v2723_v7  ;;  %v2595_v43 = vsub.f32 %v7612_v33, %v2529_v54  ;;  %v2596_v48 = vsub.f32 %v9681_v52, %v2529_v54  ;;  %v2601_v12 = vsub.f32 %v7626_v42, %v2538_v16  ;;  %v9682_v7 = vld [vmem:[#allocation36_spill] sm:$0xff]  ;;  %v9684_v54 = vld [vmem:[#allocation59_spill] sm:$0xff] }
 0x6ad   : > { %5959 = vpow2.f32 %v2725_v36  ;;  %v2602_v49 = vsub.f32 %v7630_v1, %v2538_v16  ;;  %v9685_v36 = vld [vmem:[#allocation60_spill] sm:$0xff] }
 0x6ae   : > { %v2715_v5 = vmul.f32 1.442695, %v2595_v43  ;;  %v2717_v53 = vmul.f32 1.442695, %v2596_v48  ;;  %v2727_v10 = vmul.f32 1.442695, %v2601_v12 }
 0x6af   : > { %v2729_v20 = vmul.f32 1.442695, %v2602_v49  ;;  %2735 = vadd.xlane.f32.xlu0 %v2734_v44  ;;  %v2523_v19 = vpop.xlane.xlu1 %2522  ;;  %v2532_v35 = vpop.xlane.xlu0 %2531  ;;  %v9686_v44 = vld [vmem:[#allocation37_spill] sm:$0xff] }
 0x6b0   : > { %5961 = vpow2.f32 %v2715_v5  ;;  %v2591_v33 = vsub.f32 %v9682_v7, %v2523_v19  ;;  %v2592_v52 = vsub.f32 %v9683_v9, %v2523_v19  ;;  %v2597_v42 = vsub.f32 %v9684_v54, %v2532_v35  ;;  %v9687_v19 = vld [vmem:[#allocation44_spill] sm:$0xff]  ;;  %v9688_v54 = vld [vmem:[#allocation41_spill] sm:$0xff] }
 0x6b1   : > { %5963 = vpow2.f32 %v2717_v53  ;;  %v2598_v1 = vsub.f32 %v9685_v36, %v2532_v35  ;;  %v9689_v36 = vld [vmem:[#allocation42_spill] sm:$0xff] }
 0x6b2   : > { %5965 = vpow2.f32 %v2727_v10  ;;  %v2707_v16 = vmul.f32 1.442695, %v2591_v33  ;;  %v2709_v22 = vmul.f32 1.442695, %v2592_v52  ;;  %v2719_v43 = vmul.f32 1.442695, %v2597_v42 }
 0x6b3   : > { %5967 = vpow2.f32 %v2729_v20  ;;  %v2721_v48 = vmul.f32 1.442695, %v2598_v1  ;;  %v2517_v12 = vpop.xlane.xlu1 %2516  ;;  %v2526_v49 = vpop.xlane.xlu0 %2525 }
 0x6b4   : > { %5969 = vpow2.f32 %v2707_v16  ;;  %v2587_v5 = vsub.f32 %v7596_v24, %v2517_v12  ;;  %v2588_v7 = vsub.f32 %v9686_v44, %v2517_v12  ;;  %v2593_v9 = vsub.f32 %v7608_v15, %v2526_v49 }
 0x6b5   : > { %5971 = vpow2.f32 %v2709_v22  ;;  %v2594_v53 = vsub.f32 %v9687_v19, %v2526_v49 }
 0x6b6   : > { %5973 = vpow2.f32 %v2719_v43  ;;  %v2699_v35 = vmul.f32 1.442695, %v2587_v5  ;;  %v2701_v10 = vmul.f32 1.442695, %v2588_v7  ;;  %v2711_v33 = vmul.f32 1.442695, %v2593_v9 }
 0x6b7   : > { %5975 = vpow2.f32 %v2721_v48  ;;  %v2713_v52 = vmul.f32 1.442695, %v2594_v53  ;;  %v2520_v20 = vpop.xlane.xlu0 %2519 }
 0x6b8   : > { %5977 = vpow2.f32 %v2699_v35  ;;  %v2589_v42 = vsub.f32 %v9688_v54, %v2520_v20  ;;  %v2590_v1 = vsub.f32 %v9689_v36, %v2520_v20 }
 0x6b9   : > { %v7814_v24 = vpop.eup %5957  ;;  %5979 = vpow2.f32 %v2701_v10 }
 0x6ba   : > { %v7816_v16 = vpop.eup %5959  ;;  %5981 = vpow2.f32 %v2711_v33  ;;  %v2703_v15 = vmul.f32 1.442695, %v2589_v42  ;;  %v2705_v22 = vmul.f32 1.442695, %v2590_v1 }
 0x6bb   : > { %5983 = vpow2.f32 %v2713_v52  ;;  %v2821_v43 = vadd.f32 %v7816_v16, %v7814_v24 }
 0x6bc   : > { %5985 = vpow2.f32 %v2703_v15 }
 0x6bd   : > { %v7820_v48 = vpop.eup %5961  ;;  %5987 = vpow2.f32 %v2705_v22  ;;  %2822 = vadd.xlane.f32.xlu1 %v2821_v43 }
 0x6be   : > { %v7822_v12 = vpop.eup %5963 }
 0x6bf   : > { %v7824_v49 = vpop.eup %5965  ;;  %v2815_v5 = vadd.f32 %v7822_v12, %v7820_v48 }
 0x6c0   : > { %v7828_v44 = vpop.eup %5967 }
 0x6c1   : > { %v7830_v7 = vpop.eup %5969  ;;  %2816 = vadd.xlane.f32.xlu1 %v2815_v5  ;;  %v2824_v9 = vadd.f32 %v7828_v44, %v7824_v49 }
 0x6c2   : > { %9690 = vst [vmem:[#allocation58_spill] sm:$0xff] %v7830_v7  ;;  %v7834_v19 = vpop.eup %5971 }
 0x6c3   : > { %9691 = vst [vmem:[#allocation36_spill] sm:$0xff] %v7834_v19  ;;  %v7836_v53 = vpop.eup %5973  ;;  %2825 = vadd.xlane.f32.xlu0 %v2824_v9  ;;  %v2809_v35 = vadd.f32 %v7834_v19, %v7830_v7 }
 0x6c4   : > { %v7840_v10 = vpop.eup %5975 }
 0x6c5   : > { %v7842_v33 = vpop.eup %5977  ;;  %2810 = vadd.xlane.f32.xlu1 %v2809_v35  ;;  %v2818_v52 = vadd.f32 %v7840_v10, %v7836_v53 }
 0x6c6   : > { %9692 = vst [vmem:[#allocation40_spill] sm:$0xff] %v7842_v33  ;;  %v7846_v20 = vpop.eup %5979 }
 0x6c7   : > { %9693 = vst [vmem:[#allocation59_spill] sm:$0xff] %v7846_v20  ;;  %v7848_v54 = vpop.eup %5981  ;;  %2819 = vadd.xlane.f32.xlu0 %v2818_v52  ;;  %v2803_v42 = vadd.f32 %v7846_v20, %v7842_v33 }
 0x6c8   : > { %9694 = vst [vmem:[#allocation60_spill] sm:$0xff] %v7848_v54  ;;  %v7852_v36 = vpop.eup %5983 }
 0x6c9   : > { %v7854_v1 = vpop.eup %5985  ;;  %2804 = vadd.xlane.f32.xlu1 %v2803_v42  ;;  %v2812_v15 = vadd.f32 %v7852_v36, %v7848_v54 }
 0x6ca   : > { %9695 = vst [vmem:[#allocation37_spill] sm:$0xff] %v7854_v1  ;;  %v7858_v22 = vpop.eup %5987 }
 0x6cb   : > { %9696 = vst [vmem:[#allocation44_spill] sm:$0xff] %v7858_v22  ;;  %2813 = vadd.xlane.f32.xlu0 %v2812_v15  ;;  %v2806_v43 = vadd.f32 %v7858_v22, %v7854_v1 }
 0x6cf   : > { %2807 = vadd.xlane.f32.xlu0 %v2806_v43 }
 0x706   : > { %v2775_v5 = vpop.xlane.xlu1 %2774 }
 0x707   : > { %5989 = vrcp.f32 %v2775_v5 }
 0x70a   : > { %v2511_v9 = vpop.xlane.xlu1 %2510 }
 0x70b   : > { %v2583_v35 = vsub.f32 %v7586_v62, %v2511_v9  ;;  %v2584_v52 = vsub.f32 %v7588_v26, %v2511_v9 }
 0x70c   : > { %v2778_v33 = vpop.xlane.xlu0 %2777 }
 0x70d   : > { %v2691_v20 = vmul.f32 1.442695, %v2583_v35  ;;  %v2693_v42 = vmul.f32 1.442695, %v2584_v52  ;;  %5991 = vrcp.f32 %v2778_v33 }
 0x70e   : > { %v2769_v7 = vpop.xlane.xlu1 %2768 }
 0x70f   : > { %5993 = vpow2.f32 %v2691_v20 }
 0x710   : > { %5995 = vpow2.f32 %v2693_v42  ;;  %v2514_v54 = vpop.xlane.xlu0 %2513 }
 0x711   : > { %v2585_v15 = vsub.f32 %v7592_v17, %v2514_v54  ;;  %v2586_v1 = vsub.f32 %v7594_v4, %v2514_v54  ;;  %5997 = vrcp.f32 %v2769_v7 }
 0x712   : > { %v2505_v43 = vpop.xlane.xlu1 %2504 }
 0x713   : > { %v2695_v22 = vmul.f32 1.442695, %v2585_v15  ;;  %v2697_v5 = vmul.f32 1.442695, %v2586_v1  ;;  %v2579_v19 = vsub.f32 %v7570_v34, %v2505_v43  ;;  %v2580_v62 = vsub.f32 %v7572_v39, %v2505_v43 }
 0x714   : > { %v2772_v26 = vpop.xlane.xlu0 %2771  ;;  %v5990_v35 = vpop.eup %5989 }
 0x715   : > { %5999 = vpow2.f32 %v2695_v22  ;;  %v2683_v9 = vmul.f32 1.442695, %v2579_v19  ;;  %v2685_v33 = vmul.f32 1.442695, %v2580_v62  ;;  %v2888_v39 = vmul.f32 %v5990_v35, %v7658_v60 }
 0x716   : > { %6001 = vpow2.f32 %v2697_v5  ;;  %v2763_v20 = vpop.xlane.xlu1 %2762 }
 0x717   : > { %6003 = vpow2.f32 %v2683_v9 }
 0x718   : > { %6005 = vpow2.f32 %v2685_v33  ;;  %v2508_v17 = vpop.xlane.xlu0 %2507 }
 0x719   : > { %6007 = vrcp.f32 %v2772_v26  ;;  %v2581_v4 = vsub.f32 %v7578_v27, %v2508_v17  ;;  %v2582_v54 = vsub.f32 %v7580_v32, %v2508_v17  ;;  %v2887_v27 = vmul.f32 %v5990_v35, %v7655_v37 }
 0x71a   : > { %v5992_v1 = vpop.eup %5991  ;;  %v2499_v34 = vpop.xlane.xlu1 %2498  ;;  %6009 = vrcp.f32 %v2763_v20 }
 0x71b   : > { %v2687_v7 = vmul.f32 1.442695, %v2581_v4  ;;  %v2689_v52 = vmul.f32 1.442695, %v2582_v54  ;;  %v2575_v19 = vsub.f32 %v7554_v0, %v2499_v34  ;;  %v2576_v22 = vsub.f32 %v7556_v57, %v2499_v34 }
 0x71c   : > { %v7873_v42 = vpop.eup %5993  ;;  %v2766_v15 = vpop.xlane.xlu0 %2765  ;;  %v2890_v43 = vmul.f32 %v5992_v1, %v7672_v18  ;;  %v2889_v32 = vmul.f32 %v5992_v1, %v7668_v14 }
 0x71d   : > { %v7878_v5 = vpop.eup %5995  ;;  %6011 = vpow2.f32 %v2687_v7  ;;  %v2675_v60 = vmul.f32 1.442695, %v2575_v19  ;;  %v2677_v62 = vmul.f32 1.442695, %v2576_v22 }
 0x71e   : > { %6013 = vpow2.f32 %v2689_v52  ;;  %v2938_v26 = vpack.c.bf16 %v2890_v43, %v2888_v39  ;;  %v2757_v0 = vpop.xlane.xlu1 %2756  ;;  %v2937_v9 = vpack.c.bf16 %v2889_v32, %v2887_v27  ;;  %v2797_v57 = vadd.f32 %v7878_v5, %v7873_v42  ;;  %v5998_v37 = vpop.eup %5997 }
 0x71f   : > { %6015 = vpow2.f32 %v2675_v60  ;;  %v2883_v27 = vmul.f32 %v5998_v37, %v7664_v25 }
 0x720   : > { %6017 = vpow2.f32 %v2677_v62  ;;  %2975 = vmatprep.subr.bf16.mxu0 %v2938_v26  ;;  %v2502_v18 = vpop.xlane.xlu0 %2501  ;;  %2798 = vadd.xlane.f32.xlu1 %v2797_v57 }
 0x721   : > { %6019 = vrcp.f32 %v2766_v15  ;;  %2976 = vmatpush1.bf16.xpose.msra.mxu0 %v2937_v9  ;;  %v2577_v14 = vsub.f32 %v7562_v2, %v2502_v18  ;;  %v2578_v33 = vsub.f32 %v7564_v30, %v2502_v18  ;;  %v2884_v15 = vmul.f32 %v5998_v37, %v7666_v58 }
 0x722   : > { %v7884_v20 = vpop.eup %5999  ;;  %v2493_v35 = vpop.xlane.xlu1 %2492  ;;  %6021 = vrcp.f32 %v2757_v0 }
 0x723   : > { %v7886_v17 = vpop.eup %6001  ;;  %v2679_v4 = vmul.f32 1.442695, %v2577_v14  ;;  %v2681_v54 = vmul.f32 1.442695, %v2578_v33  ;;  %v2571_v1 = vsub.f32 %v9669_v13, %v2493_v35  ;;  %v2572_v34 = vsub.f32 %v9668_v50, %v2493_v35 }
 0x724   : > { %v7890_v39 = vpop.eup %6003  ;;  %v2760_v7 = vpop.xlane.xlu0 %2759  ;;  %v2800_v2 = vadd.f32 %v7886_v17, %v7884_v20 }
 0x725   : > { %v7894_v52 = vpop.eup %6005  ;;  %6023 = vpow2.f32 %v2679_v4  ;;  %v2667_v30 = vmul.f32 1.442695, %v2571_v1  ;;  %v2669_v19 = vmul.f32 1.442695, %v2572_v34 }
 0x726   : > { %v6008_v22 = vpop.eup %6007  ;;  %6025 = vpow2.f32 %v2681_v54  ;;  %2801 = vadd.xlane.f32.xlu0 %v2800_v2  ;;  %v2751_v13 = vpop.xlane.xlu1 %2750  ;;  %v2791_v50 = vadd.f32 %v7894_v52, %v7890_v39 }
 0x727   : > { %6027 = vpow2.f32 %v2667_v30  ;;  %v2886_v43 = vmul.f32 %v6008_v22, %v7686_v56  ;;  %v2885_v32 = vmul.f32 %v6008_v22, %v7682_v8  ;;  %v6010_v62 = vpop.eup %6009 }
 0x728   : > { %6029 = vpow2.f32 %v2669_v19  ;;  %v2496_v60 = vpop.xlane.xlu0 %2495  ;;  %2792 = vadd.xlane.f32.xlu1 %v2791_v50  ;;  %v2879_v1 = vmul.f32 %v6010_v62, %v7689_v11 }
 0x729   : > { %6031 = vrcp.f32 %v2760_v7  ;;  %v2936_v26 = vpack.c.bf16 %v2886_v43, %v2884_v15  ;;  %v2935_v0 = vpack.c.bf16 %v2885_v32, %v2883_v27  ;;  %v2573_v58 = vsub.f32 %v9672_v41, %v2496_v60 }
 0x72a   : > { %v7903_v9 = vpop.eup %6011  ;;  %v2574_v57 = vsub.f32 %v9671_v61, %v2496_v60  ;;  %v2745_v18 = vpop.xlane.xlu1 %2744  ;;  %6033 = vrcp.f32 %v2751_v13  ;;  %v2880_v61 = vmul.f32 %v6010_v62, %v7694_v47 }
 0x72b   : > { %v7906_v14 = vpop.eup %6013  ;;  %2977 = vmatprep.subr.bf16.mxu0 %v2936_v26  ;;  %v2671_v25 = vmul.f32 1.442695, %v2573_v58  ;;  %6035 = vrcp.f32 %v2745_v18 }
 0x72c   : > { %v7908_v8 = vpop.eup %6015  ;;  %2978 = vmatpush1.bf16.xpose.msra.mxu0 %v2935_v0  ;;  %v2673_v56 = vmul.f32 1.442695, %v2574_v57  ;;  %v2754_v37 = vpop.xlane.xlu0 %2753  ;;  %v2794_v33 = vadd.f32 %v7906_v14, %v7903_v9 }
 0x72d   : > { %v7912_v41 = vpop.eup %6017  ;;  %6037 = vpow2.f32 %v2671_v25 }
 0x72e   : > { %v6020_v35 = vpop.eup %6019  ;;  %6039 = vpow2.f32 %v2673_v56  ;;  %2795 = vadd.xlane.f32.xlu0 %v2794_v33  ;;  %v2785_v4 = vadd.f32 %v7912_v41, %v7908_v8  ;;  %v2739_v50 = vpop.xlane.xlu1 %2738  ;;  %v5691_v33 = vld [vmem:[%s9354_s2 + $0xa0] sm:$0xff]  }
 0x72f   : > { %6041 = vrcp.f32 %v2754_v37  ;;  %v2882_v54 = vmul.f32 %v6020_v35, %v7710_v46  ;;  %v2881_v34 = vmul.f32 %v6020_v35, %v7705_v38  ;;  %v6022_v2 = vpop.eup %6021  ;;  %5294 = vmatmul.mubr.msk.bf16.gmra.mxu0 %vm478_vm0, %v5691_v33  ;;  %v5694_v33 = vld [vmem:[%s9354_s2 + $0xb8] sm:$0xff]  }
 0x730   : > { %v2748_v7 = vpop.xlane.xlu0 %2747  ;;  %2786 = vadd.xlane.f32.xlu1 %v2785_v4  ;;  %v2876_v43 = vmul.f32 %v6022_v2, %v7718_v51  ;;  %v2875_v60 = vmul.f32 %v6022_v2, %v7713_v59  ;;  %793 = vmatprep.mubr.bf16.mxu0 %v9667_v6 }
 0x731   : > { %v2934_v30 = vpack.c.bf16 %v2882_v54, %v2880_v61  ;;  %v2933_v19 = vpack.c.bf16 %v2881_v34, %v2879_v1  ;;  %6043 = vrcp.f32 %v2748_v7 }
 0x732   : > { %v7920_v22 = vpop.eup %6023  ;;  %v2733_v61 = vpop.xlane.xlu1 %2732 }
 0x733   : > { %v7922_v15 = vpop.eup %6025  ;;  %2979 = vmatprep.subr.bf16.mxu0 %v2934_v30 }
 0x734   : > { %v7924_v47 = vpop.eup %6027  ;;  %2980 = vmatpush1.bf16.xpose.msra.mxu0 %v2933_v19  ;;  %v2742_v13 = vpop.xlane.xlu0 %2741  ;;  %v2788_v11 = vadd.f32 %v7922_v15, %v7920_v22  ;;  %v9698_v19 = vld [vmem:[#allocation43_spill] sm:$0xff] }
 0x735   : > { %v7928_v46 = vpop.eup %6029  ;;  %6045 = vrcp.f32 %v2742_v13 }
 0x736   : > { %v6032_v38 = vpop.eup %6031  ;;  %2789 = vadd.xlane.f32.xlu0 %v2788_v11  ;;  %v2779_v27 = vadd.f32 %v7928_v46, %v7924_v47  ;;  %6047 = vrcp.f32 %v2739_v50  ;;  %v9699_v11 = vld [vmem:[#allocation13_spill] sm:$0xff] }
 0x737   : > { %v2878_v32 = vmul.f32 %v6032_v38, %v7736_v40  ;;  %v2877_v62 = vmul.f32 %v6032_v38, %v7730_v21  ;;  %v6034_v26 = vpop.eup %6033 }
 0x738   : > { %2780 = vadd.xlane.f32.xlu1 %v2779_v27  ;;  %v6036_v0 = vpop.eup %6035  ;;  %v2736_v56 = vpop.xlane.xlu0 %2735  ;;  %v2872_v59 = vmul.f32 %v6034_v26, %v7743_v28  ;;  %v2871_v4 = vmul.f32 %v6034_v26, %v7739_v63  ;;  %v5692_v63 = vld [vmem:[%s9354_s2 + $0xa8] sm:$0xff]   ;;  %v5693_v27 = vld [vmem:[%s9354_s2 + $0xb0] sm:$0xff]   ;;  %v9700_v26 = vld [vmem:[#allocation62_spill] sm:$0xff] }
 0x739   : > { %v2932_v58 = vpack.c.bf16 %v2878_v32, %v2876_v43  ;;  %v2931_v57 = vpack.c.bf16 %v2877_v62, %v2875_v60  ;;  %6049 = vrcp.f32 %v2736_v56  ;;  %v2868_v1 = vmul.f32 %v6036_v0, %v7754_v45  ;;  %5295 = vmatmul.mubr.msk.bf16.gmra.mxu0 %vm478_vm0, %v5692_v63 }
 0x73a   : > { %v7936_v18 = vpop.eup %6037  ;;  %6051 = vrcp.f32 %v2733_v61  ;;  %v2867_v13 = vmul.f32 %v6036_v0, %v9698_v19  ;;  %803 = vmatprep.mubr.bf16.mxu0 %v9667_v6 }
 0x73b   : > { %v7938_v25 = vpop.eup %6039  ;;  %2981 = vmatprep.subr.bf16.mxu0 %v2932_v58 }
 0x73c   : > { %v6042_v51 = vpop.eup %6041  ;;  %2982 = vmatpush1.bf16.xpose.msra.mxu0 %v2931_v57  ;;  %v2782_v40 = vadd.f32 %v7938_v25, %v7936_v18  ;;  %v9701_v57 = vld [vmem:[#allocation11_spill] sm:$0xff] }
 0x73d   : > { %v2874_v21 = vmul.f32 %v6042_v51, %v7761_v29  ;;  %v2873_v37 = vmul.f32 %v6042_v51, %v7756_v3 }
 0x73e   : > { %v6044_v35 = vpop.eup %6043  ;;  %2783 = vadd.xlane.f32.xlu0 %v2782_v40  ;;  %v9702_v40 = vld [vmem:[#allocation12_spill] sm:$0xff] }
 0x73f   : > { %v2930_v54 = vpack.c.bf16 %v2874_v21, %v2872_v59  ;;  %v2870_v34 = vmul.f32 %v6044_v35, %v7774_v23  ;;  %v2929_v28 = vpack.c.bf16 %v2873_v37, %v2871_v4  ;;  %v2869_v45 = vmul.f32 %v6044_v35, %v7770_v31  ;;  %v9697_v23 = vld [vmem:[#allocation63_spill] sm:$0xff]  ;;  %v9703_v4 = vld [vmem:[#allocation61_spill] sm:$0xff] }
 0x741   : > { %2983 = vmatprep.subr.bf16.mxu0 %v2930_v54  ;;  %v2928_v3 = vpack.c.bf16 %v2870_v34, %v2868_v1  ;;  %v2927_v50 = vpack.c.bf16 %v2869_v45, %v2867_v13  ;;  %5296 = vmatmul.mubr.msk.bf16.gmra.mxu0 %vm478_vm0, %v5693_v27 }
 0x742   : > { %v6046_v29 = vpop.eup %6045  ;;  %813 = vmatprep.mubr.bf16.mxu0 %v9667_v6 }
 0x743   : > { %v6048_v7 = vpop.eup %6047  ;;  %v2866_v30 = vmul.f32 %v6046_v29, %v9697_v23  ;;  %v2865_v0 = vmul.f32 %v6046_v29, %v9700_v26  ;;  %v9706_v26 = vld [vmem:[#allocation15_spill] sm:$0xff] }
 0x744   : > { %2984 = vmatpush1.bf16.xpose.msra.mxu0 %v2929_v28  ;;  %v2864_v38 = vmul.f32 %v6048_v7, %v9699_v11  ;;  %v2863_v51 = vmul.f32 %v6048_v7, %v9701_v57  ;;  %v9704_v28 = vld [vmem:[#allocation14_spill] sm:$0xff] }
 0x745   : > { %2985 = vmatprep.subr.bf16.mxu0 %v2928_v3 }
 0x746   : > { %v2823_v2 = vpop.xlane.xlu1 %2822  ;;  %v2926_v43 = vpack.c.bf16 %v2866_v30, %v2864_v38  ;;  %v6050_v32 = vpop.eup %6049  ;;  %v2925_v21 = vpack.c.bf16 %v2865_v0, %v2863_v51 }
 0x747   : > { %6053 = vrcp.f32 %v2823_v2  ;;  %v6052_v62 = vpop.eup %6051  ;;  %v2862_v58 = vmul.f32 %v6050_v32, %v7796_v55  ;;  %v7974_v55 = vpop.f32.mrf.mxu0  ;;  %v2861_v54 = vmul.f32 %v6050_v32, %v9703_v4 }
 0x748   : > { %v2860_v59 = vmul.f32 %v6052_v62, %v9702_v40  ;;  %v2859_v3 = vmul.f32 %v6052_v62, %v9704_v28  ;;  %v9710_v40 = vld [vmem:[#allocation36_spill] sm:$0xff] }
 0x749   : > { %v767_v1 = vpop.f32.mrf.mxu0  ;;  %5297 = vmatmul.mubr.msk.bf16.gmra.mxu0 %vm478_vm0, %v5694_v33  ;;  %v9717_v28 = vld [vmem:[#allocation44_spill] sm:$0xff] }
 0x74a   : > { %v2817_v31 = vpop.xlane.xlu1 %2816  ;;  %v2924_v37 = vpack.c.bf16 %v2862_v58, %v2860_v59  ;;  %v2923_v7 = vpack.c.bf16 %v2861_v54, %v2859_v3  ;;  %v9714_v54 = vld [vmem:[#allocation20_spill] sm:$0xff] }
 0x74b   : > { %v7979_v29 = vpop.f32.mrf.mxu0 }
 0x74c   : > { %2986 = vmatpush1.bf16.xpose.msra.mxu0 %v2927_v50  ;;  %v2826_v60 = vpop.xlane.xlu0 %2825  ;;  %v5583_v23 = vpack.c.bf16 %v7979_v29, %v7974_v55 }
 0x74d   : > { %2987 = vmatprep.subr.bf16.mxu0 %v2926_v43  ;;  %6055 = vrcp.f32 %v2826_v60  ;;  %v771_v30 = vpop.f32.mrf.mxu0 }
 0x74e   : > { %6057 = vrcp.f32 %v2817_v31  ;;  %v2811_v61 = vpop.xlane.xlu1 %2810  ;;  %v5584_v38 = vpack.c.bf16 %v771_v30, %v767_v1 }
 0x750   : > { %v2820_v56 = vpop.xlane.xlu0 %2819  ;;  %3007 = vmatprep.mubr.bf16.mxu0 %v5584_v38  ;;  %v9721_v38 = vld [vmem:[#allocation40_spill] sm:$0xff] }
 0x751   : > { %6059 = vrcp.f32 %v2820_v56  ;;  %v9709_v56 = vld [vmem:[#allocation18_spill] sm:$0xff] }
 0x752   : > { %v2805_v27 = vpop.xlane.xlu1 %2804 }
 0x754   : > { %2988 = vmatpush1.bf16.xpose.msra.mxu0 %v2925_v21  ;;  %v2814_v35 = vpop.xlane.xlu0 %2813  ;;  %v6054_v34 = vpop.eup %6053  ;;  %v9711_v21 = vld [vmem:[#allocation21_spill] sm:$0xff] }
 0x755   : > { %2989 = vmatprep.subr.bf16.mxu0 %v2924_v37  ;;  %6061 = vrcp.f32 %v2814_v35  ;;  %v2920_v2 = vmul.f32 %v6054_v34, %v7816_v16  ;;  %v2919_v32 = vmul.f32 %v6054_v34, %v7814_v24  ;;  %v9712_v37 = vld [vmem:[#allocation19_spill] sm:$0xff] }
 0x756   : > { %6063 = vrcp.f32 %v2811_v61  ;;  %v9713_v33 = vpack.c.bf16 %v9711_v21, %v9712_v37 }
 0x758   : > { %v2808_v13 = vpop.xlane.xlu0 %2807 }
 0x759   : > { %6065 = vrcp.f32 %v2808_v13  ;;  %v9720_v13 = vld [vmem:[#allocation37_spill] sm:$0xff] }
 0x75a   : > { %v6056_v63 = vpop.eup %6055  ;;  %6067 = vrcp.f32 %v2805_v27 }
 0x75b   : > { %v2922_v45 = vmul.f32 %v6056_v63, %v7828_v44  ;;  %v6058_v19 = vpop.eup %6057  ;;  %v2921_v11 = vmul.f32 %v6056_v63, %v7824_v49  ;;  %v9705_v49 = vld [vmem:[#allocation17_spill] sm:$0xff]  ;;  %v9718_v63 = vld [vmem:[#allocation58_spill] sm:$0xff] }
 0x75c   : > { %2990 = vmatpush1.bf16.xpose.msra.mxu0 %v2923_v7  ;;  %v2916_v16 = vmul.f32 %v6058_v19, %v7822_v12  ;;  %v9707_v0 = vpack.c.bf16 %v9705_v49, %v9706_v26  ;;  %v2915_v51 = vmul.f32 %v6058_v19, %v7820_v48  ;;  %v9708_v12 = vld [vmem:[#allocation16_spill] sm:$0xff] }
 0x75d   : > { %v2954_v50 = vpack.c.bf16 %v2922_v45, %v2920_v2  ;;  %v2953_v31 = vpack.c.bf16 %v2921_v11, %v2919_v32  ;;  %v9716_v48 = vld [vmem:[#allocation60_spill] sm:$0xff]  ;;  %v9719_v2 = vld [vmem:[#allocation59_spill] sm:$0xff] }
 0x75e   : > { %v6060_v43 = vpop.eup %6059 }
 0x75f   : > { %2991 = vmatprep.subr.bf16.mxu0 %v2954_v50  ;;  %v2918_v44 = vmul.f32 %v6060_v43, %v7840_v10  ;;  %v2917_v24 = vmul.f32 %v6060_v43, %v7836_v53  ;;  %v5588_v10 = vpack.c.bf16 %v9709_v56, %v9708_v12  ;;  %v9715_v53 = vld [vmem:[#allocation22_spill] sm:$0xff] }
 0x760   : > { %v5590_v1 = vpack.c.bf16 %v9715_v53, %v9714_v54  ;;  %v775_v54 = vpop.f32.mrf.mxu0 }
 0x761   : > { %v2952_v60 = vpack.c.bf16 %v2918_v44, %v2916_v16  ;;  %v2951_v35 = vpack.c.bf16 %v2917_v24, %v2915_v51 }
 0x762   : > { %v6062_v62 = vpop.eup %6061  ;;  %v777_v53 = vpop.f32.mrf.mxu0 }
 0x763   : > { %v6064_v58 = vpop.eup %6063  ;;  %v2914_v57 = vmul.f32 %v6062_v62, %v7852_v36  ;;  %v2913_v34 = vmul.f32 %v6062_v62, %v9716_v48 }
 0x764   : > { %2992 = vmatpush2.bf16.xpose.msra.mxu0 %v2953_v31  ;;  %v2912_v59 = vmul.f32 %v6064_v58, %v9710_v40  ;;  %v2911_v7 = vmul.f32 %v6064_v58, %v9718_v63 }
 0x765   : > { %2993 = vmatprep.subr.bf16.mxu0 %v2952_v60  ;;  %3099 = vxpose.xlu1.c.b16.start [1/2] (short) %v9707_v0, 128 }
 0x766   : > { %v2950_v61 = vpack.c.bf16 %v2914_v57, %v2912_v59  ;;  %v6066_v4 = vpop.eup %6065  ;;  %v2949_v30 = vpack.c.bf16 %v2913_v34, %v2911_v7 }
 0x767   : > { %v6068_v36 = vpop.eup %6067  ;;  %v2910_v3 = vmul.f32 %v6066_v4, %v9717_v28  ;;  %v2909_v11 = vmul.f32 %v6066_v4, %v9720_v13  ;;  %v779_v28 = vpop.f32.mrf.mxu0  ;;  %v9730_v13 = vld [vmem:[#allocation38_spill] sm:$0xff] }
 0x768   : > { %v2908_v45 = vmul.f32 %v6068_v36, %v9719_v2  ;;  %v2907_v50 = vmul.f32 %v6068_v36, %v9721_v38  ;;  %v5585_v38 = vpack.c.bf16 %v779_v28, %v775_v54 }
 0x769   : > { %3100 = vxpose.xlu1.c.b16.end [2/2] (short) %v9713_v33, 128  ;;  %v781_v7 = vpop.f32.mrf.mxu0 }
 0x76a   : > { %v2948_v19 = vpack.c.bf16 %v2910_v3, %v2908_v45  ;;  %v2947_v43 = vpack.c.bf16 %v2909_v11, %v2907_v50  ;;  %v9723_v3 = vld [vmem:[#allocation52_spill] sm:$0xff]  ;;  %v5586_v2 = vpack.c.bf16 %v781_v7, %v777_v53  ;;  %v9724_v45 = vld [vmem:[#allocation39_spill] sm:$0xff] }
 0x76b   : > { %3115 = vxpose.xlu0.c.b16.start [1/2] (short) %v5588_v10, 128 }
 0x76c   : > { %2994 = vmatpush2.bf16.xpose.msra.mxu0 %v2951_v35 }
 0x76d   : > { %2995 = vmatprep.subr.bf16.mxu0 %v2950_v61 }
 0x76f   : > { %3116 = vxpose.xlu0.c.b16.end [2/2] (short) %v5590_v1, 128 }
 0x774   : > { %2996 = vmatpush2.bf16.xpose.msra.mxu0 %v2949_v30  ;;  %v9725_v30 = vld [vmem:[#allocation48_spill] sm:$0xff] }
 0x775   : > { %2997 = vmatprep.subr.bf16.mxu0 %v2948_v19  ;;  %v9729_v19 = vld [vmem:[#allocation47_spill] sm:$0xff] }
 0x776   : > { %v9731_v11 = vpack.c.bf16 %v9729_v19, %v9730_v13 }
 0x77c   : > { %2998 = vmatpush2.bf16.xpose.msra.mxu0 %v2947_v43 }
 0x7a9   : > { %v2799_v27 = vpop.xlane.xlu1 %2798 }
 0x7aa   : > { %6069 = vrcp.f32 %v2799_v27 }
 0x7af   : > { %v2802_v32 = vpop.xlane.xlu0 %2801 }
 0x7b0   : > { %6071 = vrcp.f32 %v2802_v32 }
 0x7b1   : > { %v2793_v16 = vpop.xlane.xlu1 %2792 }
 0x7b2   : > { %6073 = vrcp.f32 %v2793_v16 }
 0x7b7   : > { %v2796_v44 = vpop.xlane.xlu0 %2795  ;;  %v6070_v31 = vpop.eup %6069 }
 0x7b8   : > { %6075 = vrcp.f32 %v2796_v44  ;;  %v2904_v49 = vmul.f32 %v6070_v31, %v7878_v5  ;;  %v2903_v0 = vmul.f32 %v6070_v31, %v7873_v42 }
 0x7b9   : > { %v2787_v60 = vpop.xlane.xlu1 %2786 }
 0x7ba   : > { %6077 = vrcp.f32 %v2787_v60 }
 0x7bd   : > { %v6072_v62 = vpop.eup %6071 }
 0x7be   : > { %v2906_v26 = vmul.f32 %v6072_v62, %v7886_v17  ;;  %v2905_v58 = vmul.f32 %v6072_v62, %v7884_v20 }
 0x7bf   : > { %v2790_v24 = vpop.xlane.xlu0 %2789  ;;  %v6074_v12 = vpop.eup %6073 }
 0x7c0   : > { %6079 = vrcp.f32 %v2790_v24  ;;  %v2946_v57 = vpack.c.bf16 %v2906_v26, %v2904_v49  ;;  %v2945_v51 = vpack.c.bf16 %v2905_v58, %v2903_v0  ;;  %v2900_v40 = vmul.f32 %v6074_v12, %v7894_v52 }
 0x7c1   : > { %v2781_v56 = vpop.xlane.xlu1 %2780  ;;  %v2899_v17 = vmul.f32 %v6074_v12, %v7890_v39 }
 0x7c2   : > { %2999 = vmatprep.subr.bf16.mxu0 %v2946_v57  ;;  %6081 = vrcp.f32 %v2781_v56 }
 0x7c3   : > { %3000 = vmatpush2.bf16.xpose.msra.mxu0 %v2945_v51 }
 0x7c5   : > { %v6076_v10 = vpop.eup %6075 }
 0x7c6   : > { %v2902_v5 = vmul.f32 %v6076_v10, %v7906_v14  ;;  %v2901_v42 = vmul.f32 %v6076_v10, %v7903_v9 }
 0x7c7   : > { %v2784_v59 = vpop.xlane.xlu0 %2783  ;;  %v6078_v37 = vpop.eup %6077 }
 0x7c8   : > { %6083 = vrcp.f32 %v2784_v59  ;;  %v2944_v20 = vpack.c.bf16 %v2902_v5, %v2900_v40  ;;  %v2943_v21 = vpack.c.bf16 %v2901_v42, %v2899_v17  ;;  %v2896_v35 = vmul.f32 %v6078_v37, %v7912_v41  ;;  %v3107_v50 = vpop.trf.xlu1 }
 0x7c9   : > { %v2895_v52 = vmul.f32 %v6078_v37, %v7908_v8 }
 0x7ca   : > { %3001 = vmatprep.subr.bf16.mxu0 %v2944_v20 }
 0x7cb   : > { %3002 = vmatpush2.bf16.xpose.msra.mxu0 %v2943_v21 }
 0x7cc   : > { %v3108_v55 = vpop.trf.xlu1 }
 0x7cd   : > { %v6080_v33 = vpop.eup %6079  ;;  %v3123_v37 = vpop.trf.xlu0 }
 0x7ce   : > { %v2898_v61 = vmul.f32 %v6080_v33, %v7922_v15  ;;  %v2897_v14 = vmul.f32 %v6080_v33, %v7920_v22  ;;  %v9722_v22 = vld [vmem:[#allocation50_spill] sm:$0xff] }
 0x7cf   : > { %v6082_v9 = vpop.eup %6081  ;;  %v5594_v63 = vpack.c.bf16 %v9723_v3, %v9722_v22 }
 0x7d0   : > { %v2942_v4 = vpack.c.bf16 %v2898_v61, %v2896_v35  ;;  %v2941_v39 = vpack.c.bf16 %v2897_v14, %v2895_v52  ;;  %v2892_v36 = vmul.f32 %v6082_v9, %v7928_v46  ;;  %v2891_v41 = vmul.f32 %v6082_v9, %v7924_v47  ;;  %v9726_v47 = vld [vmem:[#allocation51_spill] sm:$0xff]  ;;  %v3109_v29 = vpop.trf.xlu1 }
 0x7d1   : > { %v5592_v46 = vpack.c.bf16 %v9725_v30, %v9724_v45  ;;  %v3124_v33 = vpop.trf.xlu0 }
 0x7d2   : > { %3003 = vmatprep.subr.bf16.mxu0 %v2942_v4 }
 0x7d3   : > { %3004 = vmatpush2.bf16.xpose.msra.mxu0 %v2941_v39 }
 0x7d4   : > { %v3110_v31 = vpop.trf.xlu1 }
 0x7d5   : > { %v6084_v1 = vpop.eup %6083  ;;  %v3125_v35 = vpop.trf.xlu0 }
 0x7d6   : > { %v2894_v48 = vmul.f32 %v6084_v1, %v7938_v25  ;;  %v2893_v15 = vmul.f32 %v6084_v1, %v7936_v18  ;;  %v9727_v18 = vld [vmem:[#allocation49_spill] sm:$0xff] }
 0x7d7   : > { %v9728_v25 = vpack.c.bf16 %v9726_v47, %v9727_v18 }
 0x7d8   : > { %v2940_v34 = vpack.c.bf16 %v2894_v48, %v2892_v36  ;;  %v2939_v8 = vpack.c.bf16 %v2893_v15, %v2891_v41  ;;  %v3111_v24 = vpop.trf.xlu1 }
 0x7d9   : > { %v3126_v61 = vpop.trf.xlu0 }
 0x7da   : > { %3005 = vmatprep.subr.bf16.mxu0 %v2940_v34 }
 0x7db   : > { %3006 = vmatpush2.bf16.xpose.msra.mxu0 %v2939_v8 }
 0x7dc   : > { %3211 = vmatprep.subr.bf16.mxu0 %v5594_v63  ;;  %v3112_v40 = vpop.trf.xlu1 }
 0x7dd   : > { %v3127_v52 = vpop.trf.xlu0 }
 0x7e0   : > { %v3113_v20 = vpop.trf.xlu1 }
 0x7e1   : > { %v3128_v14 = vpop.trf.xlu0 }
 0x7e2   : > { %3008 = vmatmul.mubr.bf16.vlgmr.msra.gmra.mxu0 %v5583_v23 }
 0x7e3   : > { %3212 = vmatpush1.bf16.msra.mxu0 %v9728_v25  ;;  %3017 = vmatprep.mubr.bf16.mxu0 %v5586_v2 }
 0x7e4   : > { %3213 = vmatprep.subr.bf16.mxu0 %v5592_v46  ;;  %v3114_v21 = vpop.trf.xlu1 }
 0x7e5   : > { %v3129_v4 = vpop.trf.xlu0 }
 0x7e7   : > { %3214 = vmatpush1.bf16.msra.mxu0 %v9731_v11 }
 0x7e9   : > { %v3130_v39 = vpop.trf.xlu0 }
 0x7ea   : > { %3018 = vmatmul.mubr.bf16.gmra.mxu0 %v5585_v38 }
 0x7eb   : > { %3231 = vmatprep.mubr.bf16.mxu0 %v9667_v6 }
 0x7ef   : > { %v8043_v23 = vpop.f32.mrf.mxu0 }
 0x7f0   : > { %9732 = vst [vmem:[#allocation41_spill] sm:$0xff] %v8043_v23 }
 0x7f1   : > { %v787_v43 = vpop.f32.mrf.mxu0 }
 0x7f2   : > { %5418 = vmatmul.mubr.msk.bf16.vlgmr.msra.gmra.mxu0 %vm478_vm0, %v3107_v50 }
 0x7f3   : > { %3241 = vmatprep.mubr.bf16.mxu0 %v9667_v6  ;;  %v8047_v27 = vpop.f32.mrf.mxu0 }
 0x7f4   : > { %9733 = vst [vmem:[#allocation42_spill] sm:$0xff] %v8047_v27 }
 0x7f5   : > { %v791_v16 = vpop.f32.mrf.mxu0 }
 0x7f6   : > { %v5596_v44 = vpack.c.bf16 %v791_v16, %v787_v43 }
 0x7f8   : > { %3956 = vmatprep.mubr.bf16.mxu1 %v5596_v44 }
 0x7f9   : > { %v8051_v60 = vpop.f32.mrf.mxu0 }
 0x7fa   : > { %5419 = vmatmul.mubr.msk.bf16.gmra.mxu0 %vm478_vm0, %v3108_v55  ;;  %9734 = vst [vmem:[#allocation63_spill] sm:$0xff] %v8051_v60 }
 0x7fb   : > { %3251 = vmatprep.mubr.bf16.mxu0 %v9667_v6  ;;  %v8053_v62 = vpop.f32.mrf.mxu0 }
 0x7fc   : > { %9735 = vst [vmem:[#allocation43_spill] sm:$0xff] %v8053_v62 }
 0x7fd   : > { %v8057_v49 = vpop.f32.mrf.mxu0 }
 0x7fe   : > { %9736 = vst [vmem:[#allocation13_spill] sm:$0xff] %v8057_v49 }
 0x7ff   : > { %v8061_v0 = vpop.f32.mrf.mxu0 }
 0x800   : > { %9737 = vst [vmem:[#allocation62_spill] sm:$0xff] %v8061_v0 }
 0x801   : > { %v8065_v57 = vpop.f32.mrf.mxu0 }
 0x802   : > { %5420 = vmatmul.mubr.msk.bf16.gmra.mxu0 %vm478_vm0, %v3109_v29  ;;  %9738 = vst [vmem:[#allocation11_spill] sm:$0xff] %v8065_v57 }
 0x803   : > { %3261 = vmatprep.mubr.bf16.mxu0 %v9667_v6  ;;  %v807_v51 = vpop.f32.mrf.mxu0 }
 0x805   : > { %v8069_v12 = vpop.f32.mrf.mxu0 }
 0x806   : > { %9739 = vst [vmem:[#allocation12_spill] sm:$0xff] %v8069_v12 }
 0x807   : > { %v811_v10 = vpop.f32.mrf.mxu0 }
 0x808   : > { %v5608_v54 = vpack.c.bf16 %v811_v10, %v807_v51 }
 0x809   : > { %v8073_v5 = vpop.f32.mrf.mxu0 }
 0x80a   : > { %5421 = vmatmul.mubr.msk.bf16.gmra.mxu0 %vm478_vm0, %v3110_v31  ;;  %9740 = vst [vmem:[#allocation61_spill] sm:$0xff] %v8073_v5 }
 0x80b   : > { %3271 = vmatprep.mubr.bf16.mxu0 %v9667_v6  ;;  %v8075_v17 = vpop.f32.mrf.mxu0 }
 0x80c   : > { %9741 = vst [vmem:[#allocation14_spill] sm:$0xff] %v8075_v17 }
 0x80d   : > { %v8079_v42 = vpop.f32.mrf.mxu0 }
 0x80e   : > { %9742 = vst [vmem:[#allocation17_spill] sm:$0xff] %v8079_v42 }
 0x80f   : > { %v8102_v9 = vpop.f32.mrf.mxu0 }
 0x810   : > { %9743 = vst [vmem:[#allocation15_spill] sm:$0xff] %v8102_v9 }
 0x812   : > { %5422 = vmatmul.mubr.msk.bf16.gmra.mxu0 %vm478_vm0, %v3111_v24 }
 0x813   : > { %3281 = vmatprep.mubr.bf16.mxu0 %v9667_v6 }
 0x81a   : > { %5423 = vmatmul.mubr.msk.bf16.gmra.mxu0 %vm478_vm0, %v3112_v40 }
 0x81b   : > { %3291 = vmatprep.mubr.bf16.mxu0 %v9667_v6 }
 0x822   : > { %5424 = vmatmul.mubr.msk.bf16.gmra.mxu0 %vm478_vm0, %v3113_v20 }
 0x823   : > { %3301 = vmatprep.mubr.bf16.mxu0 %v9667_v6 }
 0x82a   : > { %5425 = vmatmul.mubr.msk.bf16.gmra.mxu0 %vm478_vm0, %v3114_v21 }
 0x82b   : > { %3311 = vmatprep.mubr.bf16.mxu0 %v9667_v6 }
 0x832   : > { %5426 = vmatmul.mubr.msk.bf16.gmra.mxu0 %vm478_vm0, %v3123_v37 }
 0x833   : > { %3321 = vmatprep.mubr.bf16.mxu0 %v9667_v6 }
 0x83a   : > { %5427 = vmatmul.mubr.msk.bf16.gmra.mxu0 %vm478_vm0, %v3124_v33 }
 0x83b   : > { %3331 = vmatprep.mubr.bf16.mxu0 %v9667_v6 }
 0x842   : > { %5428 = vmatmul.mubr.msk.bf16.gmra.mxu0 %vm478_vm0, %v3125_v35 }
 0x843   : > { %3341 = vmatprep.mubr.bf16.mxu0 %v9667_v6 }
 0x84a   : > { %5429 = vmatmul.mubr.msk.bf16.gmra.mxu0 %vm478_vm0, %v3126_v61 }
 0x84b   : > { %3351 = vmatprep.mubr.bf16.mxu0 %v9667_v6 }
 0x852   : > { %5430 = vmatmul.mubr.msk.bf16.gmra.mxu0 %vm478_vm0, %v3127_v52 }
 0x853   : > { %3361 = vmatprep.mubr.bf16.mxu0 %v9667_v6 }
 0x85a   : > { %5431 = vmatmul.mubr.msk.bf16.gmra.mxu0 %vm478_vm0, %v3128_v14 }
 0x85b   : > { %3371 = vmatprep.mubr.bf16.mxu0 %v9667_v6 }
 0x862   : > { %5432 = vmatmul.mubr.msk.bf16.gmra.mxu0 %vm478_vm0, %v3129_v4 }
 0x863   : > { %3381 = vmatprep.mubr.bf16.mxu0 %v9667_v6 }
 0x86a   : > { %5433 = vmatmul.mubr.msk.bf16.gmra.mxu0 %vm478_vm0, %v3130_v39 }
 0x86b   : > { %4905 = vmatprep.mubr.bf16.mxu0 %v5608_v54 }
 0x8a2   : > { %v8104_v53 = vpop.f32.mrf.mxu0 }
 0x8a3   : > { %9744 = vst [vmem:[#allocation16_spill] sm:$0xff] %v8104_v53 }
 0x8a4   : > { %v8106_v1 = vpop.f32.mrf.mxu0 }
 0x8a5   : > { %9745 = vst [vmem:[#allocation18_spill] sm:$0xff] %v8106_v1 }
 0x8a6   : > { %v8108_v36 = vpop.f32.mrf.mxu0 }
 0x8a7   : > { %9746 = vst [vmem:[#allocation36_spill] sm:$0xff] %v8108_v36 }
 0x8a8   : > { %v8112_v41 = vpop.f32.mrf.mxu0 }
 0x8a9   : > { %9747 = vst [vmem:[#allocation21_spill] sm:$0xff] %v8112_v41 }
 0x8aa   : > { %v8116_v34 = vpop.f32.mrf.mxu0 }
 0x8ab   : > { %9748 = vst [vmem:[#allocation19_spill] sm:$0xff] %v8116_v34 }
 0x8ac   : > { %v8118_v8 = vpop.f32.mrf.mxu0 }
 0x8ad   : > { %9749 = vst [vmem:[#allocation20_spill] sm:$0xff] %v8118_v8 }
 0x8ae   : > { %v8120_v28 = vpop.f32.mrf.mxu0 }
 0x8af   : > { %9750 = vst [vmem:[#allocation22_spill] sm:$0xff] %v8120_v28 }
 0x8b0   : > { %v8124_v3 = vpop.f32.mrf.mxu0 }
 0x8b1   : > { %9751 = vst [vmem:[#allocation60_spill] sm:$0xff] %v8124_v3 }
 0x8b2   : > { %v8128_v7 = vpop.f32.mrf.mxu0 }
 0x8b4   : > { %v8130_v2 = vpop.f32.mrf.mxu0 }
 0x8b5   : > { %v3392_v28 = vmax.f32 %v8128_v7, %v8130_v2 }
 0x8b6   : > { %v8132_v45 = vpop.f32.mrf.mxu0 }
 0x8b8   : > { %v8134_v30 = vpop.f32.mrf.mxu0 }
 0x8b9   : > { %9752 = vst [vmem:[#allocation44_spill] sm:$0xff] %v8134_v30  ;;  %v3395_v3 = vmax.f32 %v8132_v45, %v8134_v30 }
 0x8ba   : > { %v8136_v46 = vpop.f32.mrf.mxu0 }
 0x8bc   : > { %v8138_v47 = vpop.f32.mrf.mxu0 }
 0x8bd   : > { %v3398_v41 = vmax.f32 %v8136_v46, %v8138_v47 }
 0x8be   : > { %v8140_v18 = vpop.f32.mrf.mxu0 }
 0x8c0   : > { %v8142_v25 = vpop.f32.mrf.mxu0 }
 0x8c2   : > { %v8144_v19 = vpop.f32.mrf.mxu0 }
 0x8c4   : > { %v8146_v13 = vpop.f32.mrf.mxu0 }
 0x8c5   : > { %v3404_v36 = vmax.f32 %v8144_v19, %v8146_v13 }
 0x8c6   : > { %v8148_v11 = vpop.f32.mrf.mxu0 }
 0x8c8   : > { %v8150_v38 = vpop.f32.mrf.mxu0 }
 0x8ca   : > { %v8152_v50 = vpop.f32.mrf.mxu0 }
 0x8cc   : > { %v8154_v55 = vpop.f32.mrf.mxu0 }
 0x8cd   : > { %v3410_v32 = vmax.f32 %v8152_v50, %v8154_v55 }
 0x8ce   : > { %v8156_v29 = vpop.f32.mrf.mxu0 }
 0x8d0   : > { %v8158_v43 = vpop.f32.mrf.mxu0 }
 0x8d2   : > { %v8160_v16 = vpop.f32.mrf.mxu0 }
 0x8d4   : > { %v8162_v44 = vpop.f32.mrf.mxu0 }
 0x8d5   : > { %v3416_v26 = vmax.f32 %v8160_v16, %v8162_v44 }
 0x8d6   : > { %v8164_v31 = vpop.f32.mrf.mxu0 }
 0x8d8   : > { %v8166_v24 = vpop.f32.mrf.mxu0 }
 0x8da   : > { %v8168_v51 = vpop.f32.mrf.mxu0 }
 0x8dc   : > { %v8170_v10 = vpop.f32.mrf.mxu0 }
 0x8dd   : > { %v3422_v63 = vmax.f32 %v8168_v51, %v8170_v10 }
 0x8de   : > { %v8172_v40 = vpop.f32.mrf.mxu0 }
 0x8e0   : > { %v8174_v20 = vpop.f32.mrf.mxu0 }
 0x8e2   : > { %v8176_v21 = vpop.f32.mrf.mxu0 }
 0x8e4   : > { %v8178_v37 = vpop.f32.mrf.mxu0 }
 0x8e5   : > { %v3428_v54 = vmax.f32 %v8176_v21, %v8178_v37 }
 0x8e6   : > { %v8180_v33 = vpop.f32.mrf.mxu0 }
 0x8e8   : > { %v8182_v35 = vpop.f32.mrf.mxu0 }
 0x8ea   : > { %v8184_v61 = vpop.f32.mrf.mxu0 }
 0x8ec   : > { %v8186_v52 = vpop.f32.mrf.mxu0 }
 0x8ed   : > { %v3434_v14 = vmax.f32 %v8184_v61, %v8186_v52 }
 0x8ee   : > { %v8190_v4 = vpop.f32.mrf.mxu0 }
 0x8ef   : > { %3435 = vmax.xlane.f32.xlu1 %v3434_v14  ;;  %v3431_v14 = vmax.f32 %v8180_v33, %v8182_v35 }
 0x8f0   : > { %v8192_v39 = vpop.f32.mrf.mxu0 }
 0x8f1   : > { %v3437_v48 = vmax.f32 %v8190_v4, %v8192_v39 }
 0x8f2   : > { %v8198_v15 = vpop.f32.mrf.mxu0 }
 0x8f3   : > { %9753 = vst [vmem:[#allocation58_spill] sm:$0xff] %v8198_v15  ;;  %3429 = vmax.xlane.f32.xlu1 %v3428_v54  ;;  %3438 = vmax.xlane.f32.xlu0 %v3437_v48  ;;  %v3425_v48 = vmax.f32 %v8172_v40, %v8174_v20 }
 0x8f4   : > { %v8200_v22 = vpop.f32.mrf.mxu0 }
 0x8f5   : > { %9754 = vst [vmem:[#allocation59_spill] sm:$0xff] %v8200_v22 }
 0x8f6   : > { %v8206_v59 = vpop.f32.mrf.mxu0 }
 0x8f7   : > { %9755 = vst [vmem:[#allocation37_spill] sm:$0xff] %v8206_v59  ;;  %3423 = vmax.xlane.f32.xlu1 %v3422_v63  ;;  %3432 = vmax.xlane.f32.xlu0 %v3431_v14  ;;  %v3419_v63 = vmax.f32 %v8164_v31, %v8166_v24 }
 0x8f8   : > { %v8208_v56 = vpop.f32.mrf.mxu0 }
 0x8f9   : > { %9756 = vst [vmem:[#allocation40_spill] sm:$0xff] %v8208_v56 }
 0x8fa   : > { %v8214_v54 = vpop.f32.mrf.mxu0 }
 0x8fb   : > { %3417 = vmax.xlane.f32.xlu1 %v3416_v26  ;;  %3426 = vmax.xlane.f32.xlu0 %v3425_v48  ;;  %v3413_v26 = vmax.f32 %v8156_v29, %v8158_v43 }
 0x8fc   : > { %v8216_v58 = vpop.f32.mrf.mxu0 }
 0x8fe   : > { %v8222_v14 = vpop.f32.mrf.mxu0 }
 0x8ff   : > { %3411 = vmax.xlane.f32.xlu1 %v3410_v32  ;;  %3420 = vmax.xlane.f32.xlu0 %v3419_v63  ;;  %v3407_v32 = vmax.f32 %v8148_v11, %v8150_v38 }
 0x900   : > { %v8224_v53 = vpop.f32.mrf.mxu0 }
 0x902   : > { %v8230_v48 = vpop.f32.mrf.mxu0 }
 0x903   : > { %3405 = vmax.xlane.f32.xlu1 %v3404_v36  ;;  %3414 = vmax.xlane.f32.xlu0 %v3413_v26  ;;  %v3401_v36 = vmax.f32 %v8140_v18, %v8142_v25 }
 0x904   : > { %v8232_v1 = vpop.f32.mrf.mxu0 }
 0x906   : > { %v8238_v63 = vpop.f32.mrf.mxu0 }
 0x907   : > { %3399 = vmax.xlane.f32.xlu1 %v3398_v41  ;;  %3408 = vmax.xlane.f32.xlu0 %v3407_v32 }
 0x908   : > { %v8240_v34 = vpop.f32.mrf.mxu0 }
 0x90a   : > { %v8246_v26 = vpop.f32.mrf.mxu0 }
 0x90b   : > { %3393 = vmax.xlane.f32.xlu1 %v3392_v28  ;;  %3402 = vmax.xlane.f32.xlu0 %v3401_v36 }
 0x90c   : > { %v8248_v8 = vpop.f32.mrf.mxu0 }
 0x90e   : > { %v8252_v5 = vpop.f32.mrf.mxu0 }
 0x90f   : > { %3396 = vmax.xlane.f32.xlu0 %v3395_v3 }
 0x910   : > { %v8254_v41 = vpop.f32.mrf.mxu0 }
 0x912   : > { %v8256_v32 = vpop.f32.mrf.mxu0 }
 0x914   : > { %v8258_v42 = vpop.f32.mrf.mxu0 }
 0x915   : > { %9757 = vst [vmem:[#allocation50_spill] sm:$0xff] %v8258_v42 }
 0x916   : > { %v8260_v57 = vpop.f32.mrf.mxu0 }
 0x917   : > { %9758 = vst [vmem:[#allocation52_spill] sm:$0xff] %v8260_v57 }
 0x918   : > { %v8262_v12 = vpop.f32.mrf.mxu0 }
 0x919   : > { %9759 = vst [vmem:[#allocation39_spill] sm:$0xff] %v8262_v12 }
 0x91a   : > { %v8264_v28 = vpop.f32.mrf.mxu0 }
 0x91b   : > { %9760 = vst [vmem:[#allocation48_spill] sm:$0xff] %v8264_v28 }
 0x91c   : > { %v8266_v36 = vpop.f32.mrf.mxu0 }
 0x91d   : > { %9761 = vst [vmem:[#allocation51_spill] sm:$0xff] %v8266_v36  ;;  %v3470_v22 = vmax.f32 %v8264_v28, %v8266_v36 }
 0x91e   : > { %v8268_v9 = vpop.f32.mrf.mxu0 }
 0x920   : > { %v8270_v17 = vpop.f32.mrf.mxu0 }
 0x921   : > { %9762 = vst [vmem:[#allocation49_spill] sm:$0xff] %v8270_v17 }
 0x922   : > { %v8272_v6 = vpop.f32.mrf.mxu0 }
 0x924   : > { %v8274_v3 = vpop.f32.mrf.mxu0 }
 0x925   : > { %9763 = vst [vmem:[#allocation47_spill] sm:$0xff] %v8274_v3  ;;  %v3476_v59 = vmax.f32 %v8272_v6, %v8274_v3  ;;  %v3473_v3 = vmax.f32 %v8268_v9, %v8270_v17 }
 0x926   : > { %v8276_v60 = vpop.f32.mrf.mxu0 }
 0x927   : > { %9764 = vst [vmem:[#allocation38_spill] sm:$0xff] %v8276_v60 }
 0x928   : > { %v8278_v49 = vpop.f32.mrf.mxu0 }
 0x929   : > { %9765 = vst [vmem:[#allocation64_spill] sm:$0xff] %v8278_v49  ;;  %v3479_v30 = vmax.f32 %v8276_v60, %v8278_v49 }
 0x92a   : > { %v8280_v62 = vpop.f32.mrf.mxu0 }
 0x92c   : > { %v8282_v0 = vpop.f32.mrf.mxu0 }
 0x92d   : > { %9766 = vst [vmem:[#allocation65_spill] sm:$0xff] %v8282_v0  ;;  %v3482_v23 = vmax.f32 %v8280_v62, %v8282_v0  ;;  %v3464_v0 = vmax.f32 %v8256_v32, %v8258_v42 }
 0x92e   : > { %v8286_v27 = vpop.f32.mrf.mxu0 }
 0x92f   : > { %3483 = vmax.xlane.f32.xlu1 %v3482_v23  ;;  %v3467_v23 = vmax.f32 %v8260_v57, %v8262_v12 }
 0x930   : > { %v8290_v56 = vpop.f32.mrf.mxu0 }
 0x931   : > { %v3485_v15 = vmax.f32 %v8286_v27, %v8290_v56 }
 0x933   : > { %3477 = vmax.xlane.f32.xlu1 %v3476_v59  ;;  %3486 = vmax.xlane.f32.xlu0 %v3485_v15 }
 0x937   : > { %3471 = vmax.xlane.f32.xlu1 %v3470_v22  ;;  %3480 = vmax.xlane.f32.xlu0 %v3479_v30 }
 0x93b   : > { %3465 = vmax.xlane.f32.xlu1 %v3464_v0  ;;  %3474 = vmax.xlane.f32.xlu0 %v3473_v3 }
 0x93f   : > { %3468 = vmax.xlane.f32.xlu0 %v3467_v23 }
 0x978   : > { %v3436_v36 = vpop.xlane.xlu1 %3435 }
 0x979   : > { %v3516_v28 = vsub.f32 %v8184_v61, %v3436_v36  ;;  %v3517_v59 = vsub.f32 %v8186_v52, %v3436_v36 }
 0x97b   : > { %v3608_v15 = vmul.f32 1.442695, %v3516_v28  ;;  %v3610_v49 = vmul.f32 1.442695, %v3517_v59 }
 0x97c   : > { %v3430_v60 = vpop.xlane.xlu1 %3429  ;;  %v3439_v42 = vpop.xlane.xlu0 %3438 }
 0x97d   : > { %6085 = vpow2.f32 %v3608_v15  ;;  %v3512_v17 = vsub.f32 %v8176_v21, %v3430_v60  ;;  %v3513_v22 = vsub.f32 %v8178_v37, %v3430_v60  ;;  %v3518_v30 = vsub.f32 %v8190_v4, %v3439_v42 }
 0x97e   : > { %6087 = vpow2.f32 %v3610_v49  ;;  %v3519_v0 = vsub.f32 %v8192_v39, %v3439_v42 }
 0x97f   : > { %v3600_v3 = vmul.f32 1.442695, %v3512_v17  ;;  %v3602_v23 = vmul.f32 1.442695, %v3513_v22  ;;  %v3612_v12 = vmul.f32 1.442695, %v3518_v30 }
 0x980   : > { %v3614_v61 = vmul.f32 1.442695, %v3519_v0  ;;  %v3424_v57 = vpop.xlane.xlu1 %3423  ;;  %v3433_v52 = vpop.xlane.xlu0 %3432 }
 0x981   : > { %6089 = vpow2.f32 %v3600_v3  ;;  %v3514_v28 = vsub.f32 %v8180_v33, %v3433_v52  ;;  %v3515_v36 = vsub.f32 %v8182_v35, %v3433_v52  ;;  %v3508_v60 = vsub.f32 %v8168_v51, %v3424_v57 }
 0x982   : > { %6091 = vpow2.f32 %v3602_v23  ;;  %v3509_v49 = vsub.f32 %v8170_v10, %v3424_v57 }
 0x983   : > { %6093 = vpow2.f32 %v3612_v12  ;;  %v3604_v17 = vmul.f32 1.442695, %v3514_v28  ;;  %v3606_v37 = vmul.f32 1.442695, %v3515_v36  ;;  %v3592_v4 = vmul.f32 1.442695, %v3508_v60 }
 0x984   : > { %6095 = vpow2.f32 %v3614_v61  ;;  %v3418_v21 = vpop.xlane.xlu1 %3417  ;;  %v3427_v42 = vpop.xlane.xlu0 %3426  ;;  %v3594_v39 = vmul.f32 1.442695, %v3509_v49  ;;  %v3458_v61 = vmax.f32 %v8246_v26, %v8248_v8 }
 0x985   : > { %6097 = vpow2.f32 %v3604_v17  ;;  %v3510_v59 = vsub.f32 %v8172_v40, %v3427_v42  ;;  %v3511_v33 = vsub.f32 %v8174_v20, %v3427_v42  ;;  %v3504_v57 = vsub.f32 %v8160_v16, %v3418_v21 }
 0x986   : > { %6099 = vpow2.f32 %v3606_v37  ;;  %v3505_v10 = vsub.f32 %v8162_v44, %v3418_v21 }
 0x987   : > { %6101 = vpow2.f32 %v3592_v4  ;;  %v3596_v30 = vmul.f32 1.442695, %v3510_v59  ;;  %v3598_v0 = vmul.f32 1.442695, %v3511_v33  ;;  %v3584_v20 = vmul.f32 1.442695, %v3504_v57 }
 0x988   : > { %v3412_v12 = vpop.xlane.xlu1 %3411  ;;  %v3421_v35 = vpop.xlane.xlu0 %3420  ;;  %6103 = vpow2.f32 %v3594_v39  ;;  %v3586_v16 = vmul.f32 1.442695, %v3505_v10 }
 0x989   : > { %6105 = vpow2.f32 %v3596_v30  ;;  %v3506_v36 = vsub.f32 %v8164_v31, %v3421_v35  ;;  %v3507_v60 = vsub.f32 %v8166_v24, %v3421_v35  ;;  %v3500_v21 = vsub.f32 %v8152_v50, %v3412_v12 }
 0x98a   : > { %v8315_v15 = vpop.eup %6085  ;;  %6107 = vpow2.f32 %v3598_v0  ;;  %v3501_v42 = vsub.f32 %v8154_v55, %v3412_v12  ;;  %v3461_v31 = vmax.f32 %v8252_v5, %v8254_v41  ;;  %v3452_v12 = vmax.f32 %v8230_v48, %v8232_v1 }
 0x98b   : > { %v8318_v51 = vpop.eup %6087  ;;  %6109 = vpow2.f32 %v3584_v20  ;;  %v3588_v37 = vmul.f32 1.442695, %v3506_v36  ;;  %v3590_v24 = vmul.f32 1.442695, %v3507_v60  ;;  %v3576_v50 = vmul.f32 1.442695, %v3500_v21 }
 0x98c   : > { %v3722_v22 = vadd.f32 %v8318_v51, %v8315_v15  ;;  %v3406_v52 = vpop.xlane.xlu1 %3405  ;;  %v3415_v28 = vpop.xlane.xlu0 %3414  ;;  %6111 = vpow2.f32 %v3586_v16  ;;  %v3578_v57 = vmul.f32 1.442695, %v3501_v42 }
 0x98d   : > { %v3496_v35 = vsub.f32 %v8144_v19, %v3406_v52  ;;  %v3497_v10 = vsub.f32 %v8146_v13, %v3406_v52  ;;  %6113 = vpow2.f32 %v3588_v37  ;;  %v3502_v30 = vsub.f32 %v8156_v29, %v3415_v28 }
 0x98e   : > { %v8324_v40 = vpop.eup %6089  ;;  %3723 = vadd.xlane.f32.xlu1 %v3722_v22  ;;  %6115 = vpow2.f32 %v3590_v24  ;;  %v3503_v0 = vsub.f32 %v8158_v43, %v3415_v28 }
 0x98f   : > { %v8326_v3 = vpop.eup %6091  ;;  %6117 = vpow2.f32 %v3576_v50  ;;  %v3568_v20 = vmul.f32 1.442695, %v3496_v35  ;;  %v3570_v16 = vmul.f32 1.442695, %v3497_v10  ;;  %v3580_v60 = vmul.f32 1.442695, %v3502_v30 }
 0x990   : > { %v8328_v23 = vpop.eup %6093  ;;  %v3716_v17 = vadd.f32 %v8326_v3, %v8324_v40  ;;  %v3400_v39 = vpop.xlane.xlu1 %3399  ;;  %6119 = vpow2.f32 %v3578_v57  ;;  %v3582_v21 = vmul.f32 1.442695, %v3503_v0 }
 0x991   : > { %v8332_v44 = vpop.eup %6095  ;;  %v3409_v59 = vpop.xlane.xlu0 %3408  ;;  %v3493_v13 = vsub.f32 %v8138_v47, %v3400_v39  ;;  %6121 = vpow2.f32 %v3568_v20  ;;  %v9767_v20 = vld [vmem:[#allocation44_spill] sm:$0xff] }
 0x992   : > { %3459 = vmax.xlane.f32.xlu1 %v3458_v61  ;;  %v3725_v49 = vadd.f32 %v8332_v44, %v8328_v23  ;;  %v8342_v4 = vpop.eup %6097  ;;  %v3492_v61 = vsub.f32 %v8136_v46, %v3400_v39  ;;  %v3498_v43 = vsub.f32 %v8148_v11, %v3409_v59  ;;  %v3499_v46 = vsub.f32 %v8150_v38, %v3409_v59 }
 0x993   : > { %v8346_v33 = vpop.eup %6099  ;;  %v3446_v11 = vmax.f32 %v8214_v54, %v8216_v58  ;;  %6123 = vpow2.f32 %v3570_v16 }
 0x994   : > { %3726 = vadd.xlane.f32.xlu0 %v3725_v49  ;;  %v8349_v55 = vpop.eup %6101  ;;  %v3719_v19 = vadd.f32 %v8346_v33, %v8342_v4  ;;  %v3394_v52 = vpop.xlane.xlu1 %3393  ;;  %v3455_v49 = vmax.f32 %v8238_v63, %v8240_v34  ;;  %v3560_v47 = vmul.f32 1.442695, %v3492_v61  ;;  %6125 = vpow2.f32 %v3580_v60 }
 0x995   : > { %v8354_v22 = vpop.eup %6103  ;;  %v3403_v36 = vpop.xlane.xlu0 %3402  ;;  %v3489_v24 = vsub.f32 %v8130_v2, %v3394_v52  ;;  %v3572_v38 = vmul.f32 1.442695, %v3498_v43  ;;  %6127 = vpow2.f32 %v3582_v21  ;;  %v3574_v50 = vmul.f32 1.442695, %v3499_v46 }
 0x996   : > { %3717 = vadd.xlane.f32.xlu1 %v3716_v17  ;;  %v3710_v29 = vadd.f32 %v8354_v22, %v8349_v55  ;;  %v8365_v28 = vpop.eup %6105  ;;  %v3488_v17 = vsub.f32 %v8128_v7, %v3394_v52  ;;  %v3494_v59 = vsub.f32 %v8140_v18, %v3403_v36  ;;  %v3495_v7 = vsub.f32 %v8142_v25, %v3403_v36  ;;  %v9768_v52 = vld [vmem:[#allocation59_spill] sm:$0xff]  ;;  %v9769_v36 = vld [vmem:[#allocation58_spill] sm:$0xff] }
 0x997   : > { %v8370_v42 = vpop.eup %6107  ;;  %6129 = vpow2.f32 %v3560_v47  ;;  %v3554_v2 = vmul.f32 1.442695, %v3489_v24  ;;  %v3449_v25 = vmax.f32 %v8222_v14, %v8224_v53 }
 0x998   : > { %3462 = vmax.xlane.f32.xlu0 %v3461_v31  ;;  %v8373_v37 = vpop.eup %6109  ;;  %v3562_v31 = vmul.f32 1.442695, %v3493_v13  ;;  %v3552_v57 = vmul.f32 1.442695, %v3488_v17  ;;  %v3564_v30 = vmul.f32 1.442695, %v3494_v59 }
 0x999   : > { %v8378_v39 = vpop.eup %6111  ;;  %v3397_v35 = vpop.xlane.xlu0 %3396 }
 0x99a   : > { %3453 = vmax.xlane.f32.xlu1 %v3452_v12  ;;  %v3713_v12 = vadd.f32 %v8370_v42, %v8365_v28  ;;  %6131 = vpow2.f32 %v3562_v31  ;;  %v3704_v10 = vadd.f32 %v8378_v39, %v8373_v37  ;;  %v3490_v18 = vsub.f32 %v8132_v45, %v3397_v35  ;;  %v8387_v0 = vpop.eup %6113  ;;  %v9772_v31 = vld [vmem:[#allocation37_spill] sm:$0xff] }
 0x99b   : > { %6133 = vpow2.f32 %v3572_v38  ;;  %v3491_v61 = vsub.f32 %v9767_v20, %v3397_v35  ;;  %v8392_v16 = vpop.eup %6115 }
 0x99c   : > { %3720 = vadd.xlane.f32.xlu0 %v3719_v19  ;;  %6135 = vpow2.f32 %v3574_v50  ;;  %v3566_v19 = vmul.f32 1.442695, %v3495_v7  ;;  %v8394_v13 = vpop.eup %6117  ;;  %v3556_v60 = vmul.f32 1.442695, %v3490_v18 }
 0x99d   : > { %6137 = vpow2.f32 %v3552_v57  ;;  %v8398_v45 = vpop.eup %6119  ;;  %v3558_v43 = vmul.f32 1.442695, %v3491_v61 }
 0x99e   : > { %3711 = vadd.xlane.f32.xlu1 %v3710_v29  ;;  %v3440_v29 = vmax.f32 %v9769_v36, %v9768_v52  ;;  %6139 = vpow2.f32 %v3554_v2  ;;  %v8402_v21 = vpop.eup %6121  ;;  %v3698_v46 = vadd.f32 %v8398_v45, %v8394_v13 }
 0x99f   : > { %6141 = vpow2.f32 %v3564_v30  ;;  %9770 = vst [vmem:[#allocation44_spill] sm:$0xff] %v8402_v21 }
 0x9a0   : > { %3456 = vmax.xlane.f32.xlu0 %v3455_v49  ;;  %6143 = vpow2.f32 %v3566_v19  ;;  %v3707_v49 = vadd.f32 %v8392_v16, %v8387_v0  ;;  %v8406_v47 = vpop.eup %6123 }
 0x9a1   : > { %6145 = vpow2.f32 %v3556_v60  ;;  %v8408_v17 = vpop.eup %6125  ;;  %v3692_v50 = vadd.f32 %v8406_v47, %v8402_v21  ;;  %v9778_v60 = vld [vmem:[#allocation65_spill] sm:$0xff]  ;;  %v9782_v21 = vld [vmem:[#allocation51_spill] sm:$0xff] }
 0x9a2   : > { %3447 = vmax.xlane.f32.xlu1 %v3446_v11  ;;  %v9771_v11 = vld [vmem:[#allocation40_spill] sm:$0xff]  ;;  %6147 = vpow2.f32 %v3558_v43  ;;  %v8412_v38 = vpop.eup %6127 }
 0x9a3   : > { %v3443_v24 = vmax.f32 %v9772_v31, %v9771_v11 }
 0x9a4   : > { %3714 = vadd.xlane.f32.xlu0 %v3713_v12  ;;  %v8414_v59 = vpop.eup %6129  ;;  %v3701_v12 = vadd.f32 %v8412_v38, %v8408_v17 }
 0x9a5   : > { %9773 = vst [vmem:[#allocation59_spill] sm:$0xff] %v8414_v59 }
 0x9a6   : > { %3705 = vadd.xlane.f32.xlu1 %v3704_v10 }
 0x9a7   : > { %v8418_v7 = vpop.eup %6131 }
 0x9a8   : > { %3450 = vmax.xlane.f32.xlu0 %v3449_v25  ;;  %9774 = vst [vmem:[#allocation58_spill] sm:$0xff] %v8418_v7  ;;  %v8420_v35 = vpop.eup %6133  ;;  %v3686_v10 = vadd.f32 %v8418_v7, %v8414_v59 }
 0x9a9   : > { %v8424_v57 = vpop.eup %6135 }
 0x9aa   : > { %3441 = vmax.xlane.f32.xlu1 %v3440_v29  ;;  %v8426_v2 = vpop.eup %6137  ;;  %v3695_v25 = vadd.f32 %v8424_v57, %v8420_v35 }
 0x9ab   : > { %9775 = vst [vmem:[#allocation40_spill] sm:$0xff] %v8426_v2  ;;  %v8430_v30 = vpop.eup %6139 }
 0x9ac   : > { %3708 = vadd.xlane.f32.xlu0 %v3707_v49  ;;  %9776 = vst [vmem:[#allocation37_spill] sm:$0xff] %v8430_v30  ;;  %v8432_v18 = vpop.eup %6141  ;;  %v3680_v61 = vadd.f32 %v8430_v30, %v8426_v2  ;;  %v9780_v30 = vld [vmem:[#allocation47_spill] sm:$0xff] }
 0x9ad   : > { %9777 = vst [vmem:[#allocation66_spill] sm:$0xff] %v8432_v18  ;;  %v8436_v19 = vpop.eup %6143 }
 0x9ae   : > { %3699 = vadd.xlane.f32.xlu1 %v3698_v46  ;;  %v8442_v49 = vpop.eup %6145  ;;  %v3689_v46 = vadd.f32 %v8436_v19, %v8432_v18 }
 0x9af   : > { %9779 = vst [vmem:[#allocation65_spill] sm:$0xff] %v8442_v49 }
 0x9b0   : > { %3444 = vmax.xlane.f32.xlu0 %v3443_v24  ;;  %v8446_v24 = vpop.eup %6147 }
 0x9b2   : > { %3693 = vadd.xlane.f32.xlu1 %v3692_v50 }
 0x9b4   : > { %3702 = vadd.xlane.f32.xlu0 %v3701_v12 }
 0x9b6   : > { %3687 = vadd.xlane.f32.xlu1 %v3686_v10 }
 0x9b8   : > { %3696 = vadd.xlane.f32.xlu0 %v3695_v25  ;;  %v3484_v20 = vpop.xlane.xlu1 %3483 }
 0x9b9   : > { %v3548_v29 = vsub.f32 %v8280_v62, %v3484_v20  ;;  %v3549_v43 = vsub.f32 %v9778_v60, %v3484_v20  ;;  %v3683_v60 = vadd.f32 %v8446_v24, %v8442_v49 }
 0x9ba   : > { %3681 = vadd.xlane.f32.xlu1 %v3680_v61 }
 0x9bb   : > { %v3672_v50 = vmul.f32 1.442695, %v3548_v29  ;;  %v3674_v12 = vmul.f32 1.442695, %v3549_v43 }
 0x9bc   : > { %3690 = vadd.xlane.f32.xlu0 %v3689_v46  ;;  %v3478_v10 = vpop.xlane.xlu1 %3477  ;;  %v3487_v25 = vpop.xlane.xlu0 %3486 }
 0x9bd   : > { %6149 = vpow2.f32 %v3672_v50  ;;  %v3544_v2 = vsub.f32 %v8272_v6, %v3478_v10  ;;  %v3545_v62 = vsub.f32 %v9780_v30, %v3478_v10  ;;  %v3550_v20 = vsub.f32 %v8286_v27, %v3487_v25  ;;  %v9781_v50 = vld [vmem:[#allocation48_spill] sm:$0xff]  ;;  %v9783_v10 = vld [vmem:[#allocation38_spill] sm:$0xff] }
 0x9be   : > { %6151 = vpow2.f32 %v3674_v12  ;;  %v3551_v61 = vsub.f32 %v8290_v56, %v3487_v25  ;;  %v9784_v12 = vld [vmem:[#allocation64_spill] sm:$0xff] }
 0x9bf   : > { %v3664_v59 = vmul.f32 1.442695, %v3544_v2  ;;  %v3666_v18 = vmul.f32 1.442695, %v3545_v62  ;;  %v3676_v29 = vmul.f32 1.442695, %v3550_v20 }
 0x9c0   : > { %v3678_v43 = vmul.f32 1.442695, %v3551_v61  ;;  %3684 = vadd.xlane.f32.xlu0 %v3683_v60  ;;  %v3472_v46 = vpop.xlane.xlu1 %3471  ;;  %v3481_v7 = vpop.xlane.xlu0 %3480  ;;  %v9785_v60 = vld [vmem:[#allocation50_spill] sm:$0xff] }
 0x9c1   : > { %6153 = vpow2.f32 %v3664_v59  ;;  %v3540_v6 = vsub.f32 %v9781_v50, %v3472_v46  ;;  %v3541_v30 = vsub.f32 %v9782_v21, %v3472_v46  ;;  %v3546_v27 = vsub.f32 %v9783_v10, %v3481_v7  ;;  %v9786_v46 = vld [vmem:[#allocation49_spill] sm:$0xff]  ;;  %v9787_v10 = vld [vmem:[#allocation52_spill] sm:$0xff] }
 0x9c2   : > { %6155 = vpow2.f32 %v3666_v18  ;;  %v3547_v56 = vsub.f32 %v9784_v12, %v3481_v7  ;;  %v9788_v12 = vld [vmem:[#allocation39_spill] sm:$0xff] }
 0x9c3   : > { %6157 = vpow2.f32 %v3676_v29  ;;  %v3656_v25 = vmul.f32 1.442695, %v3540_v6  ;;  %v3658_v49 = vmul.f32 1.442695, %v3541_v30  ;;  %v3668_v2 = vmul.f32 1.442695, %v3546_v27 }
 0x9c4   : > { %6159 = vpow2.f32 %v3678_v43  ;;  %v3670_v62 = vmul.f32 1.442695, %v3547_v56  ;;  %v3466_v20 = vpop.xlane.xlu1 %3465  ;;  %v3475_v61 = vpop.xlane.xlu0 %3474 }
 0x9c5   : > { %6161 = vpow2.f32 %v3656_v25  ;;  %v3536_v59 = vsub.f32 %v8256_v32, %v3466_v20  ;;  %v3537_v50 = vsub.f32 %v9785_v60, %v3466_v20  ;;  %v3542_v21 = vsub.f32 %v8268_v9, %v3475_v61 }
 0x9c6   : > { %6163 = vpow2.f32 %v3658_v49  ;;  %v3543_v18 = vsub.f32 %v9786_v46, %v3475_v61 }
 0x9c7   : > { %6165 = vpow2.f32 %v3668_v2  ;;  %v3648_v7 = vmul.f32 1.442695, %v3536_v59  ;;  %v3650_v29 = vmul.f32 1.442695, %v3537_v50  ;;  %v3660_v6 = vmul.f32 1.442695, %v3542_v21 }
 0x9c8   : > { %6167 = vpow2.f32 %v3670_v62  ;;  %v3662_v30 = vmul.f32 1.442695, %v3543_v18  ;;  %v3469_v43 = vpop.xlane.xlu0 %3468 }
 0x9c9   : > { %6169 = vpow2.f32 %v3648_v7  ;;  %v3538_v27 = vsub.f32 %v9787_v10, %v3469_v43  ;;  %v3539_v56 = vsub.f32 %v9788_v12, %v3469_v43 }
 0x9ca   : > { %v8464_v32 = vpop.eup %6149  ;;  %6171 = vpow2.f32 %v3650_v29 }
 0x9cb   : > { %v8466_v25 = vpop.eup %6151  ;;  %6173 = vpow2.f32 %v3660_v6  ;;  %v3652_v9 = vmul.f32 1.442695, %v3538_v27  ;;  %v3654_v49 = vmul.f32 1.442695, %v3539_v56 }
 0x9cc   : > { %6175 = vpow2.f32 %v3662_v30  ;;  %v3770_v2 = vadd.f32 %v8466_v25, %v8464_v32 }
 0x9cd   : > { %6177 = vpow2.f32 %v3652_v9 }
 0x9ce   : > { %v8470_v62 = vpop.eup %6153  ;;  %6179 = vpow2.f32 %v3654_v49  ;;  %3771 = vadd.xlane.f32.xlu1 %v3770_v2 }
 0x9cf   : > { %v8472_v20 = vpop.eup %6155 }
 0x9d0   : > { %v8474_v61 = vpop.eup %6157  ;;  %v3764_v59 = vadd.f32 %v8472_v20, %v8470_v62 }
 0x9d1   : > { %v8478_v60 = vpop.eup %6159 }
 0x9d2   : > { %v8480_v50 = vpop.eup %6161  ;;  %3765 = vadd.xlane.f32.xlu1 %v3764_v59  ;;  %v3773_v21 = vadd.f32 %v8478_v60, %v8474_v61 }
 0x9d3   : > { %9789 = vst [vmem:[#allocation47_spill] sm:$0xff] %v8480_v50  ;;  %v8484_v46 = vpop.eup %6163 }
 0x9d4   : > { %9790 = vst [vmem:[#allocation48_spill] sm:$0xff] %v8484_v46  ;;  %v8486_v18 = vpop.eup %6165  ;;  %3774 = vadd.xlane.f32.xlu0 %v3773_v21  ;;  %v3758_v7 = vadd.f32 %v8484_v46, %v8480_v50 }
 0x9d5   : > { %v8490_v29 = vpop.eup %6167 }
 0x9d6   : > { %v8492_v6 = vpop.eup %6169  ;;  %3759 = vadd.xlane.f32.xlu1 %v3758_v7  ;;  %v3767_v30 = vadd.f32 %v8490_v29, %v8486_v18 }
 0x9d7   : > { %9791 = vst [vmem:[#allocation51_spill] sm:$0xff] %v8492_v6  ;;  %v8496_v43 = vpop.eup %6171 }
 0x9d8   : > { %9792 = vst [vmem:[#allocation38_spill] sm:$0xff] %v8496_v43  ;;  %v8498_v10 = vpop.eup %6173  ;;  %3768 = vadd.xlane.f32.xlu0 %v3767_v30  ;;  %v3752_v27 = vadd.f32 %v8496_v43, %v8492_v6 }
 0x9d9   : > { %9793 = vst [vmem:[#allocation64_spill] sm:$0xff] %v8498_v10  ;;  %v8502_v12 = vpop.eup %6175 }
 0x9da   : > { %v8504_v56 = vpop.eup %6177  ;;  %3753 = vadd.xlane.f32.xlu1 %v3752_v27  ;;  %v3761_v9 = vadd.f32 %v8502_v12, %v8498_v10 }
 0x9db   : > { %9794 = vst [vmem:[#allocation50_spill] sm:$0xff] %v8504_v56  ;;  %v8508_v49 = vpop.eup %6179 }
 0x9dc   : > { %9795 = vst [vmem:[#allocation49_spill] sm:$0xff] %v8508_v49  ;;  %3762 = vadd.xlane.f32.xlu0 %v3761_v9  ;;  %v3755_v2 = vadd.f32 %v8508_v49, %v8504_v56 }
 0x9e0   : > { %3756 = vadd.xlane.f32.xlu0 %v3755_v2 }
 0xa17   : > { %v3724_v59 = vpop.xlane.xlu1 %3723 }
 0xa18   : > { %6181 = vrcp.f32 %v3724_v59 }
 0xa1b   : > { %v3460_v21 = vpop.xlane.xlu1 %3459 }
 0xa1c   : > { %v3532_v7 = vsub.f32 %v8246_v26, %v3460_v21  ;;  %v3533_v30 = vsub.f32 %v8248_v8, %v3460_v21 }
 0xa1d   : > { %v3727_v6 = vpop.xlane.xlu0 %3726 }
 0xa1e   : > { %v3640_v43 = vmul.f32 1.442695, %v3532_v7  ;;  %v3642_v27 = vmul.f32 1.442695, %v3533_v30  ;;  %6183 = vrcp.f32 %v3727_v6 }
 0xa1f   : > { %v3718_v50 = vpop.xlane.xlu1 %3717 }
 0xa20   : > { %6185 = vpow2.f32 %v3640_v43 }
 0xa21   : > { %6187 = vpow2.f32 %v3642_v27  ;;  %v3463_v10 = vpop.xlane.xlu0 %3462 }
 0xa22   : > { %v3534_v9 = vsub.f32 %v8252_v5, %v3463_v10  ;;  %v3535_v56 = vsub.f32 %v8254_v41, %v3463_v10  ;;  %6189 = vrcp.f32 %v3718_v50 }
 0xa23   : > { %v3454_v2 = vpop.xlane.xlu1 %3453 }
 0xa24   : > { %v3644_v49 = vmul.f32 1.442695, %v3534_v9  ;;  %v3646_v59 = vmul.f32 1.442695, %v3535_v56  ;;  %v3528_v46 = vsub.f32 %v8230_v48, %v3454_v2  ;;  %v3529_v26 = vsub.f32 %v8232_v1, %v3454_v2 }
 0xa25   : > { %v3721_v8 = vpop.xlane.xlu0 %3720  ;;  %v6182_v7 = vpop.eup %6181 }
 0xa26   : > { %6191 = vpow2.f32 %v3644_v49  ;;  %v3632_v21 = vmul.f32 1.442695, %v3528_v46  ;;  %v3634_v6 = vmul.f32 1.442695, %v3529_v26  ;;  %v3837_v1 = vmul.f32 %v6182_v7, %v8318_v51 }
 0xa27   : > { %6193 = vpow2.f32 %v3646_v59  ;;  %v3712_v43 = vpop.xlane.xlu1 %3711 }
 0xa28   : > { %6195 = vpow2.f32 %v3632_v21 }
 0xa29   : > { %6197 = vpow2.f32 %v3634_v6  ;;  %v3457_v5 = vpop.xlane.xlu0 %3456 }
 0xa2a   : > { %6199 = vrcp.f32 %v3721_v8  ;;  %v3530_v41 = vsub.f32 %v8238_v63, %v3457_v5  ;;  %v3531_v10 = vsub.f32 %v8240_v34, %v3457_v5  ;;  %v3836_v63 = vmul.f32 %v6182_v7, %v8315_v15 }
 0xa2b   : > { %v6184_v56 = vpop.eup %6183  ;;  %v3448_v48 = vpop.xlane.xlu1 %3447  ;;  %6201 = vrcp.f32 %v3712_v43 }
 0xa2c   : > { %v3636_v50 = vmul.f32 1.442695, %v3530_v41  ;;  %v3638_v30 = vmul.f32 1.442695, %v3531_v10  ;;  %v3524_v46 = vsub.f32 %v8214_v54, %v3448_v48  ;;  %v3525_v49 = vsub.f32 %v8216_v58, %v3448_v48 }
 0xa2d   : > { %v8523_v27 = vpop.eup %6185  ;;  %v3715_v9 = vpop.xlane.xlu0 %3714  ;;  %v3839_v2 = vmul.f32 %v6184_v56, %v8332_v44  ;;  %v3838_v34 = vmul.f32 %v6184_v56, %v8328_v23 }
 0xa2e   : > { %v8528_v59 = vpop.eup %6187  ;;  %6203 = vpow2.f32 %v3636_v50  ;;  %v3624_v51 = vmul.f32 1.442695, %v3524_v46  ;;  %v3626_v26 = vmul.f32 1.442695, %v3525_v49 }
 0xa2f   : > { %6205 = vpow2.f32 %v3638_v30  ;;  %v3887_v8 = vpack.c.bf16 %v3839_v2, %v3837_v1  ;;  %v3706_v54 = vpop.xlane.xlu1 %3705  ;;  %v3886_v21 = vpack.c.bf16 %v3838_v34, %v3836_v63  ;;  %v3746_v58 = vadd.f32 %v8528_v59, %v8523_v27  ;;  %v6190_v15 = vpop.eup %6189 }
 0xa30   : > { %6207 = vpow2.f32 %v3624_v51  ;;  %v3832_v63 = vmul.f32 %v6190_v15, %v8324_v40 }
 0xa31   : > { %6209 = vpow2.f32 %v3626_v26  ;;  %3924 = vmatprep.subr.bf16.mxu1 %v3887_v8  ;;  %v3451_v44 = vpop.xlane.xlu0 %3450  ;;  %3747 = vadd.xlane.f32.xlu1 %v3746_v58 }
 0xa32   : > { %6211 = vrcp.f32 %v3715_v9  ;;  %3925 = vmatpush1.bf16.xpose.msra.mxu1 %v3886_v21  ;;  %v3526_v23 = vsub.f32 %v8222_v14, %v3451_v44  ;;  %v3527_v6 = vsub.f32 %v8224_v53, %v3451_v44  ;;  %v3833_v9 = vmul.f32 %v6190_v15, %v8326_v3 }
 0xa33   : > { %v8534_v43 = vpop.eup %6191  ;;  %v3442_v7 = vpop.xlane.xlu1 %3441  ;;  %6213 = vrcp.f32 %v3706_v54 }
 0xa34   : > { %v8536_v5 = vpop.eup %6193  ;;  %v3628_v41 = vmul.f32 1.442695, %v3526_v23  ;;  %v3630_v10 = vmul.f32 1.442695, %v3527_v6  ;;  %v3520_v56 = vsub.f32 %v9769_v36, %v3442_v7  ;;  %v3521_v48 = vsub.f32 %v9768_v52, %v3442_v7 }
 0xa35   : > { %v8540_v1 = vpop.eup %6195  ;;  %v3709_v50 = vpop.xlane.xlu0 %3708  ;;  %v3749_v14 = vadd.f32 %v8536_v5, %v8534_v43 }
 0xa36   : > { %v8544_v30 = vpop.eup %6197  ;;  %6215 = vpow2.f32 %v3628_v41  ;;  %v3616_v53 = vmul.f32 1.442695, %v3520_v56  ;;  %v3618_v46 = vmul.f32 1.442695, %v3521_v48 }
 0xa37   : > { %v6200_v49 = vpop.eup %6199  ;;  %6217 = vpow2.f32 %v3630_v10  ;;  %3750 = vadd.xlane.f32.xlu0 %v3749_v14  ;;  %v3700_v36 = vpop.xlane.xlu1 %3699  ;;  %v3740_v52 = vadd.f32 %v8544_v30, %v8540_v1 }
 0xa38   : > { %6219 = vpow2.f32 %v3616_v53  ;;  %v3835_v2 = vmul.f32 %v6200_v49, %v8346_v33  ;;  %v3834_v34 = vmul.f32 %v6200_v49, %v8342_v4  ;;  %v6202_v26 = vpop.eup %6201 }
 0xa39   : > { %6221 = vpow2.f32 %v3618_v46  ;;  %v3445_v51 = vpop.xlane.xlu0 %3444  ;;  %3741 = vadd.xlane.f32.xlu1 %v3740_v52  ;;  %v3828_v56 = vmul.f32 %v6202_v26, %v8349_v55 }
 0xa3a   : > { %6223 = vrcp.f32 %v3709_v50  ;;  %v3885_v8 = vpack.c.bf16 %v3835_v2, %v3833_v9  ;;  %v3884_v54 = vpack.c.bf16 %v3834_v34, %v3832_v63  ;;  %v3522_v3 = vsub.f32 %v9772_v31, %v3445_v51 }
 0xa3b   : > { %v8553_v21 = vpop.eup %6203  ;;  %v3523_v58 = vsub.f32 %v9771_v11, %v3445_v51  ;;  %v3694_v44 = vpop.xlane.xlu1 %3693  ;;  %6225 = vrcp.f32 %v3700_v36  ;;  %v3829_v11 = vmul.f32 %v6202_v26, %v8354_v22 }
 0xa3c   : > { %v8556_v23 = vpop.eup %6205  ;;  %3926 = vmatprep.subr.bf16.mxu1 %v3885_v8  ;;  %v3620_v40 = vmul.f32 1.442695, %v3522_v3  ;;  %6227 = vrcp.f32 %v3694_v44 }
 0xa3d   : > { %v8558_v4 = vpop.eup %6207  ;;  %3927 = vmatpush1.bf16.xpose.msra.mxu1 %v3884_v54  ;;  %v3622_v33 = vmul.f32 1.442695, %v3523_v58  ;;  %v3703_v15 = vpop.xlane.xlu0 %3702  ;;  %v3743_v6 = vadd.f32 %v8556_v23, %v8553_v21 }
 0xa3e   : > { %v8562_v31 = vpop.eup %6209  ;;  %6229 = vpow2.f32 %v3620_v40 }
 0xa3f   : > { %v6212_v7 = vpop.eup %6211  ;;  %6231 = vpow2.f32 %v3622_v33  ;;  %3744 = vadd.xlane.f32.xlu0 %v3743_v6  ;;  %v3734_v41 = vadd.f32 %v8562_v31, %v8558_v4  ;;  %v3688_v52 = vpop.xlane.xlu1 %3687 }
 0xa40   : > { %6233 = vrcp.f32 %v3703_v15  ;;  %v3831_v10 = vmul.f32 %v6212_v7, %v8370_v42  ;;  %v3830_v48 = vmul.f32 %v6212_v7, %v8365_v28  ;;  %v6214_v14 = vpop.eup %6213 }
 0xa41   : > { %v3697_v50 = vpop.xlane.xlu0 %3696  ;;  %3735 = vadd.xlane.f32.xlu1 %v3734_v41  ;;  %v3825_v2 = vmul.f32 %v6214_v14, %v8378_v39  ;;  %v3824_v51 = vmul.f32 %v6214_v14, %v8373_v37 }
 0xa42   : > { %v3883_v53 = vpack.c.bf16 %v3831_v10, %v3829_v11  ;;  %v3882_v46 = vpack.c.bf16 %v3830_v48, %v3828_v56  ;;  %6235 = vrcp.f32 %v3697_v50 }
 0xa43   : > { %v8570_v49 = vpop.eup %6215  ;;  %v3682_v7 = vpop.xlane.xlu1 %3681 }
 0xa44   : > { %v8572_v9 = vpop.eup %6217  ;;  %3928 = vmatprep.subr.bf16.mxu1 %v3883_v53 }
 0xa45   : > { %v8574_v22 = vpop.eup %6219  ;;  %3929 = vmatpush1.bf16.xpose.msra.mxu1 %v3882_v46  ;;  %v3691_v36 = vpop.xlane.xlu0 %3690  ;;  %v3737_v55 = vadd.f32 %v8572_v9, %v8570_v49 }
 0xa46   : > { %v8578_v42 = vpop.eup %6221  ;;  %6237 = vrcp.f32 %v3691_v36  ;;  %v9797_v36 = vld [vmem:[#allocation58_spill] sm:$0xff] }
 0xa47   : > { %v6224_v28 = vpop.eup %6223  ;;  %3738 = vadd.xlane.f32.xlu0 %v3737_v55  ;;  %v3728_v63 = vadd.f32 %v8578_v42, %v8574_v22  ;;  %6239 = vrcp.f32 %v3688_v52 }
 0xa48   : > { %v3827_v34 = vmul.f32 %v6224_v28, %v8392_v16  ;;  %v3826_v26 = vmul.f32 %v6224_v28, %v8387_v0  ;;  %v6226_v8 = vpop.eup %6225 }
 0xa49   : > { %3729 = vadd.xlane.f32.xlu1 %v3728_v63  ;;  %v6228_v54 = vpop.eup %6227  ;;  %v3685_v33 = vpop.xlane.xlu0 %3684  ;;  %v3821_v37 = vmul.f32 %v6226_v8, %v8398_v45  ;;  %v3820_v11 = vmul.f32 %v6226_v8, %v8394_v13  ;;  %v9796_v13 = vld [vmem:[#allocation44_spill] sm:$0xff] }
 0xa4a   : > { %v3881_v3 = vpack.c.bf16 %v3827_v34, %v3825_v2  ;;  %v3880_v58 = vpack.c.bf16 %v3826_v26, %v3824_v51  ;;  %6241 = vrcp.f32 %v3685_v33  ;;  %v3817_v10 = vmul.f32 %v6228_v54, %v8406_v47  ;;  %v9798_v34 = vld [vmem:[#allocation66_spill] sm:$0xff] }
 0xa4b   : > { %v8586_v44 = vpop.eup %6229  ;;  %6243 = vrcp.f32 %v3682_v7  ;;  %v3816_v46 = vmul.f32 %v6228_v54, %v9796_v13  ;;  %v9800_v54 = vld [vmem:[#allocation37_spill] sm:$0xff] }
 0xa4c   : > { %v8588_v40 = vpop.eup %6231  ;;  %3930 = vmatprep.subr.bf16.mxu1 %v3881_v3 }
 0xa4d   : > { %v6234_v39 = vpop.eup %6233  ;;  %3931 = vmatpush1.bf16.xpose.msra.mxu1 %v3880_v58  ;;  %v3731_v16 = vadd.f32 %v8588_v40, %v8586_v44 }
 0xa4e   : > { %v3823_v0 = vmul.f32 %v6234_v39, %v8412_v38  ;;  %v3822_v15 = vmul.f32 %v6234_v39, %v8408_v17 }
 0xa4f   : > { %v6236_v6 = vpop.eup %6235  ;;  %3732 = vadd.xlane.f32.xlu0 %v3731_v16 }
 0xa50   : > { %v3879_v41 = vpack.c.bf16 %v3823_v0, %v3821_v37  ;;  %v3819_v56 = vmul.f32 %v6236_v6, %v8424_v57  ;;  %v3878_v48 = vpack.c.bf16 %v3822_v15, %v3820_v11  ;;  %v3818_v14 = vmul.f32 %v6236_v6, %v8420_v35  ;;  %v9801_v37 = vld [vmem:[#allocation65_spill] sm:$0xff]  ;;  %v9802_v6 = vld [vmem:[#allocation40_spill] sm:$0xff] }
 0xa52   : > { %3932 = vmatprep.subr.bf16.mxu1 %v3879_v41  ;;  %v3877_v50 = vpack.c.bf16 %v3819_v56, %v3817_v10  ;;  %v3876_v47 = vpack.c.bf16 %v3818_v14, %v3816_v46 }
 0xa53   : > { %v6238_v45 = vpop.eup %6237 }
 0xa54   : > { %v6240_v38 = vpop.eup %6239  ;;  %v3815_v53 = vmul.f32 %v6238_v45, %v8436_v19  ;;  %v3814_v51 = vmul.f32 %v6238_v45, %v9798_v34  ;;  %v9799_v19 = vld [vmem:[#allocation59_spill] sm:$0xff]  ;;  %v9809_v34 = vld [vmem:[#allocation29_spill] sm:$0xff] }
 0xa55   : > { %3933 = vmatpush1.bf16.xpose.msra.mxu1 %v3878_v48  ;;  %v3813_v55 = vmul.f32 %v6240_v38, %v9797_v36  ;;  %v3812_v26 = vmul.f32 %v6240_v38, %v9799_v19  ;;  %v9803_v36 = vld [vmem:[#allocation25_spill] sm:$0xff] }
 0xa56   : > { %3934 = vmatprep.subr.bf16.mxu1 %v3877_v50 }
 0xa57   : > { %v3772_v17 = vpop.xlane.xlu1 %3771  ;;  %v3875_v57 = vpack.c.bf16 %v3815_v53, %v3813_v55  ;;  %v6242_v28 = vpop.eup %6241  ;;  %v3874_v58 = vpack.c.bf16 %v3814_v51, %v3812_v26  ;;  %v9804_v55 = vld [vmem:[#allocation23_spill] sm:$0xff] }
 0xa58   : > { %6245 = vrcp.f32 %v3772_v17  ;;  %v6244_v63 = vpop.eup %6243  ;;  %v3811_v35 = vmul.f32 %v6242_v28, %v8446_v24  ;;  %v3810_v0 = vmul.f32 %v6242_v28, %v9801_v37  ;;  %v9810_v51 = vld [vmem:[#allocation27_spill] sm:$0xff] }
 0xa59   : > { %v3809_v3 = vmul.f32 %v6244_v63, %v9800_v54  ;;  %v3808_v7 = vmul.f32 %v6244_v63, %v9802_v6  ;;  %v9812_v54 = vld [vmem:[#allocation28_spill] sm:$0xff] }
 0xa5b   : > { %v3766_v52 = vpop.xlane.xlu1 %3765  ;;  %v3873_v39 = vpack.c.bf16 %v3811_v35, %v3809_v3  ;;  %v3872_v11 = vpack.c.bf16 %v3810_v0, %v3808_v7  ;;  %v9811_v35 = vpack.c.bf16 %v9809_v34, %v9810_v51  ;;  %v9817_v0 = vld [vmem:[#allocation38_spill] sm:$0xff] }
 0xa5d   : > { %3935 = vmatpush1.bf16.xpose.msra.mxu1 %v3876_v47  ;;  %v3775_v2 = vpop.xlane.xlu0 %3774 }
 0xa5e   : > { %3936 = vmatprep.subr.bf16.mxu1 %v3875_v57  ;;  %6247 = vrcp.f32 %v3775_v2  ;;  %v9808_v2 = vld [vmem:[#allocation48_spill] sm:$0xff] }
 0xa5f   : > { %6249 = vrcp.f32 %v3766_v52  ;;  %v3760_v16 = vpop.xlane.xlu1 %3759  ;;  %v9807_v52 = vld [vmem:[#allocation26_spill] sm:$0xff] }
 0xa61   : > { %v3769_v8 = vpop.xlane.xlu0 %3768 }
 0xa62   : > { %6251 = vrcp.f32 %v3769_v8 }
 0xa63   : > { %v3754_v17 = vpop.xlane.xlu1 %3753 }
 0xa65   : > { %3937 = vmatpush1.bf16.xpose.msra.mxu1 %v3874_v58  ;;  %v3763_v33 = vpop.xlane.xlu0 %3762  ;;  %v6246_v15 = vpop.eup %6245 }
 0xa66   : > { %3938 = vmatprep.subr.bf16.mxu1 %v3873_v39  ;;  %6253 = vrcp.f32 %v3763_v33  ;;  %v3869_v41 = vmul.f32 %v6246_v15, %v8466_v25  ;;  %v3868_v14 = vmul.f32 %v6246_v15, %v8464_v32  ;;  %v9815_v39 = vld [vmem:[#allocation49_spill] sm:$0xff] }
 0xa67   : > { %6255 = vrcp.f32 %v3760_v16  ;;  %v9816_v16 = vld [vmem:[#allocation47_spill] sm:$0xff] }
 0xa69   : > { %v3757_v48 = vpop.xlane.xlu0 %3756 }
 0xa6a   : > { %6257 = vrcp.f32 %v3757_v48 }
 0xa6b   : > { %v6248_v24 = vpop.eup %6247  ;;  %6259 = vrcp.f32 %v3754_v17 }
 0xa6c   : > { %v3871_v10 = vmul.f32 %v6248_v24, %v8478_v60  ;;  %v6250_v56 = vpop.eup %6249  ;;  %v3870_v50 = vmul.f32 %v6248_v24, %v8474_v61  ;;  %v9805_v61 = vpack.c.bf16 %v9803_v36, %v9804_v55  ;;  %v9818_v24 = vld [vmem:[#allocation50_spill] sm:$0xff] }
 0xa6d   : > { %3939 = vmatpush1.bf16.xpose.msra.mxu1 %v3872_v11  ;;  %v3865_v53 = vmul.f32 %v6250_v56, %v8472_v20  ;;  %v3864_v28 = vmul.f32 %v6250_v56, %v8470_v62  ;;  %v9806_v20 = vld [vmem:[#allocation24_spill] sm:$0xff] }
 0xa6e   : > { %v3903_v45 = vpack.c.bf16 %v3871_v10, %v3869_v41  ;;  %v3902_v46 = vpack.c.bf16 %v3870_v50, %v3868_v14  ;;  %v9814_v62 = vld [vmem:[#allocation64_spill] sm:$0xff]  ;;  %v9819_v41 = vld [vmem:[#allocation51_spill] sm:$0xff] }
 0xa6f   : > { %v6252_v38 = vpop.eup %6251 }
 0xa70   : > { %3940 = vmatprep.subr.bf16.mxu1 %v3903_v45  ;;  %v3867_v13 = vmul.f32 %v6252_v38, %v8490_v29  ;;  %v3866_v57 = vmul.f32 %v6252_v38, %v8486_v18  ;;  %v5600_v29 = vpack.c.bf16 %v9807_v52, %v9806_v20  ;;  %v9813_v18 = vld [vmem:[#allocation30_spill] sm:$0xff] }
 0xa71   : > { %v5602_v3 = vpack.c.bf16 %v9813_v18, %v9812_v54  ;;  %v9820_v18 = vld [vmem:[#allocation57_spill] sm:$0xff] }
 0xa72   : > { %v3901_v25 = vpack.c.bf16 %v3867_v13, %v3865_v53  ;;  %v3900_v19 = vpack.c.bf16 %v3866_v57, %v3864_v28 }
 0xa73   : > { %v6254_v60 = vpop.eup %6253 }
 0xa74   : > { %v6256_v47 = vpop.eup %6255  ;;  %v3863_v32 = vmul.f32 %v6254_v60, %v8502_v12  ;;  %v3862_v58 = vmul.f32 %v6254_v60, %v9814_v62 }
 0xa75   : > { %3941 = vmatpush2.bf16.xpose.msra.mxu1 %v3902_v46  ;;  %v3861_v63 = vmul.f32 %v6256_v47, %v9808_v2  ;;  %v3860_v37 = vmul.f32 %v6256_v47, %v9816_v16  ;;  %v9831_v16 = vld [vmem:[#allocation32_spill] sm:$0xff] }
 0xa76   : > { %3942 = vmatprep.subr.bf16.mxu1 %v3901_v25  ;;  %4048 = vxpose.xlu1.c.b16.start [1/2] (short) %v9805_v61, 128 }
 0xa77   : > { %v3899_v26 = vpack.c.bf16 %v3863_v32, %v3861_v63  ;;  %v6258_v8 = vpop.eup %6257  ;;  %v3898_v6 = vpack.c.bf16 %v3862_v58, %v3860_v37  ;;  %v9824_v58 = vld [vmem:[#allocation42_spill] sm:$0xff] }
 0xa78   : > { %v6260_v12 = vpop.eup %6259  ;;  %v3859_v33 = vmul.f32 %v6258_v8, %v9815_v39  ;;  %v3858_v11 = vmul.f32 %v6258_v8, %v9818_v24  ;;  %v9825_v39 = vld [vmem:[#allocation41_spill] sm:$0xff]  ;;  %v9837_v24 = vld [vmem:[#allocation63_spill] sm:$0xff] }
 0xa79   : > { %v3857_v15 = vmul.f32 %v6260_v12, %v9817_v0  ;;  %v3856_v10 = vmul.f32 %v6260_v12, %v9819_v41  ;;  %v9823_v12 = vld [vmem:[#allocation56_spill] sm:$0xff]  ;;  %v9833_v0 = vld [vmem:[#allocation55_spill] sm:$0xff]  ;;  %v9839_v41 = vmov 0  }
 0xa7a   : > { %4049 = vxpose.xlu1.c.b16.end [2/2] (short) %v9811_v35, 128 }
 0xa7b   : > { %v3897_v7 = vpack.c.bf16 %v3859_v33, %v3857_v15  ;;  %v3896_v56 = vpack.c.bf16 %v3858_v11, %v3856_v10  ;;  %v9828_v33 = vld [vmem:[#allocation43_spill] sm:$0xff]  ;;  %v9834_v15 = vld [vmem:[#allocation53_spill] sm:$0xff] }
 0xa7c   : > { %4064 = vxpose.xlu0.c.b16.start [1/2] (short) %v5600_v29, 128 }
 0xa7d   : > { %3943 = vmatpush2.bf16.xpose.msra.mxu1 %v3900_v19 }
 0xa7e   : > { %3944 = vmatprep.subr.bf16.mxu1 %v3899_v26 }
 0xa80   : > { %4065 = vxpose.xlu0.c.b16.end [2/2] (short) %v5602_v3, 128 }
 0xa85   : > { %3945 = vmatpush2.bf16.xpose.msra.mxu1 %v3898_v6  ;;  %v9835_v6 = vpack.c.bf16 %v9833_v0, %v9834_v15 }
 0xa86   : > { %3946 = vmatprep.subr.bf16.mxu1 %v3897_v7  ;;  %v9836_v7 = vld [vmem:[#allocation13_spill] sm:$0xff] }
 0xa87   : > { %v9838_v11 = vpack.c.bf16 %v9836_v7, %v9837_v24 }
 0xa8d   : > { %3947 = vmatpush2.bf16.xpose.msra.mxu1 %v3896_v56 }
 0xaba   : > { %v3748_v48 = vpop.xlane.xlu1 %3747 }
 0xabb   : > { %6261 = vrcp.f32 %v3748_v48 }
 0xac0   : > { %v3751_v50 = vpop.xlane.xlu0 %3750 }
 0xac1   : > { %6263 = vrcp.f32 %v3751_v50 }
 0xac2   : > { %v3742_v45 = vpop.xlane.xlu1 %3741 }
 0xac3   : > { %6265 = vrcp.f32 %v3742_v45 }
 0xac8   : > { %v3745_v38 = vpop.xlane.xlu0 %3744  ;;  %v6262_v17 = vpop.eup %6261 }
 0xac9   : > { %6267 = vrcp.f32 %v3745_v38  ;;  %v3853_v13 = vmul.f32 %v6262_v17, %v8528_v59  ;;  %v3852_v25 = vmul.f32 %v6262_v17, %v8523_v27 }
 0xaca   : > { %v3736_v14 = vpop.xlane.xlu1 %3735 }
 0xacb   : > { %6269 = vrcp.f32 %v3736_v14 }
 0xace   : > { %v6264_v53 = vpop.eup %6263 }
 0xacf   : > { %v3855_v46 = vmul.f32 %v6264_v53, %v8536_v5  ;;  %v3854_v60 = vmul.f32 %v6264_v53, %v8534_v43 }
 0xad0   : > { %v3739_v36 = vpop.xlane.xlu0 %3738  ;;  %v6266_v47 = vpop.eup %6265 }
 0xad1   : > { %6271 = vrcp.f32 %v3739_v36  ;;  %v3895_v55 = vpack.c.bf16 %v3855_v46, %v3853_v13  ;;  %v3894_v61 = vpack.c.bf16 %v3854_v60, %v3852_v25  ;;  %v3849_v28 = vmul.f32 %v6266_v47, %v8544_v30 }
 0xad2   : > { %v3730_v57 = vpop.xlane.xlu1 %3729  ;;  %v3848_v5 = vmul.f32 %v6266_v47, %v8540_v1 }
 0xad3   : > { %3948 = vmatprep.subr.bf16.mxu1 %v3895_v55  ;;  %6273 = vrcp.f32 %v3730_v57 }
 0xad4   : > { %3949 = vmatpush2.bf16.xpose.msra.mxu1 %v3894_v61 }
 0xad6   : > { %v6268_v32 = vpop.eup %6267 }
 0xad7   : > { %v3851_v59 = vmul.f32 %v6268_v32, %v8556_v23  ;;  %v3850_v27 = vmul.f32 %v6268_v32, %v8553_v21 }
 0xad8   : > { %v3733_v20 = vpop.xlane.xlu0 %3732  ;;  %v6270_v29 = vpop.eup %6269 }
 0xad9   : > { %6275 = vrcp.f32 %v3733_v20  ;;  %v3893_v43 = vpack.c.bf16 %v3851_v59, %v3849_v28  ;;  %v3892_v52 = vpack.c.bf16 %v3850_v27, %v3848_v5  ;;  %v3845_v63 = vmul.f32 %v6270_v29, %v8562_v31  ;;  %v4056_v10 = vpop.trf.xlu1 }
 0xada   : > { %v3844_v30 = vmul.f32 %v6270_v29, %v8558_v4  ;;  %v9821_v4 = vld [vmem:[#allocation46_spill] sm:$0xff] }
 0xadb   : > { %3950 = vmatprep.subr.bf16.mxu1 %v3893_v43  ;;  %v5606_v3 = vpack.c.bf16 %v9821_v4, %v9820_v18 }
 0xadc   : > { %3951 = vmatpush2.bf16.xpose.msra.mxu1 %v3892_v52 }
 0xadd   : > { %v4057_v56 = vpop.trf.xlu1 }
 0xade   : > { %v6272_v2 = vpop.eup %6271  ;;  %v4072_v53 = vpop.trf.xlu0 }
 0xadf   : > { %v3847_v34 = vmul.f32 %v6272_v2, %v8572_v9  ;;  %v3846_v23 = vmul.f32 %v6272_v2, %v8570_v49  ;;  %v9822_v49 = vld [vmem:[#allocation54_spill] sm:$0xff] }
 0xae0   : > { %v6274_v21 = vpop.eup %6273  ;;  %v5604_v62 = vpack.c.bf16 %v9823_v12, %v9822_v49 }
 0xae1   : > { %v3891_v51 = vpack.c.bf16 %v3847_v34, %v3845_v63  ;;  %v3890_v1 = vpack.c.bf16 %v3846_v23, %v3844_v30  ;;  %v3841_v19 = vmul.f32 %v6274_v21, %v8578_v42  ;;  %v3840_v8 = vmul.f32 %v6274_v21, %v8574_v22  ;;  %v4058_v48 = vpop.trf.xlu1 }
 0xae2   : > { %v9826_v42 = vpack.c.bf16 %v9824_v58, %v9825_v39  ;;  %v4073_v13 = vpop.trf.xlu0 }
 0xae3   : > { %3952 = vmatprep.subr.bf16.mxu1 %v3891_v51 }
 0xae4   : > { %3953 = vmatpush2.bf16.xpose.msra.mxu1 %v3890_v1 }
 0xae5   : > { %v4059_v50 = vpop.trf.xlu1 }
 0xae6   : > { %v6276_v35 = vpop.eup %6275  ;;  %v4074_v46 = vpop.trf.xlu0 }
 0xae7   : > { %v3843_v26 = vmul.f32 %v6276_v35, %v8588_v40  ;;  %v3842_v31 = vmul.f32 %v6276_v35, %v8586_v44  ;;  %v9827_v40 = vld [vmem:[#allocation62_spill] sm:$0xff]  ;;  %v9830_v44 = vld [vmem:[#allocation33_spill] sm:$0xff] }
 0xae8   : > { %v9829_v22 = vpack.c.bf16 %v9827_v40, %v9828_v33  ;;  %v9832_v37 = vpack.c.bf16 %v9830_v44, %v9831_v16 }
 0xae9   : > { %v3889_v54 = vpack.c.bf16 %v3843_v26, %v3841_v19  ;;  %v3888_v9 = vpack.c.bf16 %v3842_v31, %v3840_v8  ;;  %v4060_v45 = vpop.trf.xlu1 }
 0xaea   : > { %v4075_v25 = vpop.trf.xlu0 }
 0xaeb   : > { %3954 = vmatprep.subr.bf16.mxu1 %v3889_v54 }
 0xaec   : > { %3955 = vmatpush2.bf16.xpose.msra.mxu1 %v3888_v9 }
 0xaed   : > { %4160 = vmatprep.subr.bf16.mxu1 %v5606_v3  ;;  %v4061_v38 = vpop.trf.xlu1 }
 0xaee   : > { %v4076_v60 = vpop.trf.xlu0 }
 0xaf1   : > { %v4062_v17 = vpop.trf.xlu1 }
 0xaf2   : > { %v4077_v36 = vpop.trf.xlu0 }
 0xaf3   : > { %3957 = vmatmul.mubr.bf16.vlgmr.msra.gmra.mxu1 %v9826_v42 }
 0xaf4   : > { %3966 = vmatprep.mubr.bf16.mxu1 %v9829_v22  ;;  %4161 = vmatpush1.bf16.msra.mxu1 %v9832_v37 }
 0xaf5   : > { %4162 = vmatprep.subr.bf16.mxu1 %v5604_v62  ;;  %v4063_v14 = vpop.trf.xlu1 }
 0xaf6   : > { %v4078_v55 = vpop.trf.xlu0 }
 0xaf8   : > { %4163 = vmatpush1.bf16.msra.mxu1 %v9835_v6 }
 0xafa   : > { %v4079_v61 = vpop.trf.xlu0 }
 0xafb   : > { %3967 = vmatmul.mubr.bf16.gmra.mxu1 %v9838_v11 }
 0xafc   : > { %4180 = vmatprep.mubr.bf16.mxu1 %v9839_v41 }
 0xb03   : > { %5450 = vmatmul.mubr.msk.bf16.vlgmr.msra.gmra.mxu1 %vm478_vm0, %v4056_v10 }
 0xb04   : > { %4190 = vmatprep.mubr.bf16.mxu1 %v9839_v41 }
 0xb0b   : > { %5451 = vmatmul.mubr.msk.bf16.gmra.mxu1 %vm478_vm0, %v4057_v56 }
 0xb0c   : > { %4200 = vmatprep.mubr.bf16.mxu1 %v9839_v41 }
 0xb13   : > { %5452 = vmatmul.mubr.msk.bf16.gmra.mxu1 %vm478_vm0, %v4058_v48 }
 0xb14   : > { %4210 = vmatprep.mubr.bf16.mxu1 %v9839_v41 }
 0xb1b   : > { %5453 = vmatmul.mubr.msk.bf16.gmra.mxu1 %vm478_vm0, %v4059_v50 }
 0xb1c   : > { %4220 = vmatprep.mubr.bf16.mxu1 %v9839_v41 }
 0xb23   : > { %5454 = vmatmul.mubr.msk.bf16.gmra.mxu1 %vm478_vm0, %v4060_v45 }
 0xb24   : > { %4230 = vmatprep.mubr.bf16.mxu1 %v9839_v41 }
 0xb2b   : > { %5455 = vmatmul.mubr.msk.bf16.gmra.mxu1 %vm478_vm0, %v4061_v38 }
 0xb2c   : > { %4240 = vmatprep.mubr.bf16.mxu1 %v9839_v41 }
 0xb33   : > { %5456 = vmatmul.mubr.msk.bf16.gmra.mxu1 %vm478_vm0, %v4062_v17 }
 0xb34   : > { %4250 = vmatprep.mubr.bf16.mxu1 %v9839_v41 }
 0xb3b   : > { %5457 = vmatmul.mubr.msk.bf16.gmra.mxu1 %vm478_vm0, %v4063_v14 }
 0xb3c   : > { %4260 = vmatprep.mubr.bf16.mxu1 %v9839_v41 }
 0xb43   : > { %5458 = vmatmul.mubr.msk.bf16.gmra.mxu1 %vm478_vm0, %v4072_v53 }
 0xb44   : > { %4270 = vmatprep.mubr.bf16.mxu1 %v9839_v41 }
 0xb4b   : > { %5459 = vmatmul.mubr.msk.bf16.gmra.mxu1 %vm478_vm0, %v4073_v13 }
 0xb4c   : > { %4280 = vmatprep.mubr.bf16.mxu1 %v9839_v41 }
 0xb53   : > { %5460 = vmatmul.mubr.msk.bf16.gmra.mxu1 %vm478_vm0, %v4074_v46 }
 0xb54   : > { %4290 = vmatprep.mubr.bf16.mxu1 %v9839_v41 }
 0xb5b   : > { %5461 = vmatmul.mubr.msk.bf16.gmra.mxu1 %vm478_vm0, %v4075_v25 }
 0xb5c   : > { %4300 = vmatprep.mubr.bf16.mxu1 %v9839_v41 }
 0xb63   : > { %5462 = vmatmul.mubr.msk.bf16.gmra.mxu1 %vm478_vm0, %v4076_v60 }
 0xb64   : > { %4310 = vmatprep.mubr.bf16.mxu1 %v9839_v41 }
 0xb6b   : > { %5463 = vmatmul.mubr.msk.bf16.gmra.mxu1 %vm478_vm0, %v4077_v36 }
 0xb6c   : > { %4320 = vmatprep.mubr.bf16.mxu1 %v9839_v41 }
 0xb73   : > { %5464 = vmatmul.mubr.msk.bf16.gmra.mxu1 %vm478_vm0, %v4078_v55 }
 0xb74   : > { %4330 = vmatprep.mubr.bf16.mxu1 %v9839_v41 }
 0xb7b   : > { %5465 = vmatmul.mubr.msk.bf16.gmra.mxu1 %vm478_vm0, %v4079_v61 }
 0xbb3   : > { %v8701_v47 = vpop.f32.mrf.mxu1 }
 0xbb4   : > { %9840 = vst [vmem:[#allocation52_spill] sm:$0xff] %v8701_v47 }
 0xbb5   : > { %v8703_v57 = vpop.f32.mrf.mxu1 }
 0xbb6   : > { %9841 = vst [vmem:[#allocation39_spill] sm:$0xff] %v8703_v57 }
 0xbb7   : > { %v8705_v32 = vpop.f32.mrf.mxu1 }
 0xbb8   : > { %9842 = vst [vmem:[#allocation44_spill] sm:$0xff] %v8705_v32 }
 0xbb9   : > { %v8709_v59 = vpop.f32.mrf.mxu1 }
 0xbba   : > { %9843 = vst [vmem:[#allocation58_spill] sm:$0xff] %v8709_v59 }
 0xbbb   : > { %v8713_v27 = vpop.f32.mrf.mxu1 }
 0xbbc   : > { %9844 = vst [vmem:[#allocation66_spill] sm:$0xff] %v8713_v27 }
 0xbbd   : > { %v8715_v20 = vpop.f32.mrf.mxu1 }
 0xbbe   : > { %9845 = vst [vmem:[#allocation59_spill] sm:$0xff] %v8715_v20 }
 0xbbf   : > { %v8717_v43 = vpop.f32.mrf.mxu1 }
 0xbc0   : > { %9846 = vst [vmem:[#allocation37_spill] sm:$0xff] %v8717_v43 }
 0xbc1   : > { %v8721_v29 = vpop.f32.mrf.mxu1 }
 0xbc2   : > { %9847 = vst [vmem:[#allocation65_spill] sm:$0xff] %v8721_v29 }
 0xbc3   : > { %v8725_v63 = vpop.f32.mrf.mxu1 }
 0xbc5   : > { %v8727_v34 = vpop.f32.mrf.mxu1 }
 0xbc7   : > { %v8729_v30 = vpop.f32.mrf.mxu1 }
 0xbc9   : > { %v8731_v23 = vpop.f32.mrf.mxu1 }
 0xbca   : > { %9848 = vst [vmem:[#allocation40_spill] sm:$0xff] %v8731_v23 }
 0xbcb   : > { %v8733_v51 = vpop.f32.mrf.mxu1 }
 0xbcd   : > { %v8735_v1 = vpop.f32.mrf.mxu1 }
 0xbcf   : > { %v8737_v21 = vpop.f32.mrf.mxu1 }
 0xbd1   : > { %v8739_v35 = vpop.f32.mrf.mxu1 }
 0xbd3   : > { %v8741_v19 = vpop.f32.mrf.mxu1 }
 0xbd5   : > { %v8743_v26 = vpop.f32.mrf.mxu1 }
 0xbd6   : > { %v4353_v55 = vmax.f32 %v8741_v19, %v8743_v26 }
 0xbd7   : > { %v8745_v8 = vpop.f32.mrf.mxu1 }
 0xbd9   : > { %v8747_v31 = vpop.f32.mrf.mxu1 }
 0xbdb   : > { %v8749_v54 = vpop.f32.mrf.mxu1 }
 0xbdd   : > { %v8751_v9 = vpop.f32.mrf.mxu1 }
 0xbde   : > { %v4359_v46 = vmax.f32 %v8749_v54, %v8751_v9 }
 0xbdf   : > { %v8753_v18 = vpop.f32.mrf.mxu1 }
 0xbe1   : > { %v8755_v4 = vpop.f32.mrf.mxu1 }
 0xbe2   : > { %v4362_v61 = vmax.f32 %v8753_v18, %v8755_v4 }
 0xbe3   : > { %v8757_v3 = vpop.f32.mrf.mxu1 }
 0xbe5   : > { %v8759_v49 = vpop.f32.mrf.mxu1 }
 0xbe6   : > { %v4365_v17 = vmax.f32 %v8757_v3, %v8759_v49 }
 0xbe7   : > { %v8761_v12 = vpop.f32.mrf.mxu1 }
 0xbe9   : > { %v8763_v62 = vpop.f32.mrf.mxu1 }
 0xbea   : > { %v4368_v25 = vmax.f32 %v8761_v12, %v8763_v62 }
 0xbeb   : > { %v8765_v58 = vpop.f32.mrf.mxu1 }
 0xbed   : > { %v8767_v39 = vpop.f32.mrf.mxu1 }
 0xbee   : > { %v4371_v48 = vmax.f32 %v8765_v58, %v8767_v39 }
 0xbef   : > { %v8769_v42 = vpop.f32.mrf.mxu1 }
 0xbf1   : > { %v8771_v40 = vpop.f32.mrf.mxu1 }
 0xbf2   : > { %v4374_v14 = vmax.f32 %v8769_v42, %v8771_v40 }
 0xbf3   : > { %v8773_v33 = vpop.f32.mrf.mxu1 }
 0xbf5   : > { %v8775_v22 = vpop.f32.mrf.mxu1 }
 0xbf6   : > { %v4377_v24 = vmax.f32 %v8773_v33, %v8775_v22 }
 0xbf7   : > { %v8777_v44 = vpop.f32.mrf.mxu1 }
 0xbf9   : > { %v8779_v16 = vpop.f32.mrf.mxu1 }
 0xbfa   : > { %v4380_v50 = vmax.f32 %v8777_v44, %v8779_v16 }
 0xbfb   : > { %v8781_v37 = vpop.f32.mrf.mxu1 }
 0xbfd   : > { %v8783_v0 = vpop.f32.mrf.mxu1 }
 0xbfe   : > { %v4383_v15 = vmax.f32 %v8781_v37, %v8783_v0 }
 0xbff   : > { %v8787_v6 = vpop.f32.mrf.mxu1 }
 0xc00   : > { %4384 = vmax.xlane.f32.xlu1 %v4383_v15 }
 0xc01   : > { %v8789_v7 = vpop.f32.mrf.mxu1 }
 0xc02   : > { %v4386_v11 = vmax.f32 %v8787_v6, %v8789_v7 }
 0xc03   : > { %v8795_v10 = vpop.f32.mrf.mxu1 }
 0xc04   : > { %9849 = vst [vmem:[#allocation25_spill] sm:$0xff] %v8795_v10  ;;  %4378 = vmax.xlane.f32.xlu1 %v4377_v24  ;;  %4387 = vmax.xlane.f32.xlu0 %v4386_v11  ;;  %v4347_v11 = vmax.f32 %v8733_v51, %v8735_v1 }
 0xc05   : > { %v8797_v56 = vpop.f32.mrf.mxu1 }
 0xc06   : > { %9850 = vst [vmem:[#allocation23_spill] sm:$0xff] %v8797_v56 }
 0xc07   : > { %v8803_v45 = vpop.f32.mrf.mxu1 }
 0xc08   : > { %9851 = vst [vmem:[#allocation24_spill] sm:$0xff] %v8803_v45  ;;  %4372 = vmax.xlane.f32.xlu1 %v4371_v48  ;;  %4381 = vmax.xlane.f32.xlu0 %v4380_v50  ;;  %v4356_v48 = vmax.f32 %v8745_v8, %v8747_v31 }
 0xc09   : > { %v8805_v38 = vpop.f32.mrf.mxu1 }
 0xc0a   : > { %9852 = vst [vmem:[#allocation26_spill] sm:$0xff] %v8805_v38 }
 0xc0b   : > { %v8811_v53 = vpop.f32.mrf.mxu1 }
 0xc0c   : > { %4366 = vmax.xlane.f32.xlu1 %v4365_v17  ;;  %4375 = vmax.xlane.f32.xlu0 %v4374_v14  ;;  %v4341_v14 = vmax.f32 %v8725_v63, %v8727_v34 }
 0xc0d   : > { %v8813_v13 = vpop.f32.mrf.mxu1 }
 0xc0f   : > { %v8819_v60 = vpop.f32.mrf.mxu1 }
 0xc10   : > { %4360 = vmax.xlane.f32.xlu1 %v4359_v46  ;;  %4369 = vmax.xlane.f32.xlu0 %v4368_v25  ;;  %v4350_v46 = vmax.f32 %v8737_v21, %v8739_v35 }
 0xc11   : > { %v8821_v36 = vpop.f32.mrf.mxu1 }
 0xc13   : > { %v8827_v15 = vpop.f32.mrf.mxu1 }
 0xc14   : > { %4354 = vmax.xlane.f32.xlu1 %v4353_v55  ;;  %4363 = vmax.xlane.f32.xlu0 %v4362_v61  ;;  %v4344_v61 = vmax.f32 %v8729_v30, %v8731_v23 }
 0xc15   : > { %v8829_v24 = vpop.f32.mrf.mxu1 }
 0xc17   : > { %v8835_v50 = vpop.f32.mrf.mxu1 }
 0xc18   : > { %4348 = vmax.xlane.f32.xlu1 %v4347_v11  ;;  %4357 = vmax.xlane.f32.xlu0 %v4356_v48 }
 0xc19   : > { %v8837_v17 = vpop.f32.mrf.mxu1 }
 0xc1b   : > { %v8843_v25 = vpop.f32.mrf.mxu1 }
 0xc1c   : > { %4342 = vmax.xlane.f32.xlu1 %v4341_v14  ;;  %4351 = vmax.xlane.f32.xlu0 %v4350_v46 }
 0xc1d   : > { %v8845_v55 = vpop.f32.mrf.mxu1 }
 0xc1f   : > { %v8849_v28 = vpop.f32.mrf.mxu1 }
 0xc20   : > { %4345 = vmax.xlane.f32.xlu0 %v4344_v61 }
 0xc21   : > { %v8851_v11 = vpop.f32.mrf.mxu1 }
 0xc23   : > { %v8853_v48 = vpop.f32.mrf.mxu1 }
 0xc25   : > { %v8855_v5 = vpop.f32.mrf.mxu1 }
 0xc26   : > { %9853 = vst [vmem:[#allocation48_spill] sm:$0xff] %v8855_v5 }
 0xc27   : > { %v8857_v52 = vpop.f32.mrf.mxu1 }
 0xc28   : > { %9854 = vst [vmem:[#allocation29_spill] sm:$0xff] %v8857_v52 }
 0xc29   : > { %v8859_v2 = vpop.f32.mrf.mxu1 }
 0xc2a   : > { %9855 = vst [vmem:[#allocation27_spill] sm:$0xff] %v8859_v2 }
 0xc2b   : > { %v8861_v14 = vpop.f32.mrf.mxu1 }
 0xc2c   : > { %9856 = vst [vmem:[#allocation28_spill] sm:$0xff] %v8861_v14 }
 0xc2d   : > { %v8863_v46 = vpop.f32.mrf.mxu1 }
 0xc2e   : > { %9857 = vst [vmem:[#allocation30_spill] sm:$0xff] %v8863_v46  ;;  %v4419_v56 = vmax.f32 %v8861_v14, %v8863_v46 }
 0xc2f   : > { %v8865_v47 = vpop.f32.mrf.mxu1 }
 0xc31   : > { %v8867_v32 = vpop.f32.mrf.mxu1 }
 0xc32   : > { %9858 = vst [vmem:[#allocation64_spill] sm:$0xff] %v8867_v32 }
 0xc33   : > { %v8869_v57 = vpop.f32.mrf.mxu1 }
 0xc35   : > { %v8871_v61 = vpop.f32.mrf.mxu1 }
 0xc36   : > { %9859 = vst [vmem:[#allocation49_spill] sm:$0xff] %v8871_v61  ;;  %v4425_v45 = vmax.f32 %v8869_v57, %v8871_v61  ;;  %v4422_v61 = vmax.f32 %v8865_v47, %v8867_v32 }
 0xc37   : > { %v8873_v59 = vpop.f32.mrf.mxu1 }
 0xc38   : > { %9860 = vst [vmem:[#allocation47_spill] sm:$0xff] %v8873_v59 }
 0xc39   : > { %v8875_v27 = vpop.f32.mrf.mxu1 }
 0xc3a   : > { %9861 = vst [vmem:[#allocation38_spill] sm:$0xff] %v8875_v27  ;;  %v4428_v23 = vmax.f32 %v8873_v59, %v8875_v27 }
 0xc3b   : > { %v8877_v43 = vpop.f32.mrf.mxu1 }
 0xc3d   : > { %v8879_v20 = vpop.f32.mrf.mxu1 }
 0xc3e   : > { %9862 = vst [vmem:[#allocation50_spill] sm:$0xff] %v8879_v20  ;;  %v4431_v29 = vmax.f32 %v8877_v43, %v8879_v20  ;;  %v4413_v20 = vmax.f32 %v8853_v48, %v8855_v5 }
 0xc3f   : > { %v8883_v41 = vpop.f32.mrf.mxu1 }
 0xc40   : > { %4432 = vmax.xlane.f32.xlu1 %v4431_v29  ;;  %v4416_v29 = vmax.f32 %v8857_v52, %v8859_v2 }
 0xc41   : > { %v8887_v38 = vpop.f32.mrf.mxu1 }
 0xc42   : > { %v4434_v10 = vmax.f32 %v8883_v41, %v8887_v38 }
 0xc44   : > { %4426 = vmax.xlane.f32.xlu1 %v4425_v45  ;;  %4435 = vmax.xlane.f32.xlu0 %v4434_v10 }
 0xc48   : > { %4420 = vmax.xlane.f32.xlu1 %v4419_v56  ;;  %4429 = vmax.xlane.f32.xlu0 %v4428_v23 }
 0xc4c   : > { %4414 = vmax.xlane.f32.xlu1 %v4413_v20  ;;  %4423 = vmax.xlane.f32.xlu0 %v4422_v61 }
 0xc50   : > { %4417 = vmax.xlane.f32.xlu0 %v4416_v29 }
 0xc89   : > { %v4385_v46 = vpop.xlane.xlu1 %4384 }
 0xc8a   : > { %v4465_v14 = vsub.f32 %v8781_v37, %v4385_v46  ;;  %v4466_v45 = vsub.f32 %v8783_v0, %v4385_v46 }
 0xc8c   : > { %v4557_v10 = vmul.f32 1.442695, %v4465_v14  ;;  %v4559_v27 = vmul.f32 1.442695, %v4466_v45 }
 0xc8d   : > { %v4379_v59 = vpop.xlane.xlu1 %4378  ;;  %v4388_v5 = vpop.xlane.xlu0 %4387 }
 0xc8e   : > { %6277 = vpow2.f32 %v4557_v10  ;;  %v4461_v32 = vsub.f32 %v8773_v33, %v4379_v59  ;;  %v4462_v23 = vsub.f32 %v8775_v22, %v4379_v59  ;;  %v4467_v56 = vsub.f32 %v8787_v6, %v4388_v5 }
 0xc8f   : > { %6279 = vpow2.f32 %v4559_v27  ;;  %v4468_v20 = vsub.f32 %v8789_v7, %v4388_v5 }
 0xc90   : > { %v4549_v61 = vmul.f32 1.442695, %v4461_v32  ;;  %v4551_v29 = vmul.f32 1.442695, %v4462_v23  ;;  %v4561_v2 = vmul.f32 1.442695, %v4467_v56 }
 0xc91   : > { %v4563_v37 = vmul.f32 1.442695, %v4468_v20  ;;  %v4373_v52 = vpop.xlane.xlu1 %4372  ;;  %v4382_v0 = vpop.xlane.xlu0 %4381 }
 0xc92   : > { %6281 = vpow2.f32 %v4549_v61  ;;  %v4463_v14 = vsub.f32 %v8777_v44, %v4382_v0  ;;  %v4464_v46 = vsub.f32 %v8779_v16, %v4382_v0  ;;  %v4457_v59 = vsub.f32 %v8765_v58, %v4373_v52 }
 0xc93   : > { %6283 = vpow2.f32 %v4551_v29  ;;  %v4458_v27 = vsub.f32 %v8767_v39, %v4373_v52 }
 0xc94   : > { %6285 = vpow2.f32 %v4561_v2  ;;  %v4553_v32 = vmul.f32 1.442695, %v4463_v14  ;;  %v4555_v22 = vmul.f32 1.442695, %v4464_v46  ;;  %v4541_v6 = vmul.f32 1.442695, %v4457_v59 }
 0xc95   : > { %6287 = vpow2.f32 %v4563_v37  ;;  %v4367_v33 = vpop.xlane.xlu1 %4366  ;;  %v4376_v5 = vpop.xlane.xlu0 %4375  ;;  %v4543_v7 = vmul.f32 1.442695, %v4458_v27  ;;  %v4407_v37 = vmax.f32 %v8843_v25, %v8845_v55 }
 0xc96   : > { %6289 = vpow2.f32 %v4553_v32  ;;  %v4459_v45 = vsub.f32 %v8769_v42, %v4376_v5  ;;  %v4460_v44 = vsub.f32 %v8771_v40, %v4376_v5  ;;  %v4453_v52 = vsub.f32 %v8757_v3, %v4367_v33 }
 0xc97   : > { %6291 = vpow2.f32 %v4555_v22  ;;  %v4454_v39 = vsub.f32 %v8759_v49, %v4367_v33 }
 0xc98   : > { %6293 = vpow2.f32 %v4541_v6  ;;  %v4545_v56 = vmul.f32 1.442695, %v4459_v45  ;;  %v4547_v20 = vmul.f32 1.442695, %v4460_v44  ;;  %v4533_v40 = vmul.f32 1.442695, %v4453_v52 }
 0xc99   : > { %v4361_v2 = vpop.xlane.xlu1 %4360  ;;  %v4370_v16 = vpop.xlane.xlu0 %4369  ;;  %6295 = vpow2.f32 %v4543_v7  ;;  %v4535_v3 = vmul.f32 1.442695, %v4454_v39 }
 0xc9a   : > { %6297 = vpow2.f32 %v4545_v56  ;;  %v4455_v46 = vsub.f32 %v8761_v12, %v4370_v16  ;;  %v4456_v59 = vsub.f32 %v8763_v62, %v4370_v16  ;;  %v4449_v33 = vsub.f32 %v8749_v54, %v4361_v2 }
 0xc9b   : > { %v8912_v10 = vpop.eup %6277  ;;  %6299 = vpow2.f32 %v4547_v20  ;;  %v4450_v5 = vsub.f32 %v8751_v9, %v4361_v2  ;;  %v4410_v12 = vmax.f32 %v8849_v28, %v8851_v11  ;;  %v4401_v2 = vmax.f32 %v8827_v15, %v8829_v24 }
 0xc9c   : > { %v8915_v58 = vpop.eup %6279  ;;  %6301 = vpow2.f32 %v4533_v40  ;;  %v4537_v22 = vmul.f32 1.442695, %v4455_v46  ;;  %v4539_v62 = vmul.f32 1.442695, %v4456_v59  ;;  %v4525_v54 = vmul.f32 1.442695, %v4449_v33 }
 0xc9d   : > { %v4671_v23 = vadd.f32 %v8915_v58, %v8912_v10  ;;  %v4355_v0 = vpop.xlane.xlu1 %4354  ;;  %v4364_v14 = vpop.xlane.xlu0 %4363  ;;  %6303 = vpow2.f32 %v4535_v3  ;;  %v4527_v52 = vmul.f32 1.442695, %v4450_v5 }
 0xc9e   : > { %v4445_v16 = vsub.f32 %v8741_v19, %v4355_v0  ;;  %v4446_v39 = vsub.f32 %v8743_v26, %v4355_v0  ;;  %6305 = vpow2.f32 %v4537_v22  ;;  %v4451_v56 = vsub.f32 %v8753_v18, %v4364_v14 }
 0xc9f   : > { %v8921_v42 = vpop.eup %6281  ;;  %4672 = vadd.xlane.f32.xlu1 %v4671_v23  ;;  %6307 = vpow2.f32 %v4539_v62  ;;  %v4452_v20 = vsub.f32 %v8755_v4, %v4364_v14 }
 0xca0   : > { %v8923_v61 = vpop.eup %6283  ;;  %6309 = vpow2.f32 %v4525_v54  ;;  %v4517_v40 = vmul.f32 1.442695, %v4445_v16  ;;  %v4519_v3 = vmul.f32 1.442695, %v4446_v39  ;;  %v4529_v59 = vmul.f32 1.442695, %v4451_v56 }
 0xca1   : > { %v8925_v29 = vpop.eup %6285  ;;  %v4665_v32 = vadd.f32 %v8923_v61, %v8921_v42  ;;  %v4349_v7 = vpop.xlane.xlu1 %4348  ;;  %6311 = vpow2.f32 %v4527_v52  ;;  %v4531_v33 = vmul.f32 1.442695, %v4452_v20 }
 0xca2   : > { %v8929_v49 = vpop.eup %6287  ;;  %v4358_v45 = vpop.xlane.xlu0 %4357  ;;  %v4442_v26 = vsub.f32 %v8735_v1, %v4349_v7  ;;  %6313 = vpow2.f32 %v4517_v40  ;;  %v9863_v40 = vld [vmem:[#allocation40_spill] sm:$0xff] }
 0xca3   : > { %4408 = vmax.xlane.f32.xlu1 %v4407_v37  ;;  %v4674_v27 = vadd.f32 %v8929_v49, %v8925_v29  ;;  %v8939_v6 = vpop.eup %6289  ;;  %v4441_v37 = vsub.f32 %v8733_v51, %v4349_v7  ;;  %v4447_v4 = vsub.f32 %v8745_v8, %v4358_v45  ;;  %v4448_v51 = vsub.f32 %v8747_v31, %v4358_v45 }
 0xca4   : > { %v8943_v44 = vpop.eup %6291  ;;  %v4395_v8 = vmax.f32 %v8811_v53, %v8813_v13  ;;  %6315 = vpow2.f32 %v4519_v3 }
 0xca5   : > { %4675 = vadd.xlane.f32.xlu0 %v4674_v27  ;;  %v8946_v9 = vpop.eup %6293  ;;  %v4668_v19 = vadd.f32 %v8943_v44, %v8939_v6  ;;  %v4343_v0 = vpop.xlane.xlu1 %4342  ;;  %v4404_v27 = vmax.f32 %v8835_v50, %v8837_v17  ;;  %v4509_v1 = vmul.f32 1.442695, %v4441_v37  ;;  %6317 = vpow2.f32 %v4529_v59 }
 0xca6   : > { %v8951_v23 = vpop.eup %6295  ;;  %v4352_v46 = vpop.xlane.xlu0 %4351  ;;  %v4438_v62 = vsub.f32 %v8727_v34, %v4343_v0  ;;  %v4521_v31 = vmul.f32 1.442695, %v4447_v4  ;;  %6319 = vpow2.f32 %v4531_v33  ;;  %v4523_v54 = vmul.f32 1.442695, %v4448_v51 }
 0xca7   : > { %4666 = vadd.xlane.f32.xlu1 %v4665_v32  ;;  %v4659_v18 = vadd.f32 %v8951_v23, %v8946_v9  ;;  %v8962_v14 = vpop.eup %6297  ;;  %v4437_v32 = vsub.f32 %v8725_v63, %v4343_v0  ;;  %v4443_v45 = vsub.f32 %v8737_v21, %v4352_v46  ;;  %v4444_v63 = vsub.f32 %v8739_v35, %v4352_v46  ;;  %v9864_v0 = vld [vmem:[#allocation23_spill] sm:$0xff]  ;;  %v9865_v46 = vld [vmem:[#allocation25_spill] sm:$0xff] }
 0xca8   : > { %v8967_v5 = vpop.eup %6299  ;;  %6321 = vpow2.f32 %v4509_v1  ;;  %v4503_v34 = vmul.f32 1.442695, %v4438_v62  ;;  %v4398_v35 = vmax.f32 %v8819_v60, %v8821_v36 }
 0xca9   : > { %4411 = vmax.xlane.f32.xlu0 %v4410_v12  ;;  %v8970_v22 = vpop.eup %6301  ;;  %v4511_v12 = vmul.f32 1.442695, %v4442_v26  ;;  %v4501_v52 = vmul.f32 1.442695, %v4437_v32  ;;  %v4513_v56 = vmul.f32 1.442695, %v4443_v45 }
 0xcaa   : > { %v8975_v7 = vpop.eup %6303  ;;  %v4346_v16 = vpop.xlane.xlu0 %4345 }
 0xcab   : > { %4402 = vmax.xlane.f32.xlu1 %v4401_v2  ;;  %v4662_v2 = vadd.f32 %v8967_v5, %v8962_v14  ;;  %6323 = vpow2.f32 %v4511_v12  ;;  %v4653_v39 = vadd.f32 %v8975_v7, %v8970_v22  ;;  %v4439_v21 = vsub.f32 %v8729_v30, %v4346_v16  ;;  %v8984_v20 = vpop.eup %6305  ;;  %v9868_v12 = vld [vmem:[#allocation24_spill] sm:$0xff] }
 0xcac   : > { %6325 = vpow2.f32 %v4521_v31  ;;  %v4440_v37 = vsub.f32 %v9863_v40, %v4346_v16  ;;  %v8989_v3 = vpop.eup %6307 }
 0xcad   : > { %4669 = vadd.xlane.f32.xlu0 %v4668_v19  ;;  %6327 = vpow2.f32 %v4523_v54  ;;  %v4515_v19 = vmul.f32 1.442695, %v4444_v63  ;;  %v8991_v26 = vpop.eup %6309  ;;  %v4505_v59 = vmul.f32 1.442695, %v4439_v21 }
 0xcae   : > { %6329 = vpow2.f32 %v4501_v52  ;;  %v8995_v30 = vpop.eup %6311  ;;  %v4507_v4 = vmul.f32 1.442695, %v4440_v37 }
 0xcaf   : > { %4660 = vadd.xlane.f32.xlu1 %v4659_v18  ;;  %v4389_v18 = vmax.f32 %v9865_v46, %v9864_v0  ;;  %6331 = vpow2.f32 %v4503_v34  ;;  %v8999_v33 = vpop.eup %6313  ;;  %v4647_v51 = vadd.f32 %v8995_v30, %v8991_v26 }
 0xcb0   : > { %6333 = vpow2.f32 %v4513_v56  ;;  %9866 = vst [vmem:[#allocation51_spill] sm:$0xff] %v8999_v33 }
 0xcb1   : > { %4405 = vmax.xlane.f32.xlu0 %v4404_v27  ;;  %6335 = vpow2.f32 %v4515_v19  ;;  %v4656_v27 = vadd.f32 %v8989_v3, %v8984_v20  ;;  %v9003_v1 = vpop.eup %6315 }
 0xcb2   : > { %6337 = vpow2.f32 %v4505_v59  ;;  %v9005_v32 = vpop.eup %6317  ;;  %v4641_v54 = vadd.f32 %v9003_v1, %v8999_v33  ;;  %v9874_v59 = vld [vmem:[#allocation50_spill] sm:$0xff] }
 0xcb3   : > { %4396 = vmax.xlane.f32.xlu1 %v4395_v8  ;;  %v9867_v8 = vld [vmem:[#allocation26_spill] sm:$0xff]  ;;  %6339 = vpow2.f32 %v4507_v4  ;;  %v9009_v31 = vpop.eup %6319 }
 0xcb4   : > { %v4392_v62 = vmax.f32 %v9868_v12, %v9867_v8  ;;  %v9878_v33 = vld [vmem:[#allocation30_spill] sm:$0xff] }
 0xcb5   : > { %4663 = vadd.xlane.f32.xlu0 %v4662_v2  ;;  %v9011_v45 = vpop.eup %6321  ;;  %v4650_v2 = vadd.f32 %v9009_v31, %v9005_v32 }
 0xcb6   : > { %9869 = vst [vmem:[#allocation57_spill] sm:$0xff] %v9011_v45 }
 0xcb7   : > { %4654 = vadd.xlane.f32.xlu1 %v4653_v39 }
 0xcb8   : > { %v9015_v63 = vpop.eup %6323 }
 0xcb9   : > { %4399 = vmax.xlane.f32.xlu0 %v4398_v35  ;;  %9870 = vst [vmem:[#allocation46_spill] sm:$0xff] %v9015_v63  ;;  %v9017_v16 = vpop.eup %6325  ;;  %v4635_v39 = vadd.f32 %v9015_v63, %v9011_v45 }
 0xcba   : > { %v9021_v52 = vpop.eup %6327 }
 0xcbb   : > { %4390 = vmax.xlane.f32.xlu1 %v4389_v18  ;;  %v9023_v34 = vpop.eup %6329  ;;  %v4644_v35 = vadd.f32 %v9021_v52, %v9017_v16 }
 0xcbc   : > { %9871 = vst [vmem:[#allocation54_spill] sm:$0xff] %v9023_v34  ;;  %v9027_v56 = vpop.eup %6331 }
 0xcbd   : > { %4657 = vadd.xlane.f32.xlu0 %v4656_v27  ;;  %9872 = vst [vmem:[#allocation56_spill] sm:$0xff] %v9027_v56  ;;  %v9029_v21 = vpop.eup %6333  ;;  %v4629_v37 = vadd.f32 %v9027_v56, %v9023_v34  ;;  %v9876_v56 = vld [vmem:[#allocation49_spill] sm:$0xff] }
 0xcbe   : > { %9873 = vst [vmem:[#allocation42_spill] sm:$0xff] %v9029_v21  ;;  %v9033_v19 = vpop.eup %6335 }
 0xcbf   : > { %4648 = vadd.xlane.f32.xlu1 %v4647_v51  ;;  %v9039_v27 = vpop.eup %6337  ;;  %v4638_v51 = vadd.f32 %v9033_v19, %v9029_v21 }
 0xcc0   : > { %9875 = vst [vmem:[#allocation41_spill] sm:$0xff] %v9039_v27 }
 0xcc1   : > { %4393 = vmax.xlane.f32.xlu0 %v4392_v62  ;;  %v9043_v62 = vpop.eup %6339 }
 0xcc3   : > { %4642 = vadd.xlane.f32.xlu1 %v4641_v54 }
 0xcc5   : > { %4651 = vadd.xlane.f32.xlu0 %v4650_v2 }
 0xcc7   : > { %4636 = vadd.xlane.f32.xlu1 %v4635_v39 }
 0xcc9   : > { %4645 = vadd.xlane.f32.xlu0 %v4644_v35  ;;  %v4433_v40 = vpop.xlane.xlu1 %4432 }
 0xcca   : > { %v4497_v18 = vsub.f32 %v8877_v43, %v4433_v40  ;;  %v4498_v4 = vsub.f32 %v9874_v59, %v4433_v40  ;;  %v4632_v59 = vadd.f32 %v9043_v62, %v9039_v27 }
 0xccb   : > { %4630 = vadd.xlane.f32.xlu1 %v4629_v37 }
 0xccc   : > { %v4621_v54 = vmul.f32 1.442695, %v4497_v18  ;;  %v4623_v2 = vmul.f32 1.442695, %v4498_v4 }
 0xccd   : > { %4639 = vadd.xlane.f32.xlu0 %v4638_v51  ;;  %v4427_v39 = vpop.xlane.xlu1 %4426  ;;  %v4436_v35 = vpop.xlane.xlu0 %4435 }
 0xcce   : > { %6341 = vpow2.f32 %v4621_v54  ;;  %v4493_v34 = vsub.f32 %v8869_v57, %v4427_v39  ;;  %v4494_v43 = vsub.f32 %v9876_v56, %v4427_v39  ;;  %v4499_v40 = vsub.f32 %v8883_v41, %v4436_v35  ;;  %v9877_v54 = vld [vmem:[#allocation28_spill] sm:$0xff]  ;;  %v9879_v39 = vld [vmem:[#allocation47_spill] sm:$0xff] }
 0xccf   : > { %6343 = vpow2.f32 %v4623_v2  ;;  %v4500_v37 = vsub.f32 %v8887_v38, %v4436_v35  ;;  %v9880_v2 = vld [vmem:[#allocation38_spill] sm:$0xff] }
 0xcd0   : > { %v4613_v45 = vmul.f32 1.442695, %v4493_v34  ;;  %v4615_v21 = vmul.f32 1.442695, %v4494_v43  ;;  %v4625_v18 = vmul.f32 1.442695, %v4499_v40 }
 0xcd1   : > { %v4627_v4 = vmul.f32 1.442695, %v4500_v37  ;;  %4633 = vadd.xlane.f32.xlu0 %v4632_v59  ;;  %v4421_v51 = vpop.xlane.xlu1 %4420  ;;  %v4430_v63 = vpop.xlane.xlu0 %4429  ;;  %v9881_v59 = vld [vmem:[#allocation48_spill] sm:$0xff] }
 0xcd2   : > { %6345 = vpow2.f32 %v4613_v45  ;;  %v4489_v57 = vsub.f32 %v9877_v54, %v4421_v51  ;;  %v4490_v56 = vsub.f32 %v9878_v33, %v4421_v51  ;;  %v4495_v41 = vsub.f32 %v9879_v39, %v4430_v63  ;;  %v9882_v51 = vld [vmem:[#allocation64_spill] sm:$0xff]  ;;  %v9883_v39 = vld [vmem:[#allocation29_spill] sm:$0xff] }
 0xcd3   : > { %6347 = vpow2.f32 %v4615_v21  ;;  %v4496_v38 = vsub.f32 %v9880_v2, %v4430_v63  ;;  %v9884_v2 = vld [vmem:[#allocation27_spill] sm:$0xff] }
 0xcd4   : > { %6349 = vpow2.f32 %v4625_v18  ;;  %v4605_v35 = vmul.f32 1.442695, %v4489_v57  ;;  %v4607_v27 = vmul.f32 1.442695, %v4490_v56  ;;  %v4617_v34 = vmul.f32 1.442695, %v4495_v41 }
 0xcd5   : > { %6351 = vpow2.f32 %v4627_v4  ;;  %v4619_v43 = vmul.f32 1.442695, %v4496_v38  ;;  %v4415_v40 = vpop.xlane.xlu1 %4414  ;;  %v4424_v37 = vpop.xlane.xlu0 %4423 }
 0xcd6   : > { %6353 = vpow2.f32 %v4605_v35  ;;  %v4485_v45 = vsub.f32 %v8853_v48, %v4415_v40  ;;  %v4486_v54 = vsub.f32 %v9881_v59, %v4415_v40  ;;  %v4491_v33 = vsub.f32 %v8865_v47, %v4424_v37 }
 0xcd7   : > { %6355 = vpow2.f32 %v4607_v27  ;;  %v4492_v21 = vsub.f32 %v9882_v51, %v4424_v37 }
 0xcd8   : > { %6357 = vpow2.f32 %v4617_v34  ;;  %v4597_v63 = vmul.f32 1.442695, %v4485_v45  ;;  %v4599_v18 = vmul.f32 1.442695, %v4486_v54  ;;  %v4609_v57 = vmul.f32 1.442695, %v4491_v33 }
 0xcd9   : > { %6359 = vpow2.f32 %v4619_v43  ;;  %v4611_v56 = vmul.f32 1.442695, %v4492_v21  ;;  %v4418_v4 = vpop.xlane.xlu0 %4417 }
 0xcda   : > { %6361 = vpow2.f32 %v4597_v63  ;;  %v4487_v41 = vsub.f32 %v9883_v39, %v4418_v4  ;;  %v4488_v38 = vsub.f32 %v9884_v2, %v4418_v4 }
 0xcdb   : > { %v9061_v48 = vpop.eup %6341  ;;  %6363 = vpow2.f32 %v4599_v18 }
 0xcdc   : > { %v9063_v35 = vpop.eup %6343  ;;  %6365 = vpow2.f32 %v4609_v57  ;;  %v4601_v47 = vmul.f32 1.442695, %v4487_v41  ;;  %v4603_v27 = vmul.f32 1.442695, %v4488_v38 }
 0xcdd   : > { %6367 = vpow2.f32 %v4611_v56  ;;  %v4719_v34 = vadd.f32 %v9063_v35, %v9061_v48 }
 0xcde   : > { %6369 = vpow2.f32 %v4601_v47 }
 0xcdf   : > { %v9067_v43 = vpop.eup %6345  ;;  %6371 = vpow2.f32 %v4603_v27  ;;  %4720 = vadd.xlane.f32.xlu1 %v4719_v34 }
 0xce0   : > { %v9069_v40 = vpop.eup %6347 }
 0xce1   : > { %v9071_v37 = vpop.eup %6349  ;;  %v4713_v45 = vadd.f32 %v9069_v40, %v9067_v43 }
 0xce2   : > { %v9075_v59 = vpop.eup %6351 }
 0xce3   : > { %v9077_v54 = vpop.eup %6353  ;;  %4714 = vadd.xlane.f32.xlu1 %v4713_v45  ;;  %v4722_v33 = vadd.f32 %v9075_v59, %v9071_v37 }
 0xce4   : > { %9885 = vst [vmem:[#allocation62_spill] sm:$0xff] %v9077_v54  ;;  %v9081_v51 = vpop.eup %6355 }
 0xce5   : > { %9886 = vst [vmem:[#allocation43_spill] sm:$0xff] %v9081_v51  ;;  %v9083_v21 = vpop.eup %6357  ;;  %4723 = vadd.xlane.f32.xlu0 %v4722_v33  ;;  %v4707_v63 = vadd.f32 %v9081_v51, %v9077_v54 }
 0xce6   : > { %v9087_v18 = vpop.eup %6359 }
 0xce7   : > { %v9089_v57 = vpop.eup %6361  ;;  %4708 = vadd.xlane.f32.xlu1 %v4707_v63  ;;  %v4716_v56 = vadd.f32 %v9087_v18, %v9083_v21 }
 0xce8   : > { %9887 = vst [vmem:[#allocation33_spill] sm:$0xff] %v9089_v57  ;;  %v9093_v4 = vpop.eup %6363 }
 0xce9   : > { %9888 = vst [vmem:[#allocation32_spill] sm:$0xff] %v9093_v4  ;;  %v9095_v39 = vpop.eup %6365  ;;  %4717 = vadd.xlane.f32.xlu0 %v4716_v56  ;;  %v4701_v41 = vadd.f32 %v9093_v4, %v9089_v57 }
 0xcea   : > { %9889 = vst [vmem:[#allocation55_spill] sm:$0xff] %v9095_v39  ;;  %v9099_v2 = vpop.eup %6367 }
 0xceb   : > { %v9101_v38 = vpop.eup %6369  ;;  %4702 = vadd.xlane.f32.xlu1 %v4701_v41  ;;  %v4710_v47 = vadd.f32 %v9099_v2, %v9095_v39 }
 0xcec   : > { %9890 = vst [vmem:[#allocation53_spill] sm:$0xff] %v9101_v38  ;;  %v9105_v27 = vpop.eup %6371 }
 0xced   : > { %9891 = vst [vmem:[#allocation13_spill] sm:$0xff] %v9105_v27  ;;  %4711 = vadd.xlane.f32.xlu0 %v4710_v47  ;;  %v4704_v34 = vadd.f32 %v9105_v27, %v9101_v38 }
 0xcf1   : > { %4705 = vadd.xlane.f32.xlu0 %v4704_v34 }
 0xd28   : > { %v4673_v45 = vpop.xlane.xlu1 %4672 }
 0xd29   : > { %6373 = vrcp.f32 %v4673_v45 }
 0xd2c   : > { %v4409_v33 = vpop.xlane.xlu1 %4408 }
 0xd2d   : > { %v4481_v63 = vsub.f32 %v8843_v25, %v4409_v33  ;;  %v4482_v56 = vsub.f32 %v8845_v55, %v4409_v33 }
 0xd2e   : > { %v4676_v57 = vpop.xlane.xlu0 %4675 }
 0xd2f   : > { %v4589_v4 = vmul.f32 1.442695, %v4481_v63  ;;  %v4591_v41 = vmul.f32 1.442695, %v4482_v56  ;;  %6375 = vrcp.f32 %v4676_v57 }
 0xd30   : > { %v4667_v54 = vpop.xlane.xlu1 %4666 }
 0xd31   : > { %6377 = vpow2.f32 %v4589_v4 }
 0xd32   : > { %6379 = vpow2.f32 %v4591_v41  ;;  %v4412_v39 = vpop.xlane.xlu0 %4411 }
 0xd33   : > { %v4483_v47 = vsub.f32 %v8849_v28, %v4412_v39  ;;  %v4484_v38 = vsub.f32 %v8851_v11, %v4412_v39  ;;  %6381 = vrcp.f32 %v4667_v54 }
 0xd34   : > { %v4403_v34 = vpop.xlane.xlu1 %4402 }
 0xd35   : > { %v4593_v27 = vmul.f32 1.442695, %v4483_v47  ;;  %v4595_v45 = vmul.f32 1.442695, %v4484_v38  ;;  %v4477_v51 = vsub.f32 %v8827_v15, %v4403_v34  ;;  %v4478_v25 = vsub.f32 %v8829_v24, %v4403_v34 }
 0xd36   : > { %v4670_v55 = vpop.xlane.xlu0 %4669  ;;  %v6374_v63 = vpop.eup %6373 }
 0xd37   : > { %6383 = vpow2.f32 %v4593_v27  ;;  %v4581_v33 = vmul.f32 1.442695, %v4477_v51  ;;  %v4583_v57 = vmul.f32 1.442695, %v4478_v25  ;;  %v4786_v24 = vmul.f32 %v6374_v63, %v8915_v58 }
 0xd38   : > { %6385 = vpow2.f32 %v4595_v45  ;;  %v4661_v4 = vpop.xlane.xlu1 %4660 }
 0xd39   : > { %6387 = vpow2.f32 %v4581_v33 }
 0xd3a   : > { %6389 = vpow2.f32 %v4583_v57  ;;  %v4406_v28 = vpop.xlane.xlu0 %4405 }
 0xd3b   : > { %6391 = vrcp.f32 %v4670_v55  ;;  %v4479_v11 = vsub.f32 %v8835_v50, %v4406_v28  ;;  %v4480_v39 = vsub.f32 %v8837_v17, %v4406_v28  ;;  %v4785_v50 = vmul.f32 %v6374_v63, %v8912_v10 }
 0xd3c   : > { %v6376_v38 = vpop.eup %6375  ;;  %v4397_v15 = vpop.xlane.xlu1 %4396  ;;  %6393 = vrcp.f32 %v4661_v4 }
 0xd3d   : > { %v4585_v54 = vmul.f32 1.442695, %v4479_v11  ;;  %v4587_v56 = vmul.f32 1.442695, %v4480_v39  ;;  %v4473_v51 = vsub.f32 %v8811_v53, %v4397_v15  ;;  %v4474_v27 = vsub.f32 %v8813_v13, %v4397_v15 }
 0xd3e   : > { %v9120_v41 = vpop.eup %6377  ;;  %v4664_v47 = vpop.xlane.xlu0 %4663  ;;  %v4788_v34 = vmul.f32 %v6376_v38, %v8929_v49  ;;  %v4787_v17 = vmul.f32 %v6376_v38, %v8925_v29 }
 0xd3f   : > { %v9125_v45 = vpop.eup %6379  ;;  %6395 = vpow2.f32 %v4585_v54  ;;  %v4573_v58 = vmul.f32 1.442695, %v4473_v51  ;;  %v4575_v25 = vmul.f32 1.442695, %v4474_v27 }
 0xd40   : > { %6397 = vpow2.f32 %v4587_v56  ;;  %v4836_v55 = vpack.c.bf16 %v4788_v34, %v4786_v24  ;;  %v4655_v53 = vpop.xlane.xlu1 %4654  ;;  %v4835_v33 = vpack.c.bf16 %v4787_v17, %v4785_v50  ;;  %v4695_v13 = vadd.f32 %v9125_v45, %v9120_v41  ;;  %v6382_v10 = vpop.eup %6381 }
 0xd41   : > { %6399 = vpow2.f32 %v4573_v58  ;;  %v4781_v50 = vmul.f32 %v6382_v10, %v8921_v42 }
 0xd42   : > { %6401 = vpow2.f32 %v4575_v25  ;;  %4873 = vmatprep.subr.bf16.mxu0 %v4836_v55  ;;  %v4400_v49 = vpop.xlane.xlu0 %4399  ;;  %4696 = vadd.xlane.f32.xlu1 %v4695_v13 }
 0xd43   : > { %6403 = vrcp.f32 %v4664_v47  ;;  %4874 = vmatpush1.bf16.xpose.msra.mxu0 %v4835_v33  ;;  %v4475_v29 = vsub.f32 %v8819_v60, %v4400_v49  ;;  %v4476_v57 = vsub.f32 %v8821_v36, %v4400_v49  ;;  %v4782_v47 = vmul.f32 %v6382_v10, %v8923_v61 }
 0xd44   : > { %v9131_v4 = vpop.eup %6383  ;;  %v4391_v63 = vpop.xlane.xlu1 %4390  ;;  %6405 = vrcp.f32 %v4655_v53 }
 0xd45   : > { %v9133_v28 = vpop.eup %6385  ;;  %v4577_v11 = vmul.f32 1.442695, %v4475_v29  ;;  %v4579_v39 = vmul.f32 1.442695, %v4476_v57  ;;  %v4469_v38 = vsub.f32 %v9865_v46, %v4391_v63  ;;  %v4470_v15 = vsub.f32 %v9864_v0, %v4391_v63 }
 0xd46   : > { %v9137_v24 = vpop.eup %6387  ;;  %v4658_v54 = vpop.xlane.xlu0 %4657  ;;  %v4698_v60 = vadd.f32 %v9133_v28, %v9131_v4 }
 0xd47   : > { %v9141_v56 = vpop.eup %6389  ;;  %6407 = vpow2.f32 %v4577_v11  ;;  %v4565_v36 = vmul.f32 1.442695, %v4469_v38  ;;  %v4567_v51 = vmul.f32 1.442695, %v4470_v15 }
 0xd48   : > { %v6392_v27 = vpop.eup %6391  ;;  %6409 = vpow2.f32 %v4579_v39  ;;  %4699 = vadd.xlane.f32.xlu0 %v4698_v60  ;;  %v4649_v46 = vpop.xlane.xlu1 %4648  ;;  %v4689_v0 = vadd.f32 %v9141_v56, %v9137_v24 }
 0xd49   : > { %6411 = vpow2.f32 %v4565_v36  ;;  %v4784_v34 = vmul.f32 %v6392_v27, %v8943_v44  ;;  %v4783_v17 = vmul.f32 %v6392_v27, %v8939_v6  ;;  %v6394_v25 = vpop.eup %6393 }
 0xd4a   : > { %6413 = vpow2.f32 %v4567_v51  ;;  %v4394_v58 = vpop.xlane.xlu0 %4393  ;;  %4690 = vadd.xlane.f32.xlu1 %v4689_v0  ;;  %v4777_v38 = vmul.f32 %v6394_v25, %v8946_v9 }
 0xd4b   : > { %6415 = vrcp.f32 %v4658_v54  ;;  %v4834_v55 = vpack.c.bf16 %v4784_v34, %v4782_v47  ;;  %v4833_v53 = vpack.c.bf16 %v4783_v17, %v4781_v50  ;;  %v4471_v61 = vsub.f32 %v9868_v12, %v4394_v58 }
 0xd4c   : > { %v9150_v33 = vpop.eup %6395  ;;  %v4472_v13 = vsub.f32 %v9867_v8, %v4394_v58  ;;  %v4643_v49 = vpop.xlane.xlu1 %4642  ;;  %6417 = vrcp.f32 %v4649_v46  ;;  %v4778_v8 = vmul.f32 %v6394_v25, %v8951_v23 }
 0xd4d   : > { %v9153_v29 = vpop.eup %6397  ;;  %4875 = vmatprep.subr.bf16.mxu0 %v4834_v55  ;;  %v4569_v42 = vmul.f32 1.442695, %v4471_v61  ;;  %6419 = vrcp.f32 %v4643_v49 }
 0xd4e   : > { %v9155_v6 = vpop.eup %6399  ;;  %4876 = vmatpush1.bf16.xpose.msra.mxu0 %v4833_v53  ;;  %v4571_v44 = vmul.f32 1.442695, %v4472_v13  ;;  %v4652_v10 = vpop.xlane.xlu0 %4651  ;;  %v4692_v57 = vadd.f32 %v9153_v29, %v9150_v33 }
 0xd4f   : > { %v9159_v12 = vpop.eup %6401  ;;  %6421 = vpow2.f32 %v4569_v42 }
 0xd50   : > { %v6404_v63 = vpop.eup %6403  ;;  %6423 = vpow2.f32 %v4571_v44  ;;  %4693 = vadd.xlane.f32.xlu0 %v4692_v57  ;;  %v4683_v11 = vadd.f32 %v9159_v12, %v9155_v6  ;;  %v4637_v0 = vpop.xlane.xlu1 %4636 }
 0xd51   : > { %6425 = vrcp.f32 %v4652_v10  ;;  %v4780_v39 = vmul.f32 %v6404_v63, %v8967_v5  ;;  %v4779_v15 = vmul.f32 %v6404_v63, %v8962_v14  ;;  %v6406_v60 = vpop.eup %6405 }
 0xd52   : > { %v4646_v54 = vpop.xlane.xlu0 %4645  ;;  %4684 = vadd.xlane.f32.xlu1 %v4683_v11  ;;  %v4774_v34 = vmul.f32 %v6406_v60, %v8975_v7  ;;  %v4773_v58 = vmul.f32 %v6406_v60, %v8970_v22 }
 0xd53   : > { %v4832_v36 = vpack.c.bf16 %v4780_v39, %v4778_v8  ;;  %v4831_v51 = vpack.c.bf16 %v4779_v15, %v4777_v38  ;;  %6427 = vrcp.f32 %v4646_v54 }
 0xd54   : > { %v9167_v27 = vpop.eup %6407  ;;  %v4631_v63 = vpop.xlane.xlu1 %4630 }
 0xd55   : > { %v9169_v47 = vpop.eup %6409  ;;  %4877 = vmatprep.subr.bf16.mxu0 %v4832_v36 }
 0xd56   : > { %v9171_v23 = vpop.eup %6411  ;;  %4878 = vmatpush1.bf16.xpose.msra.mxu0 %v4831_v51  ;;  %v4640_v46 = vpop.xlane.xlu0 %4639  ;;  %v4686_v9 = vadd.f32 %v9169_v47, %v9167_v27 }
 0xd57   : > { %v9175_v5 = vpop.eup %6413  ;;  %6429 = vrcp.f32 %v4640_v46 }
 0xd58   : > { %v6416_v14 = vpop.eup %6415  ;;  %4687 = vadd.xlane.f32.xlu0 %v4686_v9  ;;  %v4677_v50 = vadd.f32 %v9175_v5, %v9171_v23  ;;  %6431 = vrcp.f32 %v4637_v0 }
 0xd59   : > { %v4776_v17 = vmul.f32 %v6416_v14, %v8989_v3  ;;  %v4775_v25 = vmul.f32 %v6416_v14, %v8984_v20  ;;  %v6418_v55 = vpop.eup %6417  ;;  %v4978_v14 = vld [vmem:[%s9356_s4 + $0x10] sm:$0xff] }
 0xd5a   : > { %4678 = vadd.xlane.f32.xlu1 %v4677_v50  ;;  %v6420_v53 = vpop.eup %6419  ;;  %v4634_v44 = vpop.xlane.xlu0 %4633  ;;  %v4770_v22 = vmul.f32 %v6418_v55, %v8995_v30  ;;  %v4769_v8 = vmul.f32 %v6418_v55, %v8991_v26  ;;  %v4976_v26 = vld [vmem:[%s9356_s4] sm:$0xff] }
 0xd5b   : > { %v4830_v61 = vpack.c.bf16 %v4776_v17, %v4774_v34  ;;  %v4829_v13 = vpack.c.bf16 %v4775_v25, %v4773_v58  ;;  %6433 = vrcp.f32 %v4634_v44  ;;  %v4766_v39 = vmul.f32 %v6420_v53, %v9003_v1  ;;  %v9892_v1 = vld [vmem:[#allocation51_spill] sm:$0xff]  ;;  %v9894_v17 = vld [vmem:[#allocation42_spill] sm:$0xff] }
 0xd5c   : > { %v9183_v49 = vpop.eup %6421  ;;  %6435 = vrcp.f32 %v4631_v63  ;;  %v4765_v51 = vmul.f32 %v6420_v53, %v9892_v1  ;;  %v4979_v25 = vld [vmem:[%s9356_s4 + $0x18] sm:$0xff]  ;;  %v9895_v53 = vld [vmem:[#allocation57_spill] sm:$0xff] }
 0xd5d   : > { %v9185_v42 = vpop.eup %6423  ;;  %4879 = vmatprep.subr.bf16.mxu0 %v4830_v61  ;;  %v9897_v63 = vld [vmem:[#allocation41_spill] sm:$0xff] }
 0xd5e   : > { %v6426_v7 = vpop.eup %6425  ;;  %4880 = vmatpush1.bf16.xpose.msra.mxu0 %v4829_v13  ;;  %v4680_v3 = vadd.f32 %v9185_v42, %v9183_v49 }
 0xd5f   : > { %v4772_v20 = vmul.f32 %v6426_v7, %v9009_v31  ;;  %v4771_v10 = vmul.f32 %v6426_v7, %v9005_v32  ;;  %v9896_v7 = vld [vmem:[#allocation56_spill] sm:$0xff] }
 0xd60   : > { %v6428_v57 = vpop.eup %6427  ;;  %4681 = vadd.xlane.f32.xlu0 %v4680_v3  ;;  %v4977_v3 = vld [vmem:[%s9356_s4 + $0x8] sm:$0xff] }
 0xd61   : > { %v4828_v11 = vpack.c.bf16 %v4772_v20, %v4770_v22  ;;  %v4768_v38 = vmul.f32 %v6428_v57, %v9021_v52  ;;  %v4827_v15 = vpack.c.bf16 %v4771_v10, %v4769_v8  ;;  %v4767_v60 = vmul.f32 %v6428_v57, %v9017_v16  ;;  %v9893_v52 = vld [vmem:[#allocation46_spill] sm:$0xff] }
 0xd63   : > { %4881 = vmatprep.subr.bf16.mxu0 %v4828_v11  ;;  %v4826_v54 = vpack.c.bf16 %v4768_v38, %v4766_v39  ;;  %v4825_v9 = vpack.c.bf16 %v4767_v60, %v4765_v51  ;;  %v9898_v11 = vld [vmem:[#allocation54_spill] sm:$0xff] }
 0xd64   : > { %v6430_v30 = vpop.eup %6429 }
 0xd65   : > { %v6432_v31 = vpop.eup %6431  ;;  %v4764_v36 = vmul.f32 %v6430_v30, %v9033_v19  ;;  %v4763_v58 = vmul.f32 %v6430_v30, %v9894_v17  ;;  %v9900_v17 = vld [vmem:[#allocation55_spill] sm:$0xff] }
 0xd66   : > { %4882 = vmatpush1.bf16.xpose.msra.mxu0 %v4827_v15  ;;  %v4762_v46 = vmul.f32 %v6432_v31, %v9893_v52  ;;  %v4761_v61 = vmul.f32 %v6432_v31, %v9895_v53  ;;  %v9902_v53 = vld [vmem:[#allocation62_spill] sm:$0xff] }
 0xd67   : > { %4883 = vmatprep.subr.bf16.mxu0 %v4826_v54 }
 0xd68   : > { %v4721_v32 = vpop.xlane.xlu1 %4720  ;;  %v4824_v0 = vpack.c.bf16 %v4764_v36, %v4762_v46  ;;  %v6434_v34 = vpop.eup %6433  ;;  %v4823_v22 = vpack.c.bf16 %v4763_v58, %v4761_v61 }
 0xd69   : > { %6437 = vrcp.f32 %v4721_v32  ;;  %v6436_v19 = vpop.eup %6435  ;;  %v4760_v55 = vmul.f32 %v6434_v34, %v9043_v62  ;;  %v4759_v62 = vmul.f32 %v6434_v34, %v9897_v63 }
 0xd6a   : > { %v4758_v44 = vmul.f32 %v6436_v19, %v9896_v7  ;;  %v4757_v39 = vmul.f32 %v6436_v19, %v9898_v11 }
 0xd6b   : > { %4982 = vperm.xlu1 %5670, %v4976_v26  }
 0xd6c   : > { %v4715_v16 = vpop.xlane.xlu1 %4714  ;;  %v4822_v20 = vpack.c.bf16 %v4760_v55, %v4758_v44  ;;  %v4821_v15 = vpack.c.bf16 %v4759_v62, %v4757_v39 }
 0xd6e   : > { %4884 = vmatpush1.bf16.xpose.msra.mxu0 %v4825_v9  ;;  %v4724_v50 = vpop.xlane.xlu0 %4723 }
 0xd6f   : > { %4885 = vmatprep.subr.bf16.mxu0 %v4824_v0  ;;  %6439 = vrcp.f32 %v4724_v50  ;;  %4992 = vperm.xlu1 %5670, %v4978_v14  }
 0xd70   : > { %6441 = vrcp.f32 %v4715_v16  ;;  %v4709_v57 = vpop.xlane.xlu1 %4708 }
 0xd72   : > { %v4718_v13 = vpop.xlane.xlu0 %4717 }
 0xd73   : > { %6443 = vrcp.f32 %v4718_v13  ;;  %4997 = vperm.xlu1 %5670, %v4979_v25   ;;  %v9901_v25 = vld [vmem:[#allocation13_spill] sm:$0xff]  ;;  %v9903_v13 = vld [vmem:[#allocation32_spill] sm:$0xff] }
 0xd74   : > { %v4703_v1 = vpop.xlane.xlu1 %4702 }
 0xd76   : > { %4886 = vmatpush1.bf16.xpose.msra.mxu0 %v4823_v22  ;;  %4987 = vperm.xlu0 %5669, %v4977_v3   ;;  %v4712_v10 = vpop.xlane.xlu0 %4711  ;;  %v6438_v8 = vpop.eup %6437  ;;  %v9905_v3 = vld [vmem:[#allocation33_spill] sm:$0xff] }
 0xd77   : > { %4887 = vmatprep.subr.bf16.mxu0 %v4822_v20  ;;  %6445 = vrcp.f32 %v4712_v10  ;;  %v4818_v54 = vmul.f32 %v6438_v8, %v9063_v35  ;;  %v4817_v51 = vmul.f32 %v6438_v8, %v9061_v48  ;;  %v9899_v48 = vld [vmem:[#allocation43_spill] sm:$0xff] }
 0xd78   : > { %6447 = vrcp.f32 %v4709_v57 }
 0xd7a   : > { %v4706_v32 = vpop.xlane.xlu0 %4705 }
 0xd7b   : > { %6449 = vrcp.f32 %v4706_v32 }
 0xd7c   : > { %v6440_v38 = vpop.eup %6439  ;;  %6451 = vrcp.f32 %v4703_v1 }
 0xd7d   : > { %v4820_v30 = vmul.f32 %v6440_v38, %v9075_v59  ;;  %v6442_v31 = vpop.eup %6441  ;;  %v4819_v60 = vmul.f32 %v6440_v38, %v9071_v37 }
 0xd7e   : > { %4888 = vmatpush1.bf16.xpose.msra.mxu0 %v4821_v15  ;;  %v4814_v52 = vmul.f32 %v6442_v31, %v9069_v40  ;;  %v4813_v34 = vmul.f32 %v6442_v31, %v9067_v43  ;;  %v9904_v43 = vld [vmem:[#allocation53_spill] sm:$0xff] }
 0xd7f   : > { %v4852_v26 = vpack.c.bf16 %v4820_v30, %v4818_v54  ;;  %v4851_v9 = vpack.c.bf16 %v4819_v60, %v4817_v51 }
 0xd80   : > { %v6444_v36 = vpop.eup %6443 }
 0xd81   : > { %4889 = vmatprep.subr.bf16.mxu0 %v4852_v26  ;;  %v4816_v46 = vmul.f32 %v6444_v36, %v9087_v18  ;;  %v4815_v37 = vmul.f32 %v6444_v36, %v9083_v21 }
 0xd83   : > { %v4850_v35 = vpack.c.bf16 %v4816_v46, %v4814_v52  ;;  %v4849_v50 = vpack.c.bf16 %v4815_v37, %v4813_v34 }
 0xd84   : > { %v6446_v59 = vpop.eup %6445 }
 0xd85   : > { %v6448_v14 = vpop.eup %6447  ;;  %v4812_v0 = vmul.f32 %v6446_v59, %v9099_v2  ;;  %v4811_v58 = vmul.f32 %v6446_v59, %v9900_v17 }
 0xd86   : > { %4890 = vmatpush2.bf16.xpose.msra.mxu0 %v4851_v9  ;;  %v4810_v16 = vmul.f32 %v6448_v14, %v9899_v48  ;;  %v4809_v61 = vmul.f32 %v6448_v14, %v9902_v53 }
 0xd87   : > { %4891 = vmatprep.subr.bf16.mxu0 %v4850_v35 }
 0xd88   : > { %v4848_v19 = vpack.c.bf16 %v4812_v0, %v4810_v16  ;;  %v6450_v40 = vpop.eup %6449  ;;  %v4847_v7 = vpack.c.bf16 %v4811_v58, %v4809_v61  ;;  %v9911_v58 = vld [vmem:[#allocation17_spill] sm:$0xff] }
 0xd89   : > { %v6452_v18 = vpop.eup %6451  ;;  %v4808_v55 = vmul.f32 %v6450_v40, %v9901_v25  ;;  %v4807_v44 = vmul.f32 %v6450_v40, %v9904_v43  ;;  %v9908_v40 = vld [vmem:[#allocation12_spill] sm:$0xff] }
 0xd8a   : > { %v4806_v21 = vmul.f32 %v6452_v18, %v9903_v13  ;;  %v4805_v22 = vmul.f32 %v6452_v18, %v9905_v3  ;;  %v9909_v18 = vld [vmem:[#allocation11_spill] sm:$0xff] }
 0xd8b   : > { %v9910_v17 = vpack.c.bf16 %v9908_v40, %v9909_v18 }
 0xd8c   : > { %v4846_v2 = vpack.c.bf16 %v4808_v55, %v4806_v21  ;;  %v4845_v20 = vpack.c.bf16 %v4807_v44, %v4805_v22  ;;  %v9915_v22 = vld [vmem:[#allocation65_spill] sm:$0xff] }
 0xd8e   : > { %4892 = vmatpush2.bf16.xpose.msra.mxu0 %v4849_v50 }
 0xd8f   : > { %4893 = vmatprep.subr.bf16.mxu0 %v4848_v19 }
 0xd96   : > { %4894 = vmatpush2.bf16.xpose.msra.mxu0 %v4847_v7 }
 0xd97   : > { %4895 = vmatprep.subr.bf16.mxu0 %v4846_v2 }
 0xd9e   : > { %4896 = vmatpush2.bf16.xpose.msra.mxu0 %v4845_v20  ;;  %v9916_v20 = vld [vmem:[#allocation59_spill] sm:$0xff] }
 0xdcb   : > { %v4697_v10 = vpop.xlane.xlu1 %4696 }
 0xdcc   : > { %6453 = vrcp.f32 %v4697_v10  ;;  %v9917_v10 = vpack.c.bf16 %v9915_v22, %v9916_v20 }
 0xdd1   : > { %v4700_v57 = vpop.xlane.xlu0 %4699 }
 0xdd2   : > { %6455 = vrcp.f32 %v4700_v57  ;;  %v9918_v57 = vld [vmem:[#allocation37_spill] sm:$0xff] }
 0xdd3   : > { %v4691_v63 = vpop.xlane.xlu1 %4690 }
 0xdd4   : > { %6457 = vrcp.f32 %v4691_v63  ;;  %v9919_v63 = vld [vmem:[#allocation66_spill] sm:$0xff] }
 0xdd9   : > { %v4694_v62 = vpop.xlane.xlu0 %4693  ;;  %v6454_v8 = vpop.eup %6453 }
 0xdda   : > { %6459 = vrcp.f32 %v4694_v62  ;;  %v4802_v38 = vmul.f32 %v6454_v8, %v9125_v45  ;;  %v4801_v54 = vmul.f32 %v6454_v8, %v9120_v41  ;;  %v9920_v62 = vpack.c.bf16 %v9918_v57, %v9919_v63  ;;  %v9921_v8 = vld [vmem:[#allocation58_spill] sm:$0xff] }
 0xddb   : > { %v4685_v11 = vpop.xlane.xlu1 %4684 }
 0xddc   : > { %6461 = vrcp.f32 %v4685_v11  ;;  %v9922_v11 = vld [vmem:[#allocation39_spill] sm:$0xff] }
 0xddf   : > { %v6456_v39 = vpop.eup %6455 }
 0xde0   : > { %v4804_v15 = vmul.f32 %v6456_v39, %v9133_v28  ;;  %v4803_v30 = vmul.f32 %v6456_v39, %v9131_v4  ;;  %v9923_v39 = vpack.c.bf16 %v9921_v8, %v9922_v11 }
 0xde1   : > { %v4688_v31 = vpop.xlane.xlu0 %4687  ;;  %v6458_v26 = vpop.eup %6457 }
 0xde2   : > { %6463 = vrcp.f32 %v4688_v31  ;;  %v4844_v32 = vpack.c.bf16 %v4804_v15, %v4802_v38  ;;  %v4843_v60 = vpack.c.bf16 %v4803_v30, %v4801_v54  ;;  %v4798_v51 = vmul.f32 %v6458_v26, %v9141_v56  ;;  %v9924_v38 = vld [vmem:[#allocation44_spill] sm:$0xff] }
 0xde3   : > { %v4679_v36 = vpop.xlane.xlu1 %4678  ;;  %v4797_v28 = vmul.f32 %v6458_v26, %v9137_v24  ;;  %v9925_v15 = vld [vmem:[#allocation52_spill] sm:$0xff]  ;;  %v9931_v26 = vld [vmem:[#allocation19_spill] sm:$0xff] }
 0xde4   : > { %4897 = vmatprep.subr.bf16.mxu0 %v4844_v32  ;;  %6465 = vrcp.f32 %v4679_v36  ;;  %v9926_v54 = vpack.c.bf16 %v9924_v38, %v9925_v15  ;;  %v9927_v30 = vld [vmem:[#allocation60_spill] sm:$0xff] }
 0xde5   : > { %4898 = vmatpush2.bf16.xpose.msra.mxu0 %v4843_v60  ;;  %v9928_v31 = vld [vmem:[#allocation20_spill] sm:$0xff]  ;;  %v9930_v60 = vld [vmem:[#allocation22_spill] sm:$0xff] }
 0xde6   : > { %v9929_v32 = vpack.c.bf16 %v9927_v30, %v9928_v31  ;;  %v9932_v36 = vpack.c.bf16 %v9930_v60, %v9931_v26 }
 0xde7   : > { %v6460_v1 = vpop.eup %6459 }
 0xde8   : > { %v4800_v45 = vmul.f32 %v6460_v1, %v9153_v29  ;;  %v4799_v41 = vmul.f32 %v6460_v1, %v9150_v33  ;;  %v9933_v1 = vld [vmem:[#allocation21_spill] sm:$0xff] }
 0xde9   : > { %v4682_v52 = vpop.xlane.xlu0 %4681  ;;  %v6462_v9 = vpop.eup %6461 }
 0xdea   : > { %6467 = vrcp.f32 %v4682_v52  ;;  %v4842_v4 = vpack.c.bf16 %v4800_v45, %v4798_v51  ;;  %v4841_v46 = vpack.c.bf16 %v4799_v41, %v4797_v28  ;;  %v4794_v59 = vmul.f32 %v6462_v9, %v9159_v12  ;;  %v9934_v51 = vld [vmem:[#allocation18_spill] sm:$0xff]  ;;  %v9936_v28 = vld [vmem:[#allocation7_spill] sm:$0xff] }
 0xdeb   : > { %v4793_v56 = vmul.f32 %v6462_v9, %v9155_v6  ;;  %v9906_v6 = vld [vmem:[#allocation14_spill] sm:$0xff]  ;;  %v9935_v45 = vpack.c.bf16 %v9933_v1, %v9934_v51 }
 0xdec   : > { %4899 = vmatprep.subr.bf16.mxu0 %v4842_v4  ;;  %v9937_v41 = vld [vmem:[#allocation10_spill] sm:$0xff]  ;;  %v9938_v4 = vld [vmem:[#allocation36_spill] sm:$0xff] }
 0xded   : > { %4900 = vmatpush2.bf16.xpose.msra.mxu0 %v4841_v46  ;;  %v5614_v52 = vpack.c.bf16 %v9937_v41, %v9936_v28  ;;  %v9939_v46 = vld [vmem:[#allocation16_spill] sm:$0xff] }
 0xdee   : > { %v9940_v9 = vpack.c.bf16 %v9938_v4, %v9939_v46 }
 0xdef   : > { %v6464_v35 = vpop.eup %6463 }
 0xdf0   : > { %v4796_v14 = vmul.f32 %v6464_v35, %v9169_v47  ;;  %v4795_v29 = vmul.f32 %v6464_v35, %v9167_v27  ;;  %v9907_v27 = vld [vmem:[#allocation15_spill] sm:$0xff]  ;;  %v9941_v35 = vld [vmem:[#allocation34_spill] sm:$0xff] }
 0xdf1   : > { %v6466_v33 = vpop.eup %6465  ;;  %v5610_v19 = vpack.c.bf16 %v9907_v27, %v9906_v6  ;;  %v4988_v27 = vpop.permute.xlu0 %4987 }
 0xdf2   : > { %v4840_v37 = vpack.c.bf16 %v4796_v14, %v4794_v59  ;;  %v4839_v24 = vpack.c.bf16 %v4795_v29, %v4793_v56  ;;  %v4790_v34 = vmul.f32 %v6466_v33, %v9175_v5  ;;  %v4789_v16 = vmul.f32 %v6466_v33, %v9171_v23  ;;  %v9912_v5 = vld [vmem:[#allocation61_spill] sm:$0xff]  ;;  %v9942_v59 = vld [vmem:[#allocation31_spill] sm:$0xff]  ;;  %v9943_v56 = vld [vmem:[#allocation8_spill] sm:$0xff] }
 0xdf3   : > { %v9913_v25 = vpack.c.bf16 %v9911_v58, %v9912_v5  ;;  %v5612_v14 = vpack.c.bf16 %v9942_v59, %v9941_v35  ;;  %v9944_v29 = vld [vmem:[#allocation9_spill] sm:$0xff] }
 0xdf4   : > { %4901 = vmatprep.subr.bf16.mxu0 %v4840_v37  ;;  %v9945_v37 = vpack.c.bf16 %v9943_v56, %v9944_v29  ;;  %v9946_v33 = vld [vmem:[#allocation45_spill] sm:$0xff] }
 0xdf5   : > { %4902 = vmatpush2.bf16.xpose.msra.mxu0 %v4839_v24  ;;  %v5695_v24 = vld [vmem:[%s9355_s3] sm:$0xff]  }
 0xdf7   : > { %v6468_v0 = vpop.eup %6467 }
 0xdf8   : > { %v4792_v48 = vmul.f32 %v6468_v0, %v9185_v42  ;;  %v4791_v12 = vmul.f32 %v6468_v0, %v9183_v49  ;;  %v9914_v42 = vmov 0   ;;  %v9947_v0 = vld [vmem:[#allocation35_spill] sm:$0xff] }
 0xdfa   : > { %v4838_v50 = vpack.c.bf16 %v4792_v48, %v4790_v34  ;;  %v4837_v47 = vpack.c.bf16 %v4791_v12, %v4789_v16  ;;  %v9948_v34 = vpack.c.bf16 %v9946_v33, %v9947_v0  ;;  %v5696_v48 = vld [vmem:[%s9355_s3 + $0x8] sm:$0xff]   ;;  %v4983_v16 = vpop.permute.xlu1 %4982 }
 0xdfc   : > { %4903 = vmatprep.subr.bf16.mxu0 %v4838_v50 }
 0xdfd   : > { %4904 = vmatpush2.bf16.xpose.msra.mxu0 %v4837_v47 }
 0xdfe   : > { %v4993_v18 = vpop.permute.xlu1 %4992 }
 0xe04   : > { %4906 = vmatmul.mubr.bf16.vlgmr.msra.gmra.mxu0 %v9910_v17 }
 0xe05   : > { %4915 = vmatprep.mubr.bf16.mxu0 %v5610_v19 }
 0xe0c   : > { %4916 = vmatmul.mubr.bf16.gmra.mxu0 %v9913_v25 }
 0xe0d   : > { %5124 = vmatprep.mubr.bf16.mxu0 %v9914_v42 }
 0xec4   : > { %v4907_v23 = vpop.f32.mrf.mxu0 }
 0xec6   : > { %v4909_v49 = vpop.f32.mrf.mxu0 }
 0xec8   : > { %v4911_v55 = vpop.f32.mrf.mxu0 }
 0xec9   : > { %v5623_v3 = vpack.c.bf16 %v4911_v55, %v4907_v23 }
 0xeca   : > { %v4913_v53 = vpop.f32.mrf.mxu0 }
 0xecb   : > { %v5624_v44 = vpack.c.bf16 %v4913_v53, %v4909_v49  ;;  %v4998_v49 = vpop.permute.xlu1 %4997 }
 0xecc   : > { %v4917_v61 = vpop.f32.mrf.mxu0 }
 0xece   : > { %v4919_v13 = vpop.f32.mrf.mxu0 }
 0xed0   : > { %v4921_v21 = vpop.f32.mrf.mxu0 }
 0xed1   : > { %v5625_v43 = vpack.c.bf16 %v4921_v21, %v4917_v61 }
 0xed2   : > { %v4923_v7 = vpop.f32.mrf.mxu0 }
 0xed3   : > { %v5626_v2 = vpack.c.bf16 %v4923_v7, %v4919_v13 }
 0xed5   : > { %5092 = vmatprep.subr.bf16.mxu0 %v5626_v2 }
 0xed6   : > { %5093 = vmatpush1.bf16.msra.mxu0 %v5625_v43 }
 0xed7   : > { %5094 = vmatprep.subr.bf16.mxu0 %v5624_v44 }
 0xeda   : > { %5095 = vmatpush1.bf16.msra.mxu0 %v5623_v3 }
 0xedb   : > { %5096 = vmatprep.subr.bf16.mxu0 %v9917_v10 }
 0xede   : > { %5097 = vmatpush1.bf16.msra.mxu0 %v9920_v62 }
 0xedf   : > { %5098 = vmatprep.subr.bf16.mxu0 %v9923_v39 }
 0xee2   : > { %5099 = vmatpush1.bf16.msra.mxu0 %v9926_v54 }
 0xee3   : > { %5100 = vmatprep.subr.bf16.mxu0 %v9929_v32 }
 0xee6   : > { %5101 = vmatpush1.bf16.msra.mxu0 %v9932_v36 }
 0xee7   : > { %5102 = vmatprep.subr.bf16.mxu0 %v9935_v45 }
 0xeea   : > { %5103 = vmatpush1.bf16.msra.mxu0 %v9940_v9 }
 0xeeb   : > { %5104 = vmatprep.subr.bf16.mxu0 %v5614_v52 }
 0xeee   : > { %5105 = vmatpush1.bf16.msra.mxu0 %v9945_v37 }
 0xeef   : > { %5106 = vmatprep.subr.bf16.mxu0 %v5612_v14 }
 0xef2   : > { %5107 = vmatpush1.bf16.msra.mxu0 %v9948_v34 }
 0xef5   : > { %5125 = vmatmul.mubr.bf16.vlgmr.msra.gmra.mxu0 %v5695_v24 }
 0xef6   : > { %5134 = vmatprep.mubr.bf16.mxu0 %v9914_v42 }
 0xefd   : > { %5135 = vmatmul.mubr.bf16.gmra.mxu0 %v5696_v48 }
 0xfb5   : > { %v5126_v12 = vpop.f32.mrf.mxu0 }
 0xfb6   : > { %v5127_v50 = vadd.f32 %v5126_v12, %v4983_v16 }
 0xfb7   : > { %v5128_v47 = vpop.f32.mrf.mxu0 }
 0xfb8   : > { %5145 = vst [vmem:[%s217_s16] sm:$0xff] %v5127_v50  ;;  %v5129_v6 = vadd.f32 %v5128_v47, %v4983_v16 }
 0xfb9   : > { %v5130_v19 = vpop.f32.mrf.mxu0 }
 0xfba   : > { %5146 = vst [vmem:[%s217_s16 + $0x8] sm:$0xff] %v5129_v6  ;;  %v5131_v40 = vadd.f32 %v5130_v19, %v4988_v27 }
 0xfbb   : > { %v5132_v17 = vpop.f32.mrf.mxu0 }
 0xfbc   : > { %5147 = vst [vmem:[%s217_s16 + $0x10] sm:$0xff] %v5131_v40  ;;  %v5133_v58 = vadd.f32 %v5132_v17, %v4988_v27 }
 0xfbd   : > { %v5136_v5 = vpop.f32.mrf.mxu0 }
 0xfbe   : > { %5148 = vst [vmem:[%s217_s16 + $0x18] sm:$0xff] %v5133_v58  ;;  %v5137_v25 = vadd.f32 %v5136_v5, %v4993_v18 }
 0xfbf   : > { %v5138_v42 = vpop.f32.mrf.mxu0 }
 0xfc0   : > { %5149 = vst [vmem:[%s217_s16 + $0x20] sm:$0xff] %v5137_v25  ;;  %v5139_v23 = vadd.f32 %v5138_v42, %v4993_v18 }
 0xfc1   : > { %v5140_v55 = vpop.f32.mrf.mxu0 }
 0xfc2   : > { %5150 = vst [vmem:[%s217_s16 + $0x28] sm:$0xff] %v5139_v23  ;;  %v5141_v53 = vadd.f32 %v5140_v55, %v4998_v49 }
 0xfc3   : > { %v5142_v61 = vpop.f32.mrf.mxu0 }
 0xfc4   : > { %5151 = vst [vmem:[%s217_s16 + $0x30] sm:$0xff] %v5141_v53  ;;  %v5143_v13 = vadd.f32 %v5142_v61, %v4998_v49 }
 0xfc6   : > { %5152 = vst [vmem:[%s217_s16 + $0x38] sm:$0xff] %v5143_v13 }
 0xfc7   : > { %6482 = shalt.err (!%p6479_p3)
}
 0xfc8   : > { %s6483_s10 = scalar_lea.hbm %s9306_s30, 1024  ;;  %s6487_s13 = scalar_lea.hbm %s9357_s5, 2048 }
 0xfc9   : > { %p6484_p4 = scmp.ne.s32.totalorder %s9306_s30, %s6483_s10  ;;  %p6488_p9 = scmp.lt.s32.totalorder %s9306_s30, %s9357_s5 }
 0xfca   : > { %p6489_p10 = scmp.lt.s32.totalorder %s6487_s13, %s6483_s10 }
 0xfcb   : > { %p6485_p7 = pnand %p6484_p4, %p6603_p5 }
 0xfcc   : > { %p6490_p11 = por %p6489_p10, %p6488_p9 }
 0xfcd   : > { %p6486_p8 = pneg %p6485_p7 }
 0xfcf   : > { %p6491_p12 = pnand %p6490_p11, %p6486_p8 }
 0xfd1   : > { %6494 = shalt.err (!%p6491_p12)
}
 0xfd2   : > { %s6533_s16 = smov 256   ;;  %s6534_s17 = smov 16  }
 0xfd3   : > { %5627 = dma.vmem_to_hbm [thread:$0]  (%p6603_p5), %s9308_s23, 1024, %s9306_s30, %s9312_s22, %s6533_s16, %s6533_s16, %s6534_s17  }
 0xfd4 PF: > { %p5633_p13 = scmp.ge.s32.totalorder %s6529_s21, 2  ;;  %s5182_s25 = sand.u32 1, %s6517_s18  }
 0xfd5   : > { %s5183_s26 = scalar_lea.sflag [#allocation5], %s5182_s25 }
 0xfd6   : > { %p5630_p0 = pnand %p5633_p13, %p6607_p6 }
 0xfd8   : > { %p5631_p1 = pneg %p5630_p0 }
 0xfda   : > { %6512 = dma.done.wait (%p5631_p1), %s5183_s26, 1024  }
 0xfdb   : > { %6514 = vsyncadd (%p5631_p1), %s5183_s26, 4294966272  ;;  %p15_p2 = scmp.ge.s32.totalorder %s6590_s24, 4   ;;  %s9949_s18 = smov %s6521_s19 }
 0xfdc   : > { %s9950_s19 = smov %s6525_s20  ;;  %s9951_s20 = smov %s6601_s27 }
 0xfdd   : > { %s9952_s21 = smov %s6590_s24  ;;  %17 = sbr.rel (!%p15_p2) target bundleno = 3 (0x3), region = 91 }
 0xfe2   :  { %5188 = vsyncpa [#allocation5], 1 }
 0xfe3   :  { %5190 = vsyncpa [#allocation5 + $0x1], 1 }

</bundles_post_ra>
